<compile_context>
chip_gen: v6e
topology: v6e:2x2x1
jax: 0.10.0
libtpu: 0.0.40
codegen_flags: <defaults>
</compile_context>

<pallas_src>
import functools

import jax
import jax.numpy as jnp
from jax.experimental import pallas as pl
from jax.experimental.pallas import tpu as pltpu


# ----------------------------- Pallas kernels -----------------------------

def _conv_bn_relu_kernel(a_ref, w_ref, g_ref, b_ref, o_ref):
    """One K-chunk of conv-as-GEMM; BN(batch stats) + ReLU epilogue at the end.

    a_ref: [tk, M] activation chunk (f32 or bf16; cast to bf16 here),
    w_ref: [1, Cout, tk] f32 weight chunk,
    o_ref: [Cout, M] f32 -- lane-dense output, doubles as the K accumulator.
    """
    kk = pl.program_id(0)

    @pl.when(kk == 0)
    def _init():
        o_ref[...] = jnp.zeros_like(o_ref)

    w = w_ref[0].astype(jnp.bfloat16)                 # [Cout, tk]
    a = a_ref[...].astype(jnp.bfloat16)               # [tk, M]  (VPU cast, f32 path)
    o_ref[...] += jnp.dot(w, a, preferred_element_type=jnp.float32)

    @pl.when(kk == pl.num_programs(0) - 1)
    def _finalize():
        y = o_ref[...]                                # [Cout, M]
        # BatchNorm2d, training-mode semantics: biased variance over all M
        # positions.  Reductions are over the lane axis (XLU).
        mean = jnp.mean(y, axis=-1, keepdims=True)
        var = jnp.mean(jnp.square(y - mean), axis=-1, keepdims=True)
        scale = g_ref[...] * jax.lax.rsqrt(var + 1e-5)
        bias = b_ref[...] - mean * scale
        o_ref[...] = jnp.maximum(y * scale + bias, 0.0)


def conv_bn_relu_gemm(a, w_oc_k, gamma, beta):
    """a: [K, M] (f32 or bf16), w_oc_k: [Cout, K] f32 -> relu(BN(w @ a)) [Cout, M].

    For the large im2col GEMMs (K >= 64) the reduction axis is split into two
    grid steps (pipelined DMA of the second chunk overlaps the first dot);
    for the tiny 1x1 convs a single step is used.
    """
    K, M = a.shape
    cout = w_oc_k.shape[0]
    if K >= 64:
        kp = ((K + 31) // 32) * 32       # tk multiple of 16 (bf16 sublane tile)
        nk, tk = 2, kp // 2 if False else (2, kp // 2)[1]  # noqa: keep explicit below
        nk = 2
        tk = kp // 2
        if kp != K:                       # zero K-padding: exact (adds nothing)
            a = jnp.pad(a, ((0, kp - K), (0, 0)))
            w_oc_k = jnp.pad(w_oc_k, ((0, 0), (0, kp - K)))
    else:
        kp, nk, tk = K, 1, K
    # Weight chunks as [nk, Cout, tk] so the K tiling never violates the
    # (8,128) block rule and the in-kernel dot stays in canonical (m,k)x(k,n).
    w3 = jnp.transpose(w_oc_k.astype(jnp.float32).reshape(cout, nk, tk), (1, 0, 2))
    g = gamma.reshape(cout, 1).astype(jnp.float32)
    b = beta.reshape(cout, 1).astype(jnp.float32)
    return pl.pallas_call(
        _conv_bn_relu_kernel,
        out_shape=jax.ShapeDtypeStruct((cout, M), jnp.float32),
        grid=(nk,),
        in_specs=[pl.BlockSpec((tk, M), lambda k: (k, 0)),
                  pl.BlockSpec((1, cout, tk), lambda k: (k, 0, 0)),
                  pl.BlockSpec((cout, 1), lambda k: (0, 0)),
                  pl.BlockSpec((cout, 1), lambda k: (0, 0))],
        out_specs=pl.BlockSpec((cout, M), lambda k: (0, 0)),
        compiler_params=pltpu.CompilerParams(
            dimension_semantics=("arbitrary",)),
    )(a, w3, g, b)


def _transition_avgpool_kernel(a0_ref, a1_ref, a2_ref, a3_ref,
                               w_ref, g_ref, b_ref, o_ref):
    """Fused transition: 1x1 conv -> BN(batch stats, pre-pool) -> ReLU -> 2x2 avg pool.

    a{t}_ref: [Cin, Mp] f32 -- the four stride-2 spatial phases (Mp = N*Ho*Wo),
    w_ref: [Cout, Cin] f32, o_ref: [Cout, Mp] f32 (lane-dense, pooled).
    """
    w = w_ref[...].astype(jnp.bfloat16)
    refs = (a0_ref, a1_ref, a2_ref, a3_ref)
    ys = [jnp.dot(w, r[...].astype(jnp.bfloat16), preferred_element_type=jnp.float32)
          for r in refs]                                        # 4 x [Cout, Mp]
    inv_cnt = 1.0 / (4.0 * ys[0].shape[-1])                     # stats over all N*H*W
    mean = (jnp.sum(ys[0], axis=-1, keepdims=True) +
            jnp.sum(ys[1], axis=-1, keepdims=True) +
            jnp.sum(ys[2], axis=-1, keepdims=True) +
            jnp.sum(ys[3], axis=-1, keepdims=True)) * inv_cnt
    var = (jnp.sum(jnp.square(ys[0] - mean), axis=-1, keepdims=True) +
           jnp.sum(jnp.square(ys[1] - mean), axis=-1, keepdims=True) +
           jnp.sum(jnp.square(ys[2] - mean), axis=-1, keepdims=True) +
           jnp.sum(jnp.square(ys[3] - mean), axis=-1, keepdims=True)) * inv_cnt
    scale = g_ref[...] * jax.lax.rsqrt(var + 1e-5)
    bias = b_ref[...] - mean * scale
    acc = (jnp.maximum(ys[0] * scale + bias, 0.0) +
           jnp.maximum(ys[1] * scale + bias, 0.0) +
           jnp.maximum(ys[2] * scale + bias, 0.0) +
           jnp.maximum(ys[3] * scale + bias, 0.0))
    o_ref[...] = 0.25 * acc                                     # AvgPool2d(2)


def _maxpool_3x3_s2_kernel(p00_ref, p01_ref, p10_ref, p11_ref, o_ref):
    """Max pool k=3, s=2, p=1 from the four stride-2 phase planes.

    p{dh}{dw}_ref: [C, N, Ho+1, Wo+1] f32 with one -inf row/col of padding at
    index 0, where p[dh][dw][c, n, i+1, j+1] = x[c, n, 2i+dh, 2j+dw].
    """
    p00 = p00_ref[...]
    p01 = p01_ref[...]
    p10 = p10_ref[...]
    p11 = p11_ref[...]
    # rows {2ho, 2ho+1}, cols {2wo, 2wo+1}
    home = jnp.maximum(jnp.maximum(p00[:, :, 1:, 1:], p01[:, :, 1:, 1:]),
                       jnp.maximum(p10[:, :, 1:, 1:], p11[:, :, 1:, 1:]))
    # row 2ho-1, cols {2wo, 2wo+1}
    up = jnp.maximum(p10[:, :, :-1, 1:], p11[:, :, :-1, 1:])
    # rows {2ho, 2ho+1}, col 2wo-1
    left = jnp.maximum(p01[:, :, 1:, :-1], p11[:, :, 1:, :-1])
    # row 2ho-1, col 2wo-1
    corner = p11[:, :, :-1, :-1]
    o_ref[...] = jnp.maximum(jnp.maximum(home, up), jnp.maximum(left, corner))


def _gap_fc_softmax_kernel(x_ref, w_ref, b_ref, o_ref):
    """Global 7x7 average pool + Linear + softmax, fused.  x_ref: [C, N, S]."""
    xm = jnp.mean(x_ref[...], axis=-1)                          # [C, N] (lane reduce)
    # logits[n, o] = sum_c xm[c, n] * w[c, o] + b[o]  (tiny; VPU broadcast-sum)
    logits = jnp.sum(xm[:, :, None] * w_ref[...][:, None, :], axis=0) + b_ref[...]
    m = jnp.max(logits, axis=-1, keepdims=True)
    e = jnp.exp(logits - m)
    denom = jnp.sum(e, axis=-1, keepdims=True)
    o_ref[...] = e * pl.reciprocal(denom, approx=True)          # EUP recip


# ------------------------------ glue (JAX) --------------------------------

def im2col_cf(x, kh, kw, stride, pad):
    """Channel-first im2col: x [C,N,H,W] -> ([kh*kw*C, N*Ho*Wo], Ho, Wo)."""
    c, n, h, w = x.shape
    if pad > 0:
        x = jnp.pad(x, ((0, 0), (0, 0), (pad, pad), (pad, pad)))
    ho = (h + 2 * pad - kh) // stride + 1
    wo = (w + 2 * pad - kw) // stride + 1
    cols = [x[:, :, i:i + (ho - 1) * stride + 1:stride,
              j:j + (wo - 1) * stride + 1:stride]
            for i in range(kh) for j in range(kw)]
    a = jnp.concatenate(cols, axis=0)              # [kh*kw*C, N, Ho, Wo]
    return a.reshape(kh * kw * c, n * ho * wo), ho, wo


def bn_conv_relu(x, p, stride, pad):
    """BN_Conv2d (Conv -> BatchNorm(batch stats) -> ReLU) on x: [Cin, N, H, W]."""
    w = p["w"]                                     # [Cout, Cin, kh, kw] (PyTorch layout)
    cout, cin, kh, kw = w.shape
    _, n, h, wd = x.shape
    if kh == 1 and kw == 1 and stride == 1 and pad == 0:
        ho, wo = h, wd
        a = x.reshape(cin, n * h * wd)             # f32; cast to bf16 inside the kernel
        wf = w.reshape(cout, cin)
    else:
        # bf16 im2col: halves the materialized buffer that must be written anyway.
        a, ho, wo = im2col_cf(x.astype(jnp.bfloat16), kh, kw, stride, pad)
        wf = jnp.transpose(w, (0, 2, 3, 1)).reshape(cout, kh * kw * cin)
    y = conv_bn_relu_gemm(a, wf, p["gamma"], p["beta"])          # [Cout, M]
    return y.reshape(cout, n, ho, wo)


def transition_avgpool(x, p):
    """Transition: 1x1 BN_Conv2d + AvgPool2d(2), fused into one kernel."""
    w = p["w"]                                     # [Cout, Cin, 1, 1]
    cout, cin = w.shape[0], w.shape[1]
    _, n, h, wd = x.shape
    assert h % 2 == 0 and wd % 2 == 0
    ho, wo = h // 2, wd // 2
    mp = n * ho * wo
    # Four disjoint stride-2 phases: total bytes == the input, no window stack.
    taps = [x[:, :, dh::2, dw::2].reshape(cin, mp)
            for dh in (0, 1) for dw in (0, 1)]
    wf = w.reshape(cout, cin).astype(jnp.float32)
    g = p["gamma"].reshape(cout, 1).astype(jnp.float32)
    b = p["beta"].reshape(cout, 1).astype(jnp.float32)
    out = pl.pallas_call(
        _transition_avgpool_kernel,
        out_shape=jax.ShapeDtypeStruct((cout, mp), jnp.float32),
        grid=(1,),
        in_specs=[pl.BlockSpec((cin, mp), lambda i: (0, 0)) for _ in range(4)]
                 + [pl.BlockSpec((cout, cin), lambda i: (0, 0)),
                    pl.BlockSpec((cout, 1), lambda i: (0, 0)),
                    pl.BlockSpec((cout, 1), lambda i: (0, 0))],
        out_specs=pl.BlockSpec((cout, mp), lambda i: (0, 0)),
    )(*taps, wf, g, b)
    return out.reshape(cout, n, ho, wo)


def max_pool_3x3_s2_p1(x):
    """F.max_pool2d(x, 3, 2, 1) on x: [C, N, H, W] with even H, W."""
    c, n, h, w = x.shape
    assert h % 2 == 0 and w % 2 == 0
    ho, wo = h // 2, w // 2
    planes = []
    for dh in (0, 1):
        for dw in (0, 1):
            ph = x[:, :, dh::2, dw::2]             # [C, N, Ho, Wo]
            ph = jnp.pad(ph, ((0, 0), (0, 0), (1, 0), (1, 0)),
                         constant_values=-jnp.inf)
            planes.append(ph)
    return pl.pallas_call(
        _maxpool_3x3_s2_kernel,
        out_shape=jax.ShapeDtypeStruct((c, n, ho, wo), jnp.float32),
        grid=(1,),
        in_specs=[pl.BlockSpec((c, n, ho + 1, wo + 1), lambda i: (0, 0, 0, 0))
                  for _ in range(4)],
        out_specs=pl.BlockSpec((c, n, ho, wo), lambda i: (0, 0, 0, 0)),
    )(*planes)


def gap_fc_softmax(x, fc_w, fc_b):
    """x: [C, N, H, W] -> softmax(fc(avg_pool(HxW)))  [N, num_classes]."""
    c, n, h, w = x.shape
    s = h * w
    nc = fc_w.shape[1]
    return pl.pallas_call(
        _gap_fc_softmax_kernel,
        out_shape=jax.ShapeDtypeStruct((n, nc), jnp.float32),
        grid=(1,),
        in_specs=[pl.BlockSpec((c, n, s), lambda i: (0, 0, 0)),
                  pl.BlockSpec((c, nc), lambda i: (0, 0)),
                  pl.BlockSpec((1, nc), lambda i: (0, 0))],
        out_specs=pl.BlockSpec((n, nc), lambda i: (0, 0)),
    )(x.reshape(c, n, s), fc_w.astype(jnp.float32),
      fc_b.reshape(1, nc).astype(jnp.float32))


# --------------------------- parameter building ---------------------------

def init_bn_conv(key, cin, cout, k):
    w = 0.05 * jax.random.normal(key, (cout, cin, k, k), jnp.float32)
    return {"w": w,
            "gamma": jnp.ones((cout,), jnp.float32),
            "beta": jnp.zeros((cout,), jnp.float32)}


def init_densenet(key, layers, k, theta, num_classes):
    keys = iter(jax.random.split(key, 256))
    params = {"stem": init_bn_conv(next(keys), 3, 2 * k, 7)}   # BN_Conv2d(3, 2k, 7, 2, 3)
    blocks = []
    k0 = 2 * k
    patches = 0
    for bi in range(len(layers)):
        dense_layers = []
        for li in range(layers[bi]):
            cin = k0 + li * k
            dense_layers.append({
                "c1": init_bn_conv(next(keys), cin, 4 * k, 1),   # 1x1, s1, p0
                "c2": init_bn_conv(next(keys), 4 * k, k, 3),     # 3x3, s1, p1
            })
        blocks.append(("dense", dense_layers))
        patches = k0 + layers[bi] * k
        if bi != len(layers) - 1:
            out_chls = int(theta * patches)
            blocks.append(("transition", init_bn_conv(next(keys), patches, out_chls, 1)))
            k0 = out_chls
    params["blocks"] = blocks
    params["fc_w"] = 0.05 * jax.random.normal(next(keys), (patches, num_classes), jnp.float32)
    params["fc_b"] = jnp.zeros((num_classes,), jnp.float32)
    return params


# ------------------------------ forward pass ------------------------------

def densenet_forward(params, x_nchw):
    # NCHW -> channel-major [C, N, H, W]; all kernels see lane-dense [C, M].
    x = jnp.transpose(x_nchw, (1, 0, 2, 3)).astype(jnp.float32)
    out = bn_conv_relu(x, params["stem"], stride=2, pad=3)
    out = max_pool_3x3_s2_p1(out)                                 # F.max_pool2d(out, 3, 2, 1)
    for kind, p in params["blocks"]:
        if kind == "dense":
            # DenseBlock.forward (concat order matches the reference module).
            # TODO(synk): at realistic growth rates, write new channels in place
            # into a preallocated [C_total, M] buffer via input_output_aliases.
            feat = bn_conv_relu(bn_conv_relu(out, p[0]["c1"], 1, 0), p[0]["c2"], 1, 1)
            cur = jnp.concatenate([out, feat], axis=0)            # cat((x, feature), 1)
            for li in range(1, len(p)):
                feat = bn_conv_relu(bn_conv_relu(cur, p[li]["c1"], 1, 0), p[li]["c2"], 1, 1)
                cur = jnp.concatenate([feat, cur], axis=0)        # cat((feature, out), 1)
            out = cur
        else:                                                     # transition (+ avg pool), fused
            out = transition_avgpool(out, p)
    # F.avg_pool2d(out, 7) + view + fc + softmax, fused in one kernel.
    return gap_fc_softmax(out, params["fc_w"], params["fc_b"])


# ---------------------------------- main -----------------------------------

if __name__ == "__main__":
    layers, k, theta, num_classes = (2, 2), 4, 0.5, 10
    key = jax.random.PRNGKey(0)
    key_p, key_x = jax.random.split(key)
    params = init_densenet(key_p, layers, k, theta, num_classes)

    # PyTorch NCHW input: 56x56 so the final feature map is 7x7
    # (56 / 2(conv) / 2(maxpool) / 2(transition) = 7), matching avg_pool2d(7).
    x = jax.random.normal(key_x, (2, 3, 56, 56), jnp.float32)

    fwd = jax.jit(functools.partial(densenet_forward, params))
    out = fwd(x)
    jax.block_until_ready(out)

    assert out.shape == (2, num_classes)
    assert bool(jnp.all(jnp.isfinite(out)))
    # softmax rows sum to 1 (EUP approximate reciprocal => ~2^-12 rel. error)
    assert bool(jnp.allclose(jnp.sum(out, axis=1), 1.0, atol=2e-3))
    print("KERNEL_OK")
</pallas_src>

<mosaic_0001>
module attributes {stable_mosaic.version = 11 : i64} {
  func.func @_conv_bn_relu_kernel(%arg0: i32, %arg1: memref<80x1568xbf16, #tpu.memory_space<vmem>>, %arg2: memref<1x8x80xf32, #tpu.memory_space<vmem>>, %arg3: memref<8x1xf32, #tpu.memory_space<vmem>>, %arg4: memref<8x1xf32, #tpu.memory_space<vmem>>, %arg5: memref<8x1568xf32, #tpu.memory_space<vmem>>) attributes {dimension_semantics = [#tpu.dimension_semantics<arbitrary>], iteration_bounds = array<i64: 2>, scalar_prefetch = 0 : i64, scratch_operands = 0 : i64, tpu.core_type = #tpu.core_type<tc>, window_params = [{transform_indices = @transform_0, window_bounds = array<i64: 80, 1568>}, {transform_indices = @transform_1, window_bounds = array<i64: 1, 8, 80>}, {pipeline_mode = #tpu.pipeline_mode<synchronous>, transform_indices = @transform_2, window_bounds = array<i64: 8, 1>}, {pipeline_mode = #tpu.pipeline_mode<synchronous>, transform_indices = @transform_3, window_bounds = array<i64: 8, 1>}, {pipeline_mode = #tpu.pipeline_mode<synchronous>, transform_indices = @transform_4, window_bounds = array<i64: 8, 1568>}]} {
    %c0_i32 = arith.constant 0 : i32
    %0 = arith.cmpi eq, %arg0, %c0_i32 : i32
    %1 = arith.extui %0 : i1 to i32
    %c0_i32_0 = arith.constant 0 : i32
    %2 = arith.cmpi ne, %1, %c0_i32_0 : i32
    scf.if %2 {
      %cst_10 = arith.constant 0.000000e+00 : f32
      %14 = vector.broadcast %cst_10 : f32 to vector<8x1568xf32>
      %c0_11 = arith.constant 0 : index
      %c0_12 = arith.constant 0 : index
      %15 = vector.load %arg5[%c0_11, %c0_12] : memref<8x1568xf32, #tpu.memory_space<vmem>>, vector<8x1568xf32>
      tpu.vector_store %arg5[%c0_11, %c0_12], %14 {strides = array<i32>} : memref<8x1568xf32, #tpu.memory_space<vmem>>, vector<8x1568xf32>,
    } else {
    }
    %c0 = arith.constant 0 : index
    %c0_1 = arith.constant 0 : index
    %c0_2 = arith.constant 0 : index
    %3 = vector.load %arg2[%c0, %c0_1, %c0_2] : memref<1x8x80xf32, #tpu.memory_space<vmem>>, vector<1x8x80xf32>
    %4 = vector.shape_cast %3 : vector<1x8x80xf32> to vector<8x80xf32>
    %5 = arith.truncf %4 : vector<8x80xf32> to vector<8x80xbf16>
    %c0_3 = arith.constant 0 : index
    %c0_4 = arith.constant 0 : index
    %6 = vector.load %arg1[%c0_3, %c0_4] : memref<80x1568xbf16, #tpu.memory_space<vmem>>, vector<80x1568xbf16>
    %c0_5 = arith.constant 0 : index
    %c0_6 = arith.constant 0 : index
    %7 = vector.load %arg5[%c0_5, %c0_6] : memref<8x1568xf32, #tpu.memory_space<vmem>>, vector<8x1568xf32>
    %cst = arith.constant dense<0.000000e+00> : vector<8x1568xf32>
    %8 = tpu.matmul %5, %6, %cst {dimension_numbers = #tpu.dot_dimension_numbers<[1], [0], [0], [1], [0, 0, 1, 1], [], []>} : vector<8x80xbf16>, vector<80x1568xbf16>, vector<8x1568xf32> -> vector<8x1568xf32>
    %9 = arith.addf %7, %8 : vector<8x1568xf32>
    %c0_7 = arith.constant 0 : index
    %c0_8 = arith.constant 0 : index
    %10 = vector.load %arg5[%c0_7, %c0_8] : memref<8x1568xf32, #tpu.memory_space<vmem>>, vector<8x1568xf32>
    tpu.vector_store %arg5[%c0_7, %c0_8], %9 {strides = array<i32>} : memref<8x1568xf32, #tpu.memory_space<vmem>>, vector<8x1568xf32>,
    %c1_i32 = arith.constant 1 : i32
    %11 = arith.cmpi eq, %arg0, %c1_i32 : i32
    %12 = arith.extui %11 : i1 to i32
    %c0_i32_9 = arith.constant 0 : i32
    %13 = arith.cmpi ne, %12, %c0_i32_9 : i32
    scf.if %13 {
      %c0_10 = arith.constant 0 : index
      %c0_11 = arith.constant 0 : index
      %14 = vector.load %arg5[%c0_10, %c0_11] : memref<8x1568xf32, #tpu.memory_space<vmem>>, vector<8x1568xf32>
      %cst_12 = arith.constant dense<0.000000e+00> : vector<8xf32>
      %15 = vector.multi_reduction <add>, %14, %cst_12 [1] : vector<8x1568xf32> to vector<8xf32>
      %16 = vector.shape_cast %15 : vector<8xf32> to vector<8x1xf32>
      %cst_13 = arith.constant 1.568000e+03 : f32
      %17 = vector.broadcast %cst_13 : f32 to vector<8x1xf32>
      %18 = arith.divf %16, %17 : vector<8x1xf32>
      %19 = vector.broadcast %18 : vector<8x1xf32> to vector<8x1568xf32>
      %20 = arith.subf %14, %19 : vector<8x1568xf32>
      %21 = arith.mulf %20, %20 : vector<8x1568xf32>
      %cst_14 = arith.constant dense<0.000000e+00> : vector<8xf32>
      %22 = vector.multi_reduction <add>, %21, %cst_14 [1] : vector<8x1568xf32> to vector<8xf32>
      %23 = vector.shape_cast %22 : vector<8xf32> to vector<8x1xf32>
      %cst_15 = arith.constant 1.568000e+03 : f32
      %24 = vector.broadcast %cst_15 : f32 to vector<8x1xf32>
      %25 = arith.divf %23, %24 : vector<8x1xf32>
      %c0_16 = arith.constant 0 : index
      %c0_17 = arith.constant 0 : index
      %26 = vector.load %arg3[%c0_16, %c0_17] : memref<8x1xf32, #tpu.memory_space<vmem>>, vector<8x1xf32>
      %cst_18 = arith.constant 9.99999974E-6 : f32
      %27 = vector.broadcast %cst_18 : f32 to vector<8x1xf32>
      %28 = arith.addf %25, %27 : vector<8x1xf32>
      %29 = math.rsqrt %28 : vector<8x1xf32>
      %30 = arith.mulf %26, %29 : vector<8x1xf32>
      %c0_19 = arith.constant 0 : index
      %c0_20 = arith.constant 0 : index
      %31 = vector.load %arg4[%c0_19, %c0_20] : memref<8x1xf32, #tpu.memory_space<vmem>>, vector<8x1xf32>
      %32 = arith.mulf %18, %30 : vector<8x1xf32>
      %33 = arith.subf %31, %32 : vector<8x1xf32>
      %34 = vector.broadcast %30 : vector<8x1xf32> to vector<8x1568xf32>
      %35 = arith.mulf %14, %34 : vector<8x1568xf32>
      %36 = vector.broadcast %33 : vector<8x1xf32> to vector<8x1568xf32>
      %37 = arith.addf %35, %36 : vector<8x1568xf32>
      %cst_21 = arith.constant 0.000000e+00 : f32
      %38 = vector.broadcast %cst_21 : f32 to vector<8x1568xf32>
      %39 = arith.maximumf %37, %38 : vector<8x1568xf32>
      %c0_22 = arith.constant 0 : index
      %c0_23 = arith.constant 0 : index
      %40 = vector.load %arg5[%c0_22, %c0_23] : memref<8x1568xf32, #tpu.memory_space<vmem>>, vector<8x1568xf32>
      tpu.vector_store %arg5[%c0_22, %c0_23], %39 {strides = array<i32>} : memref<8x1568xf32, #tpu.memory_space<vmem>>, vector<8x1568xf32>,
    } else {
    }
    return
  }
  func.func @transform_0(%arg0: i32) -> (i32, i32) {
    %c0_i32 = arith.constant 0 : i32
    %c0_i32_0 = arith.constant 0 : i32
    return %arg0, %c0_i32 : i32, i32
  }
  func.func @transform_1(%arg0: i32) -> (i32, i32, i32) {
    %c0_i32 = arith.constant 0 : i32
    %c0_i32_0 = arith.constant 0 : i32
    %c0_i32_1 = arith.constant 0 : i32
    return %arg0, %c0_i32, %c0_i32_0 : i32, i32, i32
  }
  func.func @transform_2(%arg0: i32) -> (i32, i32) {
    %c0_i32 = arith.constant 0 : i32
    %c0_i32_0 = arith.constant 0 : i32
    %c0_i32_1 = arith.constant 0 : i32
    return %c0_i32, %c0_i32_0 : i32, i32
  }
  func.func @transform_3(%arg0: i32) -> (i32, i32) {
    %c0_i32 = arith.constant 0 : i32
    %c0_i32_0 = arith.constant 0 : i32
    %c0_i32_1 = arith.constant 0 : i32
    return %c0_i32, %c0_i32_0 : i32, i32
  }
  func.func @transform_4(%arg0: i32) -> (i32, i32) {
    %c0_i32 = arith.constant 0 : i32
    %c0_i32_0 = arith.constant 0 : i32
    %c0_i32_1 = arith.constant 0 : i32
    return %c0_i32, %c0_i32_0 : i32, i32
  }
}

module attributes {stable_mosaic.version = 11 : i64} {
  func.func @_maxpool_3x3_s2_kernel(%arg0: i32, %arg1: memref<8x2x15x15xf32, #tpu.memory_space<vmem>>, %arg2: memref<8x2x15x15xf32, #tpu.memory_space<vmem>>, %arg3: memref<8x2x15x15xf32, #tpu.memory_space<vmem>>, %arg4: memref<8x2x15x15xf32, #tpu.memory_space<vmem>>, %arg5: memref<8x2x14x14xf32, #tpu.memory_space<vmem>>) attributes {dimension_semantics = [#tpu.dimension_semantics<arbitrary>], iteration_bounds = array<i64: 1>, scalar_prefetch = 0 : i64, scratch_operands = 0 : i64, tpu.core_type = #tpu.core_type<tc>, window_params = [{pipeline_mode = #tpu.pipeline_mode<synchronous>, transform_indices = @transform_0, window_bounds = array<i64: 8, 2, 15, 15>}, {pipeline_mode = #tpu.pipeline_mode<synchronous>, transform_indices = @transform_1, window_bounds = array<i64: 8, 2, 15, 15>}, {pipeline_mode = #tpu.pipeline_mode<synchronous>, transform_indices = @transform_2, window_bounds = array<i64: 8, 2, 15, 15>}, {pipeline_mode = #tpu.pipeline_mode<synchronous>, transform_indices = @transform_3, window_bounds = array<i64: 8, 2, 15, 15>}, {pipeline_mode = #tpu.pipeline_mode<synchronous>, transform_indices = @transform_4, window_bounds = array<i64: 8, 2, 14, 14>}]} {
    %c0 = arith.constant 0 : index
    %c0_0 = arith.constant 0 : index
    %c0_1 = arith.constant 0 : index
    %c0_2 = arith.constant 0 : index
    %0 = vector.load %arg1[%c0, %c0_0, %c0_1, %c0_2] : memref<8x2x15x15xf32, #tpu.memory_space<vmem>>, vector<8x2x15x15xf32>
    %c0_3 = arith.constant 0 : index
    %c0_4 = arith.constant 0 : index
    %c0_5 = arith.constant 0 : index
    %c0_6 = arith.constant 0 : index
    %1 = vector.load %arg2[%c0_3, %c0_4, %c0_5, %c0_6] : memref<8x2x15x15xf32, #tpu.memory_space<vmem>>, vector<8x2x15x15xf32>
    %c0_7 = arith.constant 0 : index
    %c0_8 = arith.constant 0 : index
    %c0_9 = arith.constant 0 : index
    %c0_10 = arith.constant 0 : index
    %2 = vector.load %arg3[%c0_7, %c0_8, %c0_9, %c0_10] : memref<8x2x15x15xf32, #tpu.memory_space<vmem>>, vector<8x2x15x15xf32>
    %c0_11 = arith.constant 0 : index
    %c0_12 = arith.constant 0 : index
    %c0_13 = arith.constant 0 : index
    %c0_14 = arith.constant 0 : index
    %3 = vector.load %arg4[%c0_11, %c0_12, %c0_13, %c0_14] : memref<8x2x15x15xf32, #tpu.memory_space<vmem>>, vector<8x2x15x15xf32>
    %4 = vector.extract_strided_slice %0 {offsets = [0, 0, 1, 1], sizes = [8, 2, 14, 14], strides = [1, 1, 1, 1]} : vector<8x2x15x15xf32> to vector<8x2x14x14xf32>
    %5 = vector.extract_strided_slice %1 {offsets = [0, 0, 1, 1], sizes = [8, 2, 14, 14], strides = [1, 1, 1, 1]} : vector<8x2x15x15xf32> to vector<8x2x14x14xf32>
    %6 = arith.maximumf %4, %5 : vector<8x2x14x14xf32>
    %7 = vector.extract_strided_slice %2 {offsets = [0, 0, 1, 1], sizes = [8, 2, 14, 14], strides = [1, 1, 1, 1]} : vector<8x2x15x15xf32> to vector<8x2x14x14xf32>
    %8 = vector.extract_strided_slice %3 {offsets = [0, 0, 1, 1], sizes = [8, 2, 14, 14], strides = [1, 1, 1, 1]} : vector<8x2x15x15xf32> to vector<8x2x14x14xf32>
    %9 = arith.maximumf %7, %8 : vector<8x2x14x14xf32>
    %10 = arith.maximumf %6, %9 : vector<8x2x14x14xf32>
    %11 = vector.extract_strided_slice %2 {offsets = [0, 0, 0, 1], sizes = [8, 2, 14, 14], strides = [1, 1, 1, 1]} : vector<8x2x15x15xf32> to vector<8x2x14x14xf32>
    %12 = vector.extract_strided_slice %3 {offsets = [0, 0, 0, 1], sizes = [8, 2, 14, 14], strides = [1, 1, 1, 1]} : vector<8x2x15x15xf32> to vector<8x2x14x14xf32>
    %13 = arith.maximumf %11, %12 : vector<8x2x14x14xf32>
    %14 = vector.extract_strided_slice %1 {offsets = [0, 0, 1, 0], sizes = [8, 2, 14, 14], strides = [1, 1, 1, 1]} : vector<8x2x15x15xf32> to vector<8x2x14x14xf32>
    %15 = vector.extract_strided_slice %3 {offsets = [0, 0, 1, 0], sizes = [8, 2, 14, 14], strides = [1, 1, 1, 1]} : vector<8x2x15x15xf32> to vector<8x2x14x14xf32>
    %16 = arith.maximumf %14, %15 : vector<8x2x14x14xf32>
    %17 = vector.extract_strided_slice %3 {offsets = [0, 0, 0, 0], sizes = [8, 2, 14, 14], strides = [1, 1, 1, 1]} : vector<8x2x15x15xf32> to vector<8x2x14x14xf32>
    %18 = arith.maximumf %10, %13 : vector<8x2x14x14xf32>
    %19 = arith.maximumf %16, %17 : vector<8x2x14x14xf32>
    %20 = arith.maximumf %18, %19 : vector<8x2x14x14xf32>
    %c0_15 = arith.constant 0 : index
    %c0_16 = arith.constant 0 : index
    %c0_17 = arith.constant 0 : index
    %c0_18 = arith.constant 0 : index
    %21 = vector.load %arg5[%c0_15, %c0_16, %c0_17, %c0_18] : memref<8x2x14x14xf32, #tpu.memory_space<vmem>>, vector<8x2x14x14xf32>
    tpu.vector_store %arg5[%c0_15, %c0_16, %c0_17, %c0_18], %20 {strides = array<i32>} : memref<8x2x14x14xf32, #tpu.memory_space<vmem>>, vector<8x2x14x14xf32>,
    return
  }
  func.func @transform_0(%arg0: i32) -> (i32, i32, i32, i32) {
    %c0_i32 = arith.constant 0 : i32
    %c0_i32_0 = arith.constant 0 : i32
    %c0_i32_1 = arith.constant 0 : i32
    %c0_i32_2 = arith.constant 0 : i32
    %c0_i32_3 = arith.constant 0 : i32
    return %c0_i32, %c0_i32_0, %c0_i32_1, %c0_i32_2 : i32, i32, i32, i32
  }
  func.func @transform_1(%arg0: i32) -> (i32, i32, i32, i32) {
    %c0_i32 = arith.constant 0 : i32
    %c0_i32_0 = arith.constant 0 : i32
    %c0_i32_1 = arith.constant 0 : i32
    %c0_i32_2 = arith.constant 0 : i32
    %c0_i32_3 = arith.constant 0 : i32
    return %c0_i32, %c0_i32_0, %c0_i32_1, %c0_i32_2 : i32, i32, i32, i32
  }
  func.func @transform_2(%arg0: i32) -> (i32, i32, i32, i32) {
    %c0_i32 = arith.constant 0 : i32
    %c0_i32_0 = arith.constant 0 : i32
    %c0_i32_1 = arith.constant 0 : i32
    %c0_i32_2 = arith.constant 0 : i32
    %c0_i32_3 = arith.constant 0 : i32
    return %c0_i32, %c0_i32_0, %c0_i32_1, %c0_i32_2 : i32, i32, i32, i32
  }
  func.func @transform_3(%arg0: i32) -> (i32, i32, i32, i32) {
    %c0_i32 = arith.constant 0 : i32
    %c0_i32_0 = arith.constant 0 : i32
    %c0_i32_1 = arith.constant 0 : i32
    %c0_i32_2 = arith.constant 0 : i32
    %c0_i32_3 = arith.constant 0 : i32
    return %c0_i32, %c0_i32_0, %c0_i32_1, %c0_i32_2 : i32, i32, i32, i32
  }
  func.func @transform_4(%arg0: i32) -> (i32, i32, i32, i32) {
    %c0_i32 = arith.constant 0 : i32
    %c0_i32_0 = arith.constant 0 : i32
    %c0_i32_1 = arith.constant 0 : i32
    %c0_i32_2 = arith.constant 0 : i32
    %c0_i32_3 = arith.constant 0 : i32
    return %c0_i32, %c0_i32_0, %c0_i32_1, %c0_i32_2 : i32, i32, i32, i32
  }
}

module attributes {stable_mosaic.version = 11 : i64} {
  func.func @_conv_bn_relu_kernel(%arg0: i32, %arg1: memref<8x392xf32, #tpu.memory_space<vmem>>, %arg2: memref<1x16x8xf32, #tpu.memory_space<vmem>>, %arg3: memref<16x1xf32, #tpu.memory_space<vmem>>, %arg4: memref<16x1xf32, #tpu.memory_space<vmem>>, %arg5: memref<16x392xf32, #tpu.memory_space<vmem>>) attributes {dimension_semantics = [#tpu.dimension_semantics<arbitrary>], iteration_bounds = array<i64: 1>, scalar_prefetch = 0 : i64, scratch_operands = 0 : i64, tpu.core_type = #tpu.core_type<tc>, window_params = [{transform_indices = @transform_0, window_bounds = array<i64: 8, 392>}, {transform_indices = @transform_1, window_bounds = array<i64: 1, 16, 8>}, {pipeline_mode = #tpu.pipeline_mode<synchronous>, transform_indices = @transform_2, window_bounds = array<i64: 16, 1>}, {pipeline_mode = #tpu.pipeline_mode<synchronous>, transform_indices = @transform_3, window_bounds = array<i64: 16, 1>}, {pipeline_mode = #tpu.pipeline_mode<synchronous>, transform_indices = @transform_4, window_bounds = array<i64: 16, 392>}]} {
    %c0_i32 = arith.constant 0 : i32
    %0 = arith.cmpi eq, %arg0, %c0_i32 : i32
    %1 = arith.extui %0 : i1 to i32
    %c0_i32_0 = arith.constant 0 : i32
    %2 = arith.cmpi ne, %1, %c0_i32_0 : i32
    scf.if %2 {
      %cst_11 = arith.constant 0.000000e+00 : f32
      %15 = vector.broadcast %cst_11 : f32 to vector<16x392xf32>
      %c0_12 = arith.constant 0 : index
      %c0_13 = arith.constant 0 : index
      %16 = vector.load %arg5[%c0_12, %c0_13] : memref<16x392xf32, #tpu.memory_space<vmem>>, vector<16x392xf32>
      tpu.vector_store %arg5[%c0_12, %c0_13], %15 {strides = array<i32>} : memref<16x392xf32, #tpu.memory_space<vmem>>, vector<16x392xf32>,
    } else {
    }
    %c0 = arith.constant 0 : index
    %c0_1 = arith.constant 0 : index
    %c0_2 = arith.constant 0 : index
    %3 = vector.load %arg2[%c0, %c0_1, %c0_2] : memref<1x16x8xf32, #tpu.memory_space<vmem>>, vector<1x16x8xf32>
    %4 = vector.shape_cast %3 : vector<1x16x8xf32> to vector<16x8xf32>
    %5 = arith.truncf %4 : vector<16x8xf32> to vector<16x8xbf16>
    %c0_3 = arith.constant 0 : index
    %c0_4 = arith.constant 0 : index
    %6 = vector.load %arg1[%c0_3, %c0_4] : memref<8x392xf32, #tpu.memory_space<vmem>>, vector<8x392xf32>
    %7 = arith.truncf %6 : vector<8x392xf32> to vector<8x392xbf16>
    %c0_5 = arith.constant 0 : index
    %c0_6 = arith.constant 0 : index
    %8 = vector.load %arg5[%c0_5, %c0_6] : memref<16x392xf32, #tpu.memory_space<vmem>>, vector<16x392xf32>
    %cst = arith.constant dense<0.000000e+00> : vector<16x392xf32>
    %9 = tpu.matmul %5, %7, %cst {dimension_numbers = #tpu.dot_dimension_numbers<[1], [0], [0], [1], [0, 0, 1, 1], [], []>} : vector<16x8xbf16>, vector<8x392xbf16>, vector<16x392xf32> -> vector<16x392xf32>
    %10 = arith.addf %8, %9 : vector<16x392xf32>
    %c0_7 = arith.constant 0 : index
    %c0_8 = arith.constant 0 : index
    %11 = vector.load %arg5[%c0_7, %c0_8] : memref<16x392xf32, #tpu.memory_space<vmem>>, vector<16x392xf32>
    tpu.vector_store %arg5[%c0_7, %c0_8], %10 {strides = array<i32>} : memref<16x392xf32, #tpu.memory_space<vmem>>, vector<16x392xf32>,
    %c0_i32_9 = arith.constant 0 : i32
    %12 = arith.cmpi eq, %arg0, %c0_i32_9 : i32
    %13 = arith.extui %12 : i1 to i32
    %c0_i32_10 = arith.constant 0 : i32
    %14 = arith.cmpi ne, %13, %c0_i32_10 : i32
    scf.if %14 {
      %c0_11 = arith.constant 0 : index
      %c0_12 = arith.constant 0 : index
      %15 = vector.load %arg5[%c0_11, %c0_12] : memref<16x392xf32, #tpu.memory_space<vmem>>, vector<16x392xf32>
      %cst_13 = arith.constant dense<0.000000e+00> : vector<16xf32>
      %16 = vector.multi_reduction <add>, %15, %cst_13 [1] : vector<16x392xf32> to vector<16xf32>
      %17 = vector.shape_cast %16 : vector<16xf32> to vector<16x1xf32>
      %cst_14 = arith.constant 3.920000e+02 : f32
      %18 = vector.broadcast %cst_14 : f32 to vector<16x1xf32>
      %19 = arith.divf %17, %18 : vector<16x1xf32>
      %20 = vector.broadcast %19 : vector<16x1xf32> to vector<16x392xf32>
      %21 = arith.subf %15, %20 : vector<16x392xf32>
      %22 = arith.mulf %21, %21 : vector<16x392xf32>
      %cst_15 = arith.constant dense<0.000000e+00> : vector<16xf32>
      %23 = vector.multi_reduction <add>, %22, %cst_15 [1] : vector<16x392xf32> to vector<16xf32>
      %24 = vector.shape_cast %23 : vector<16xf32> to vector<16x1xf32>
      %cst_16 = arith.constant 3.920000e+02 : f32
      %25 = vector.broadcast %cst_16 : f32 to vector<16x1xf32>
      %26 = arith.divf %24, %25 : vector<16x1xf32>
      %c0_17 = arith.constant 0 : index
      %c0_18 = arith.constant 0 : index
      %27 = vector.load %arg3[%c0_17, %c0_18] : memref<16x1xf32, #tpu.memory_space<vmem>>, vector<16x1xf32>
      %cst_19 = arith.constant 9.99999974E-6 : f32
      %28 = vector.broadcast %cst_19 : f32 to vector<16x1xf32>
      %29 = arith.addf %26, %28 : vector<16x1xf32>
      %30 = math.rsqrt %29 : vector<16x1xf32>
      %31 = arith.mulf %27, %30 : vector<16x1xf32>
      %c0_20 = arith.constant 0 : index
      %c0_21 = arith.constant 0 : index
      %32 = vector.load %arg4[%c0_20, %c0_21] : memref<16x1xf32, #tpu.memory_space<vmem>>, vector<16x1xf32>
      %33 = arith.mulf %19, %31 : vector<16x1xf32>
      %34 = arith.subf %32, %33 : vector<16x1xf32>
      %35 = vector.broadcast %31 : vector<16x1xf32> to vector<16x392xf32>
      %36 = arith.mulf %15, %35 : vector<16x392xf32>
      %37 = vector.broadcast %34 : vector<16x1xf32> to vector<16x392xf32>
      %38 = arith.addf %36, %37 : vector<16x392xf32>
      %cst_22 = arith.constant 0.000000e+00 : f32
      %39 = vector.broadcast %cst_22 : f32 to vector<16x392xf32>
      %40 = arith.maximumf %38, %39 : vector<16x392xf32>
      %c0_23 = arith.constant 0 : index
      %c0_24 = arith.constant 0 : index
      %41 = vector.load %arg5[%c0_23, %c0_24] : memref<16x392xf32, #tpu.memory_space<vmem>>, vector<16x392xf32>
      tpu.vector_store %arg5[%c0_23, %c0_24], %40 {strides = array<i32>} : memref<16x392xf32, #tpu.memory_space<vmem>>, vector<16x392xf32>,
    } else {
    }
    return
  }
  func.func @transform_0(%arg0: i32) -> (i32, i32) {
    %c0_i32 = arith.constant 0 : i32
    %c0_i32_0 = arith.constant 0 : i32
    return %arg0, %c0_i32 : i32, i32
  }
  func.func @transform_1(%arg0: i32) -> (i32, i32, i32) {
    %c0_i32 = arith.constant 0 : i32
    %c0_i32_0 = arith.constant 0 : i32
    %c0_i32_1 = arith.constant 0 : i32
    return %arg0, %c0_i32, %c0_i32_0 : i32, i32, i32
  }
  func.func @transform_2(%arg0: i32) -> (i32, i32) {
    %c0_i32 = arith.constant 0 : i32
    %c0_i32_0 = arith.constant 0 : i32
    %c0_i32_1 = arith.constant 0 : i32
    return %c0_i32, %c0_i32_0 : i32, i32
  }
  func.func @transform_3(%arg0: i32) -> (i32, i32) {
    %c0_i32 = arith.constant 0 : i32
    %c0_i32_0 = arith.constant 0 : i32
    %c0_i32_1 = arith.constant 0 : i32
    return %c0_i32, %c0_i32_0 : i32, i32
  }
  func.func @transform_4(%arg0: i32) -> (i32, i32) {
    %c0_i32 = arith.constant 0 : i32
    %c0_i32_0 = arith.constant 0 : i32
    %c0_i32_1 = arith.constant 0 : i32
    return %c0_i32, %c0_i32_0 : i32, i32
  }
}

module attributes {stable_mosaic.version = 11 : i64} {
  func.func @_conv_bn_relu_kernel(%arg0: i32, %arg1: memref<80x392xbf16, #tpu.memory_space<vmem>>, %arg2: memref<1x4x80xf32, #tpu.memory_space<vmem>>, %arg3: memref<4x1xf32, #tpu.memory_space<vmem>>, %arg4: memref<4x1xf32, #tpu.memory_space<vmem>>, %arg5: memref<4x392xf32, #tpu.memory_space<vmem>>) attributes {dimension_semantics = [#tpu.dimension_semantics<arbitrary>], iteration_bounds = array<i64: 2>, scalar_prefetch = 0 : i64, scratch_operands = 0 : i64, tpu.core_type = #tpu.core_type<tc>, window_params = [{transform_indices = @transform_0, window_bounds = array<i64: 80, 392>}, {transform_indices = @transform_1, window_bounds = array<i64: 1, 4, 80>}, {pipeline_mode = #tpu.pipeline_mode<synchronous>, transform_indices = @transform_2, window_bounds = array<i64: 4, 1>}, {pipeline_mode = #tpu.pipeline_mode<synchronous>, transform_indices = @transform_3, window_bounds = array<i64: 4, 1>}, {pipeline_mode = #tpu.pipeline_mode<synchronous>, transform_indices = @transform_4, window_bounds = array<i64: 4, 392>}]} {
    %c0_i32 = arith.constant 0 : i32
    %0 = arith.cmpi eq, %arg0, %c0_i32 : i32
    %1 = arith.extui %0 : i1 to i32
    %c0_i32_0 = arith.constant 0 : i32
    %2 = arith.cmpi ne, %1, %c0_i32_0 : i32
    scf.if %2 {
      %cst_10 = arith.constant 0.000000e+00 : f32
      %14 = vector.broadcast %cst_10 : f32 to vector<4x392xf32>
      %c0_11 = arith.constant 0 : index
      %c0_12 = arith.constant 0 : index
      %15 = vector.load %arg5[%c0_11, %c0_12] : memref<4x392xf32, #tpu.memory_space<vmem>>, vector<4x392xf32>
      tpu.vector_store %arg5[%c0_11, %c0_12], %14 {strides = array<i32>} : memref<4x392xf32, #tpu.memory_space<vmem>>, vector<4x392xf32>,
    } else {
    }
    %c0 = arith.constant 0 : index
    %c0_1 = arith.constant 0 : index
    %c0_2 = arith.constant 0 : index
    %3 = vector.load %arg2[%c0, %c0_1, %c0_2] : memref<1x4x80xf32, #tpu.memory_space<vmem>>, vector<1x4x80xf32>
    %4 = vector.shape_cast %3 : vector<1x4x80xf32> to vector<4x80xf32>
    %5 = arith.truncf %4 : vector<4x80xf32> to vector<4x80xbf16>
    %c0_3 = arith.constant 0 : index
    %c0_4 = arith.constant 0 : index
    %6 = vector.load %arg1[%c0_3, %c0_4] : memref<80x392xbf16, #tpu.memory_space<vmem>>, vector<80x392xbf16>
    %c0_5 = arith.constant 0 : index
    %c0_6 = arith.constant 0 : index
    %7 = vector.load %arg5[%c0_5, %c0_6] : memref<4x392xf32, #tpu.memory_space<vmem>>, vector<4x392xf32>
    %cst = arith.constant dense<0.000000e+00> : vector<4x392xf32>
    %8 = tpu.matmul %5, %6, %cst {dimension_numbers = #tpu.dot_dimension_numbers<[1], [0], [0], [1], [0, 0, 1, 1], [], []>} : vector<4x80xbf16>, vector<80x392xbf16>, vector<4x392xf32> -> vector<4x392xf32>
    %9 = arith.addf %7, %8 : vector<4x392xf32>
    %c0_7 = arith.constant 0 : index
    %c0_8 = arith.constant 0 : index
    %10 = vector.load %arg5[%c0_7, %c0_8] : memref<4x392xf32, #tpu.memory_space<vmem>>, vector<4x392xf32>
    tpu.vector_store %arg5[%c0_7, %c0_8], %9 {strides = array<i32>} : memref<4x392xf32, #tpu.memory_space<vmem>>, vector<4x392xf32>,
    %c1_i32 = arith.constant 1 : i32
    %11 = arith.cmpi eq, %arg0, %c1_i32 : i32
    %12 = arith.extui %11 : i1 to i32
    %c0_i32_9 = arith.constant 0 : i32
    %13 = arith.cmpi ne, %12, %c0_i32_9 : i32
    scf.if %13 {
      %c0_10 = arith.constant 0 : index
      %c0_11 = arith.constant 0 : index
      %14 = vector.load %arg5[%c0_10, %c0_11] : memref<4x392xf32, #tpu.memory_space<vmem>>, vector<4x392xf32>
      %cst_12 = arith.constant dense<0.000000e+00> : vector<4xf32>
      %15 = vector.multi_reduction <add>, %14, %cst_12 [1] : vector<4x392xf32> to vector<4xf32>
      %16 = vector.shape_cast %15 : vector<4xf32> to vector<4x1xf32>
      %cst_13 = arith.constant 3.920000e+02 : f32
      %17 = vector.broadcast %cst_13 : f32 to vector<4x1xf32>
      %18 = arith.divf %16, %17 : vector<4x1xf32>
      %19 = vector.broadcast %18 : vector<4x1xf32> to vector<4x392xf32>
      %20 = arith.subf %14, %19 : vector<4x392xf32>
      %21 = arith.mulf %20, %20 : vector<4x392xf32>
      %cst_14 = arith.constant dense<0.000000e+00> : vector<4xf32>
      %22 = vector.multi_reduction <add>, %21, %cst_14 [1] : vector<4x392xf32> to vector<4xf32>
      %23 = vector.shape_cast %22 : vector<4xf32> to vector<4x1xf32>
      %cst_15 = arith.constant 3.920000e+02 : f32
      %24 = vector.broadcast %cst_15 : f32 to vector<4x1xf32>
      %25 = arith.divf %23, %24 : vector<4x1xf32>
      %c0_16 = arith.constant 0 : index
      %c0_17 = arith.constant 0 : index
      %26 = vector.load %arg3[%c0_16, %c0_17] : memref<4x1xf32, #tpu.memory_space<vmem>>, vector<4x1xf32>
      %cst_18 = arith.constant 9.99999974E-6 : f32
      %27 = vector.broadcast %cst_18 : f32 to vector<4x1xf32>
      %28 = arith.addf %25, %27 : vector<4x1xf32>
      %29 = math.rsqrt %28 : vector<4x1xf32>
      %30 = arith.mulf %26, %29 : vector<4x1xf32>
      %c0_19 = arith.constant 0 : index
      %c0_20 = arith.constant 0 : index
      %31 = vector.load %arg4[%c0_19, %c0_20] : memref<4x1xf32, #tpu.memory_space<vmem>>, vector<4x1xf32>
      %32 = arith.mulf %18, %30 : vector<4x1xf32>
      %33 = arith.subf %31, %32 : vector<4x1xf32>
      %34 = vector.broadcast %30 : vector<4x1xf32> to vector<4x392xf32>
      %35 = arith.mulf %14, %34 : vector<4x392xf32>
      %36 = vector.broadcast %33 : vector<4x1xf32> to vector<4x392xf32>
      %37 = arith.addf %35, %36 : vector<4x392xf32>
      %cst_21 = arith.constant 0.000000e+00 : f32
      %38 = vector.broadcast %cst_21 : f32 to vector<4x392xf32>
      %39 = arith.maximumf %37, %38 : vector<4x392xf32>
      %c0_22 = arith.constant 0 : index
      %c0_23 = arith.constant 0 : index
      %40 = vector.load %arg5[%c0_22, %c0_23] : memref<4x392xf32, #tpu.memory_space<vmem>>, vector<4x392xf32>
      tpu.vector_store %arg5[%c0_22, %c0_23], %39 {strides = array<i32>} : memref<4x392xf32, #tpu.memory_space<vmem>>, vector<4x392xf32>,
    } else {
    }
    return
  }
  func.func @transform_0(%arg0: i32) -> (i32, i32) {
    %c0_i32 = arith.constant 0 : i32
    %c0_i32_0 = arith.constant 0 : i32
    return %arg0, %c0_i32 : i32, i32
  }
  func.func @transform_1(%arg0: i32) -> (i32, i32, i32) {
    %c0_i32 = arith.constant 0 : i32
    %c0_i32_0 = arith.constant 0 : i32
    %c0_i32_1 = arith.constant 0 : i32
    return %arg0, %c0_i32, %c0_i32_0 : i32, i32, i32
  }
  func.func @transform_2(%arg0: i32) -> (i32, i32) {
    %c0_i32 = arith.constant 0 : i32
    %c0_i32_0 = arith.constant 0 : i32
    %c0_i32_1 = arith.constant 0 : i32
    return %c0_i32, %c0_i32_0 : i32, i32
  }
  func.func @transform_3(%arg0: i32) -> (i32, i32) {
    %c0_i32 = arith.constant 0 : i32
    %c0_i32_0 = arith.constant 0 : i32
    %c0_i32_1 = arith.constant 0 : i32
    return %c0_i32, %c0_i32_0 : i32, i32
  }
  func.func @transform_4(%arg0: i32) -> (i32, i32) {
    %c0_i32 = arith.constant 0 : i32
    %c0_i32_0 = arith.constant 0 : i32
    %c0_i32_1 = arith.constant 0 : i32
    return %c0_i32, %c0_i32_0 : i32, i32
  }
}

module attributes {stable_mosaic.version = 11 : i64} {
  func.func @_conv_bn_relu_kernel(%arg0: i32, %arg1: memref<12x392xf32, #tpu.memory_space<vmem>>, %arg2: memref<1x16x12xf32, #tpu.memory_space<vmem>>, %arg3: memref<16x1xf32, #tpu.memory_space<vmem>>, %arg4: memref<16x1xf32, #tpu.memory_space<vmem>>, %arg5: memref<16x392xf32, #tpu.memory_space<vmem>>) attributes {dimension_semantics = [#tpu.dimension_semantics<arbitrary>], iteration_bounds = array<i64: 1>, scalar_prefetch = 0 : i64, scratch_operands = 0 : i64, tpu.core_type = #tpu.core_type<tc>, window_params = [{transform_indices = @transform_0, window_bounds = array<i64: 12, 392>}, {transform_indices = @transform_1, window_bounds = array<i64: 1, 16, 12>}, {pipeline_mode = #tpu.pipeline_mode<synchronous>, transform_indices = @transform_2, window_bounds = array<i64: 16, 1>}, {pipeline_mode = #tpu.pipeline_mode<synchronous>, transform_indices = @transform_3, window_bounds = array<i64: 16, 1>}, {pipeline_mode = #tpu.pipeline_mode<synchronous>, transform_indices = @transform_4, window_bounds = array<i64: 16, 392>}]} {
    %c0_i32 = arith.constant 0 : i32
    %0 = arith.cmpi eq, %arg0, %c0_i32 : i32
    %1 = arith.extui %0 : i1 to i32
    %c0_i32_0 = arith.constant 0 : i32
    %2 = arith.cmpi ne, %1, %c0_i32_0 : i32
    scf.if %2 {
      %cst_11 = arith.constant 0.000000e+00 : f32
      %15 = vector.broadcast %cst_11 : f32 to vector<16x392xf32>
      %c0_12 = arith.constant 0 : index
      %c0_13 = arith.constant 0 : index
      %16 = vector.load %arg5[%c0_12, %c0_13] : memref<16x392xf32, #tpu.memory_space<vmem>>, vector<16x392xf32>
      tpu.vector_store %arg5[%c0_12, %c0_13], %15 {strides = array<i32>} : memref<16x392xf32, #tpu.memory_space<vmem>>, vector<16x392xf32>,
    } else {
    }
    %c0 = arith.constant 0 : index
    %c0_1 = arith.constant 0 : index
    %c0_2 = arith.constant 0 : index
    %3 = vector.load %arg2[%c0, %c0_1, %c0_2] : memref<1x16x12xf32, #tpu.memory_space<vmem>>, vector<1x16x12xf32>
    %4 = vector.shape_cast %3 : vector<1x16x12xf32> to vector<16x12xf32>
    %5 = arith.truncf %4 : vector<16x12xf32> to vector<16x12xbf16>
    %c0_3 = arith.constant 0 : index
    %c0_4 = arith.constant 0 : index
    %6 = vector.load %arg1[%c0_3, %c0_4] : memref<12x392xf32, #tpu.memory_space<vmem>>, vector<12x392xf32>
    %7 = arith.truncf %6 : vector<12x392xf32> to vector<12x392xbf16>
    %c0_5 = arith.constant 0 : index
    %c0_6 = arith.constant 0 : index
    %8 = vector.load %arg5[%c0_5, %c0_6] : memref<16x392xf32, #tpu.memory_space<vmem>>, vector<16x392xf32>
    %cst = arith.constant dense<0.000000e+00> : vector<16x392xf32>
    %9 = tpu.matmul %5, %7, %cst {dimension_numbers = #tpu.dot_dimension_numbers<[1], [0], [0], [1], [0, 0, 1, 1], [], []>} : vector<16x12xbf16>, vector<12x392xbf16>, vector<16x392xf32> -> vector<16x392xf32>
    %10 = arith.addf %8, %9 : vector<16x392xf32>
    %c0_7 = arith.constant 0 : index
    %c0_8 = arith.constant 0 : index
    %11 = vector.load %arg5[%c0_7, %c0_8] : memref<16x392xf32, #tpu.memory_space<vmem>>, vector<16x392xf32>
    tpu.vector_store %arg5[%c0_7, %c0_8], %10 {strides = array<i32>} : memref<16x392xf32, #tpu.memory_space<vmem>>, vector<16x392xf32>,
    %c0_i32_9 = arith.constant 0 : i32
    %12 = arith.cmpi eq, %arg0, %c0_i32_9 : i32
    %13 = arith.extui %12 : i1 to i32
    %c0_i32_10 = arith.constant 0 : i32
    %14 = arith.cmpi ne, %13, %c0_i32_10 : i32
    scf.if %14 {
      %c0_11 = arith.constant 0 : index
      %c0_12 = arith.constant 0 : index
      %15 = vector.load %arg5[%c0_11, %c0_12] : memref<16x392xf32, #tpu.memory_space<vmem>>, vector<16x392xf32>
      %cst_13 = arith.constant dense<0.000000e+00> : vector<16xf32>
      %16 = vector.multi_reduction <add>, %15, %cst_13 [1] : vector<16x392xf32> to vector<16xf32>
      %17 = vector.shape_cast %16 : vector<16xf32> to vector<16x1xf32>
      %cst_14 = arith.constant 3.920000e+02 : f32
      %18 = vector.broadcast %cst_14 : f32 to vector<16x1xf32>
      %19 = arith.divf %17, %18 : vector<16x1xf32>
      %20 = vector.broadcast %19 : vector<16x1xf32> to vector<16x392xf32>
      %21 = arith.subf %15, %20 : vector<16x392xf32>
      %22 = arith.mulf %21, %21 : vector<16x392xf32>
      %cst_15 = arith.constant dense<0.000000e+00> : vector<16xf32>
      %23 = vector.multi_reduction <add>, %22, %cst_15 [1] : vector<16x392xf32> to vector<16xf32>
      %24 = vector.shape_cast %23 : vector<16xf32> to vector<16x1xf32>
      %cst_16 = arith.constant 3.920000e+02 : f32
      %25 = vector.broadcast %cst_16 : f32 to vector<16x1xf32>
      %26 = arith.divf %24, %25 : vector<16x1xf32>
      %c0_17 = arith.constant 0 : index
      %c0_18 = arith.constant 0 : index
      %27 = vector.load %arg3[%c0_17, %c0_18] : memref<16x1xf32, #tpu.memory_space<vmem>>, vector<16x1xf32>
      %cst_19 = arith.constant 9.99999974E-6 : f32
      %28 = vector.broadcast %cst_19 : f32 to vector<16x1xf32>
      %29 = arith.addf %26, %28 : vector<16x1xf32>
      %30 = math.rsqrt %29 : vector<16x1xf32>
      %31 = arith.mulf %27, %30 : vector<16x1xf32>
      %c0_20 = arith.constant 0 : index
      %c0_21 = arith.constant 0 : index
      %32 = vector.load %arg4[%c0_20, %c0_21] : memref<16x1xf32, #tpu.memory_space<vmem>>, vector<16x1xf32>
      %33 = arith.mulf %19, %31 : vector<16x1xf32>
      %34 = arith.subf %32, %33 : vector<16x1xf32>
      %35 = vector.broadcast %31 : vector<16x1xf32> to vector<16x392xf32>
      %36 = arith.mulf %15, %35 : vector<16x392xf32>
      %37 = vector.broadcast %34 : vector<16x1xf32> to vector<16x392xf32>
      %38 = arith.addf %36, %37 : vector<16x392xf32>
      %cst_22 = arith.constant 0.000000e+00 : f32
      %39 = vector.broadcast %cst_22 : f32 to vector<16x392xf32>
      %40 = arith.maximumf %38, %39 : vector<16x392xf32>
      %c0_23 = arith.constant 0 : index
      %c0_24 = arith.constant 0 : index
      %41 = vector.load %arg5[%c0_23, %c0_24] : memref<16x392xf32, #tpu.memory_space<vmem>>, vector<16x392xf32>
      tpu.vector_store %arg5[%c0_23, %c0_24], %40 {strides = array<i32>} : memref<16x392xf32, #tpu.memory_space<vmem>>, vector<16x392xf32>,
    } else {
    }
    return
  }
  func.func @transform_0(%arg0: i32) -> (i32, i32) {
    %c0_i32 = arith.constant 0 : i32
    %c0_i32_0 = arith.constant 0 : i32
    return %arg0, %c0_i32 : i32, i32
  }
  func.func @transform_1(%arg0: i32) -> (i32, i32, i32) {
    %c0_i32 = arith.constant 0 : i32
    %c0_i32_0 = arith.constant 0 : i32
    %c0_i32_1 = arith.constant 0 : i32
    return %arg0, %c0_i32, %c0_i32_0 : i32, i32, i32
  }
  func.func @transform_2(%arg0: i32) -> (i32, i32) {
    %c0_i32 = arith.constant 0 : i32
    %c0_i32_0 = arith.constant 0 : i32
    %c0_i32_1 = arith.constant 0 : i32
    return %c0_i32, %c0_i32_0 : i32, i32
  }
  func.func @transform_3(%arg0: i32) -> (i32, i32) {
    %c0_i32 = arith.constant 0 : i32
    %c0_i32_0 = arith.constant 0 : i32
    %c0_i32_1 = arith.constant 0 : i32
    return %c0_i32, %c0_i32_0 : i32, i32
  }
  func.func @transform_4(%arg0: i32) -> (i32, i32) {
    %c0_i32 = arith.constant 0 : i32
    %c0_i32_0 = arith.constant 0 : i32
    %c0_i32_1 = arith.constant 0 : i32
    return %c0_i32, %c0_i32_0 : i32, i32
  }
}

module attributes {stable_mosaic.version = 11 : i64} {
  func.func @_transition_avgpool_kernel(%arg0: i32, %arg1: memref<16x98xf32, #tpu.memory_space<vmem>>, %arg2: memref<16x98xf32, #tpu.memory_space<vmem>>, %arg3: memref<16x98xf32, #tpu.memory_space<vmem>>, %arg4: memref<16x98xf32, #tpu.memory_space<vmem>>, %arg5: memref<8x16xf32, #tpu.memory_space<vmem>>, %arg6: memref<8x1xf32, #tpu.memory_space<vmem>>, %arg7: memref<8x1xf32, #tpu.memory_space<vmem>>, %arg8: memref<8x98xf32, #tpu.memory_space<vmem>>) attributes {dimension_semantics = [#tpu.dimension_semantics<arbitrary>], iteration_bounds = array<i64: 1>, scalar_prefetch = 0 : i64, scratch_operands = 0 : i64, tpu.core_type = #tpu.core_type<tc>, window_params = [{pipeline_mode = #tpu.pipeline_mode<synchronous>, transform_indices = @transform_0, window_bounds = array<i64: 16, 98>}, {pipeline_mode = #tpu.pipeline_mode<synchronous>, transform_indices = @transform_1, window_bounds = array<i64: 16, 98>}, {pipeline_mode = #tpu.pipeline_mode<synchronous>, transform_indices = @transform_2, window_bounds = array<i64: 16, 98>}, {pipeline_mode = #tpu.pipeline_mode<synchronous>, transform_indices = @transform_3, window_bounds = array<i64: 16, 98>}, {pipeline_mode = #tpu.pipeline_mode<synchronous>, transform_indices = @transform_4, window_bounds = array<i64: 8, 16>}, {pipeline_mode = #tpu.pipeline_mode<synchronous>, transform_indices = @transform_5, window_bounds = array<i64: 8, 1>}, {pipeline_mode = #tpu.pipeline_mode<synchronous>, transform_indices = @transform_6, window_bounds = array<i64: 8, 1>}, {pipeline_mode = #tpu.pipeline_mode<synchronous>, transform_indices = @transform_7, window_bounds = array<i64: 8, 98>}]} {
    %c0 = arith.constant 0 : index
    %c0_0 = arith.constant 0 : index
    %0 = vector.load %arg5[%c0, %c0_0] : memref<8x16xf32, #tpu.memory_space<vmem>>, vector<8x16xf32>
    %1 = arith.truncf %0 : vector<8x16xf32> to vector<8x16xbf16>
    %c0_1 = arith.constant 0 : index
    %c0_2 = arith.constant 0 : index
    %2 = vector.load %arg1[%c0_1, %c0_2] : memref<16x98xf32, #tpu.memory_space<vmem>>, vector<16x98xf32>
    %3 = arith.truncf %2 : vector<16x98xf32> to vector<16x98xbf16>
    %cst = arith.constant dense<0.000000e+00> : vector<8x98xf32>
    %4 = tpu.matmul %1, %3, %cst {dimension_numbers = #tpu.dot_dimension_numbers<[1], [0], [0], [1], [0, 0, 1, 1], [], []>} : vector<8x16xbf16>, vector<16x98xbf16>, vector<8x98xf32> -> vector<8x98xf32>
    %c0_3 = arith.constant 0 : index
    %c0_4 = arith.constant 0 : index
    %5 = vector.load %arg2[%c0_3, %c0_4] : memref<16x98xf32, #tpu.memory_space<vmem>>, vector<16x98xf32>
    %6 = arith.truncf %5 : vector<16x98xf32> to vector<16x98xbf16>
    %cst_5 = arith.constant dense<0.000000e+00> : vector<8x98xf32>
    %7 = tpu.matmul %1, %6, %cst_5 {dimension_numbers = #tpu.dot_dimension_numbers<[1], [0], [0], [1], [0, 0, 1, 1], [], []>} : vector<8x16xbf16>, vector<16x98xbf16>, vector<8x98xf32> -> vector<8x98xf32>
    %c0_6 = arith.constant 0 : index
    %c0_7 = arith.constant 0 : index
    %8 = vector.load %arg3[%c0_6, %c0_7] : memref<16x98xf32, #tpu.memory_space<vmem>>, vector<16x98xf32>
    %9 = arith.truncf %8 : vector<16x98xf32> to vector<16x98xbf16>
    %cst_8 = arith.constant dense<0.000000e+00> : vector<8x98xf32>
    %10 = tpu.matmul %1, %9, %cst_8 {dimension_numbers = #tpu.dot_dimension_numbers<[1], [0], [0], [1], [0, 0, 1, 1], [], []>} : vector<8x16xbf16>, vector<16x98xbf16>, vector<8x98xf32> -> vector<8x98xf32>
    %c0_9 = arith.constant 0 : index
    %c0_10 = arith.constant 0 : index
    %11 = vector.load %arg4[%c0_9, %c0_10] : memref<16x98xf32, #tpu.memory_space<vmem>>, vector<16x98xf32>
    %12 = arith.truncf %11 : vector<16x98xf32> to vector<16x98xbf16>
    %cst_11 = arith.constant dense<0.000000e+00> : vector<8x98xf32>
    %13 = tpu.matmul %1, %12, %cst_11 {dimension_numbers = #tpu.dot_dimension_numbers<[1], [0], [0], [1], [0, 0, 1, 1], [], []>} : vector<8x16xbf16>, vector<16x98xbf16>, vector<8x98xf32> -> vector<8x98xf32>
    %cst_12 = arith.constant dense<0.000000e+00> : vector<8xf32>
    %14 = vector.multi_reduction <add>, %4, %cst_12 [1] : vector<8x98xf32> to vector<8xf32>
    %15 = vector.shape_cast %14 : vector<8xf32> to vector<8x1xf32>
    %cst_13 = arith.constant dense<0.000000e+00> : vector<8xf32>
    %16 = vector.multi_reduction <add>, %7, %cst_13 [1] : vector<8x98xf32> to vector<8xf32>
    %17 = vector.shape_cast %16 : vector<8xf32> to vector<8x1xf32>
    %18 = arith.addf %15, %17 : vector<8x1xf32>
    %cst_14 = arith.constant dense<0.000000e+00> : vector<8xf32>
    %19 = vector.multi_reduction <add>, %10, %cst_14 [1] : vector<8x98xf32> to vector<8xf32>
    %20 = vector.shape_cast %19 : vector<8xf32> to vector<8x1xf32>
    %21 = arith.addf %18, %20 : vector<8x1xf32>
    %cst_15 = arith.constant dense<0.000000e+00> : vector<8xf32>
    %22 = vector.multi_reduction <add>, %13, %cst_15 [1] : vector<8x98xf32> to vector<8xf32>
    %23 = vector.shape_cast %22 : vector<8xf32> to vector<8x1xf32>
    %24 = arith.addf %21, %23 : vector<8x1xf32>
    %cst_16 = arith.constant 0.00255102036 : f32
    %25 = vector.broadcast %cst_16 : f32 to vector<8x1xf32>
    %26 = arith.mulf %24, %25 : vector<8x1xf32>
    %27 = vector.broadcast %26 : vector<8x1xf32> to vector<8x98xf32>
    %28 = arith.subf %4, %27 : vector<8x98xf32>
    %29 = arith.mulf %28, %28 : vector<8x98xf32>
    %cst_17 = arith.constant dense<0.000000e+00> : vector<8xf32>
    %30 = vector.multi_reduction <add>, %29, %cst_17 [1] : vector<8x98xf32> to vector<8xf32>
    %31 = vector.shape_cast %30 : vector<8xf32> to vector<8x1xf32>
    %32 = vector.broadcast %26 : vector<8x1xf32> to vector<8x98xf32>
    %33 = arith.subf %7, %32 : vector<8x98xf32>
    %34 = arith.mulf %33, %33 : vector<8x98xf32>
    %cst_18 = arith.constant dense<0.000000e+00> : vector<8xf32>
    %35 = vector.multi_reduction <add>, %34, %cst_18 [1] : vector<8x98xf32> to vector<8xf32>
    %36 = vector.shape_cast %35 : vector<8xf32> to vector<8x1xf32>
    %37 = arith.addf %31, %36 : vector<8x1xf32>
    %38 = vector.broadcast %26 : vector<8x1xf32> to vector<8x98xf32>
    %39 = arith.subf %10, %38 : vector<8x98xf32>
    %40 = arith.mulf %39, %39 : vector<8x98xf32>
    %cst_19 = arith.constant dense<0.000000e+00> : vector<8xf32>
    %41 = vector.multi_reduction <add>, %40, %cst_19 [1] : vector<8x98xf32> to vector<8xf32>
    %42 = vector.shape_cast %41 : vector<8xf32> to vector<8x1xf32>
    %43 = arith.addf %37, %42 : vector<8x1xf32>
    %44 = vector.broadcast %26 : vector<8x1xf32> to vector<8x98xf32>
    %45 = arith.subf %13, %44 : vector<8x98xf32>
    %46 = arith.mulf %45, %45 : vector<8x98xf32>
    %cst_20 = arith.constant dense<0.000000e+00> : vector<8xf32>
    %47 = vector.multi_reduction <add>, %46, %cst_20 [1] : vector<8x98xf32> to vector<8xf32>
    %48 = vector.shape_cast %47 : vector<8xf32> to vector<8x1xf32>
    %49 = arith.addf %43, %48 : vector<8x1xf32>
    %cst_21 = arith.constant 0.00255102036 : f32
    %50 = vector.broadcast %cst_21 : f32 to vector<8x1xf32>
    %51 = arith.mulf %49, %50 : vector<8x1xf32>
    %c0_22 = arith.constant 0 : index
    %c0_23 = arith.constant 0 : index
    %52 = vector.load %arg6[%c0_22, %c0_23] : memref<8x1xf32, #tpu.memory_space<vmem>>, vector<8x1xf32>
    %cst_24 = arith.constant 9.99999974E-6 : f32
    %53 = vector.broadcast %cst_24 : f32 to vector<8x1xf32>
    %54 = arith.addf %51, %53 : vector<8x1xf32>
    %55 = math.rsqrt %54 : vector<8x1xf32>
    %56 = arith.mulf %52, %55 : vector<8x1xf32>
    %c0_25 = arith.constant 0 : index
    %c0_26 = arith.constant 0 : index
    %57 = vector.load %arg7[%c0_25, %c0_26] : memref<8x1xf32, #tpu.memory_space<vmem>>, vector<8x1xf32>
    %58 = arith.mulf %26, %56 : vector<8x1xf32>
    %59 = arith.subf %57, %58 : vector<8x1xf32>
    %60 = vector.broadcast %56 : vector<8x1xf32> to vector<8x98xf32>
    %61 = arith.mulf %4, %60 : vector<8x98xf32>
    %62 = vector.broadcast %59 : vector<8x1xf32> to vector<8x98xf32>
    %63 = arith.addf %61, %62 : vector<8x98xf32>
    %cst_27 = arith.constant 0.000000e+00 : f32
    %64 = vector.broadcast %cst_27 : f32 to vector<8x98xf32>
    %65 = arith.maximumf %63, %64 : vector<8x98xf32>
    %66 = vector.broadcast %56 : vector<8x1xf32> to vector<8x98xf32>
    %67 = arith.mulf %7, %66 : vector<8x98xf32>
    %68 = vector.broadcast %59 : vector<8x1xf32> to vector<8x98xf32>
    %69 = arith.addf %67, %68 : vector<8x98xf32>
    %cst_28 = arith.constant 0.000000e+00 : f32
    %70 = vector.broadcast %cst_28 : f32 to vector<8x98xf32>
    %71 = arith.maximumf %69, %70 : vector<8x98xf32>
    %72 = arith.addf %65, %71 : vector<8x98xf32>
    %73 = vector.broadcast %56 : vector<8x1xf32> to vector<8x98xf32>
    %74 = arith.mulf %10, %73 : vector<8x98xf32>
    %75 = vector.broadcast %59 : vector<8x1xf32> to vector<8x98xf32>
    %76 = arith.addf %74, %75 : vector<8x98xf32>
    %cst_29 = arith.constant 0.000000e+00 : f32
    %77 = vector.broadcast %cst_29 : f32 to vector<8x98xf32>
    %78 = arith.maximumf %76, %77 : vector<8x98xf32>
    %79 = arith.addf %72, %78 : vector<8x98xf32>
    %80 = vector.broadcast %56 : vector<8x1xf32> to vector<8x98xf32>
    %81 = arith.mulf %13, %80 : vector<8x98xf32>
    %82 = vector.broadcast %59 : vector<8x1xf32> to vector<8x98xf32>
    %83 = arith.addf %81, %82 : vector<8x98xf32>
    %cst_30 = arith.constant 0.000000e+00 : f32
    %84 = vector.broadcast %cst_30 : f32 to vector<8x98xf32>
    %85 = arith.maximumf %83, %84 : vector<8x98xf32>
    %86 = arith.addf %79, %85 : vector<8x98xf32>
    %cst_31 = arith.constant 2.500000e-01 : f32
    %87 = vector.broadcast %cst_31 : f32 to vector<8x98xf32>
    %88 = arith.mulf %87, %86 : vector<8x98xf32>
    %c0_32 = arith.constant 0 : index
    %c0_33 = arith.constant 0 : index
    %89 = vector.load %arg8[%c0_32, %c0_33] : memref<8x98xf32, #tpu.memory_space<vmem>>, vector<8x98xf32>
    tpu.vector_store %arg8[%c0_32, %c0_33], %88 {strides = array<i32>} : memref<8x98xf32, #tpu.memory_space<vmem>>, vector<8x98xf32>,
    return
  }
  func.func @transform_0(%arg0: i32) -> (i32, i32) {
    %c0_i32 = arith.constant 0 : i32
    %c0_i32_0 = arith.constant 0 : i32
    %c0_i32_1 = arith.constant 0 : i32
    return %c0_i32, %c0_i32_0 : i32, i32
  }
  func.func @transform_1(%arg0: i32) -> (i32, i32) {
    %c0_i32 = arith.constant 0 : i32
    %c0_i32_0 = arith.constant 0 : i32
    %c0_i32_1 = arith.constant 0 : i32
    return %c0_i32, %c0_i32_0 : i32, i32
  }
  func.func @transform_2(%arg0: i32) -> (i32, i32) {
    %c0_i32 = arith.constant 0 : i32
    %c0_i32_0 = arith.constant 0 : i32
    %c0_i32_1 = arith.constant 0 : i32
    return %c0_i32, %c0_i32_0 : i32, i32
  }
  func.func @transform_3(%arg0: i32) -> (i32, i32) {
    %c0_i32 = arith.constant 0 : i32
    %c0_i32_0 = arith.constant 0 : i32
    %c0_i32_1 = arith.constant 0 : i32
    return %c0_i32, %c0_i32_0 : i32, i32
  }
  func.func @transform_4(%arg0: i32) -> (i32, i32) {
    %c0_i32 = arith.constant 0 : i32
    %c0_i32_0 = arith.constant 0 : i32
    %c0_i32_1 = arith.constant 0 : i32
    return %c0_i32, %c0_i32_0 : i32, i32
  }
  func.func @transform_5(%arg0: i32) -> (i32, i32) {
    %c0_i32 = arith.constant 0 : i32
    %c0_i32_0 = arith.constant 0 : i32
    %c0_i32_1 = arith.constant 0 : i32
    return %c0_i32, %c0_i32_0 : i32, i32
  }
  func.func @transform_6(%arg0: i32) -> (i32, i32) {
    %c0_i32 = arith.constant 0 : i32
    %c0_i32_0 = arith.constant 0 : i32
    %c0_i32_1 = arith.constant 0 : i32
    return %c0_i32, %c0_i32_0 : i32, i32
  }
  func.func @transform_7(%arg0: i32) -> (i32, i32) {
    %c0_i32 = arith.constant 0 : i32
    %c0_i32_0 = arith.constant 0 : i32
    %c0_i32_1 = arith.constant 0 : i32
    return %c0_i32, %c0_i32_0 : i32, i32
  }
}

module attributes {stable_mosaic.version = 11 : i64} {
  func.func @_conv_bn_relu_kernel(%arg0: i32, %arg1: memref<8x98xf32, #tpu.memory_space<vmem>>, %arg2: memref<1x16x8xf32, #tpu.memory_space<vmem>>, %arg3: memref<16x1xf32, #tpu.memory_space<vmem>>, %arg4: memref<16x1xf32, #tpu.memory_space<vmem>>, %arg5: memref<16x98xf32, #tpu.memory_space<vmem>>) attributes {dimension_semantics = [#tpu.dimension_semantics<arbitrary>], iteration_bounds = array<i64: 1>, scalar_prefetch = 0 : i64, scratch_operands = 0 : i64, tpu.core_type = #tpu.core_type<tc>, window_params = [{transform_indices = @transform_0, window_bounds = array<i64: 8, 98>}, {transform_indices = @transform_1, window_bounds = array<i64: 1, 16, 8>}, {pipeline_mode = #tpu.pipeline_mode<synchronous>, transform_indices = @transform_2, window_bounds = array<i64: 16, 1>}, {pipeline_mode = #tpu.pipeline_mode<synchronous>, transform_indices = @transform_3, window_bounds = array<i64: 16, 1>}, {pipeline_mode = #tpu.pipeline_mode<synchronous>, transform_indices = @transform_4, window_bounds = array<i64: 16, 98>}]} {
    %c0_i32 = arith.constant 0 : i32
    %0 = arith.cmpi eq, %arg0, %c0_i32 : i32
    %1 = arith.extui %0 : i1 to i32
    %c0_i32_0 = arith.constant 0 : i32
    %2 = arith.cmpi ne, %1, %c0_i32_0 : i32
    scf.if %2 {
      %cst_11 = arith.constant 0.000000e+00 : f32
      %15 = vector.broadcast %cst_11 : f32 to vector<16x98xf32>
      %c0_12 = arith.constant 0 : index
      %c0_13 = arith.constant 0 : index
      %16 = vector.load %arg5[%c0_12, %c0_13] : memref<16x98xf32, #tpu.memory_space<vmem>>, vector<16x98xf32>
      tpu.vector_store %arg5[%c0_12, %c0_13], %15 {strides = array<i32>} : memref<16x98xf32, #tpu.memory_space<vmem>>, vector<16x98xf32>,
    } else {
    }
    %c0 = arith.constant 0 : index
    %c0_1 = arith.constant 0 : index
    %c0_2 = arith.constant 0 : index
    %3 = vector.load %arg2[%c0, %c0_1, %c0_2] : memref<1x16x8xf32, #tpu.memory_space<vmem>>, vector<1x16x8xf32>
    %4 = vector.shape_cast %3 : vector<1x16x8xf32> to vector<16x8xf32>
    %5 = arith.truncf %4 : vector<16x8xf32> to vector<16x8xbf16>
    %c0_3 = arith.constant 0 : index
    %c0_4 = arith.constant 0 : index
    %6 = vector.load %arg1[%c0_3, %c0_4] : memref<8x98xf32, #tpu.memory_space<vmem>>, vector<8x98xf32>
    %7 = arith.truncf %6 : vector<8x98xf32> to vector<8x98xbf16>
    %c0_5 = arith.constant 0 : index
    %c0_6 = arith.constant 0 : index
    %8 = vector.load %arg5[%c0_5, %c0_6] : memref<16x98xf32, #tpu.memory_space<vmem>>, vector<16x98xf32>
    %cst = arith.constant dense<0.000000e+00> : vector<16x98xf32>
    %9 = tpu.matmul %5, %7, %cst {dimension_numbers = #tpu.dot_dimension_numbers<[1], [0], [0], [1], [0, 0, 1, 1], [], []>} : vector<16x8xbf16>, vector<8x98xbf16>, vector<16x98xf32> -> vector<16x98xf32>
    %10 = arith.addf %8, %9 : vector<16x98xf32>
    %c0_7 = arith.constant 0 : index
    %c0_8 = arith.constant 0 : index
    %11 = vector.load %arg5[%c0_7, %c0_8] : memref<16x98xf32, #tpu.memory_space<vmem>>, vector<16x98xf32>
    tpu.vector_store %arg5[%c0_7, %c0_8], %10 {strides = array<i32>} : memref<16x98xf32, #tpu.memory_space<vmem>>, vector<16x98xf32>,
    %c0_i32_9 = arith.constant 0 : i32
    %12 = arith.cmpi eq, %arg0, %c0_i32_9 : i32
    %13 = arith.extui %12 : i1 to i32
    %c0_i32_10 = arith.constant 0 : i32
    %14 = arith.cmpi ne, %13, %c0_i32_10 : i32
    scf.if %14 {
      %c0_11 = arith.constant 0 : index
      %c0_12 = arith.constant 0 : index
      %15 = vector.load %arg5[%c0_11, %c0_12] : memref<16x98xf32, #tpu.memory_space<vmem>>, vector<16x98xf32>
      %cst_13 = arith.constant dense<0.000000e+00> : vector<16xf32>
      %16 = vector.multi_reduction <add>, %15, %cst_13 [1] : vector<16x98xf32> to vector<16xf32>
      %17 = vector.shape_cast %16 : vector<16xf32> to vector<16x1xf32>
      %cst_14 = arith.constant 9.800000e+01 : f32
      %18 = vector.broadcast %cst_14 : f32 to vector<16x1xf32>
      %19 = arith.divf %17, %18 : vector<16x1xf32>
      %20 = vector.broadcast %19 : vector<16x1xf32> to vector<16x98xf32>
      %21 = arith.subf %15, %20 : vector<16x98xf32>
      %22 = arith.mulf %21, %21 : vector<16x98xf32>
      %cst_15 = arith.constant dense<0.000000e+00> : vector<16xf32>
      %23 = vector.multi_reduction <add>, %22, %cst_15 [1] : vector<16x98xf32> to vector<16xf32>
      %24 = vector.shape_cast %23 : vector<16xf32> to vector<16x1xf32>
      %cst_16 = arith.constant 9.800000e+01 : f32
      %25 = vector.broadcast %cst_16 : f32 to vector<16x1xf32>
      %26 = arith.divf %24, %25 : vector<16x1xf32>
      %c0_17 = arith.constant 0 : index
      %c0_18 = arith.constant 0 : index
      %27 = vector.load %arg3[%c0_17, %c0_18] : memref<16x1xf32, #tpu.memory_space<vmem>>, vector<16x1xf32>
      %cst_19 = arith.constant 9.99999974E-6 : f32
      %28 = vector.broadcast %cst_19 : f32 to vector<16x1xf32>
      %29 = arith.addf %26, %28 : vector<16x1xf32>
      %30 = math.rsqrt %29 : vector<16x1xf32>
      %31 = arith.mulf %27, %30 : vector<16x1xf32>
      %c0_20 = arith.constant 0 : index
      %c0_21 = arith.constant 0 : index
      %32 = vector.load %arg4[%c0_20, %c0_21] : memref<16x1xf32, #tpu.memory_space<vmem>>, vector<16x1xf32>
      %33 = arith.mulf %19, %31 : vector<16x1xf32>
      %34 = arith.subf %32, %33 : vector<16x1xf32>
      %35 = vector.broadcast %31 : vector<16x1xf32> to vector<16x98xf32>
      %36 = arith.mulf %15, %35 : vector<16x98xf32>
      %37 = vector.broadcast %34 : vector<16x1xf32> to vector<16x98xf32>
      %38 = arith.addf %36, %37 : vector<16x98xf32>
      %cst_22 = arith.constant 0.000000e+00 : f32
      %39 = vector.broadcast %cst_22 : f32 to vector<16x98xf32>
      %40 = arith.maximumf %38, %39 : vector<16x98xf32>
      %c0_23 = arith.constant 0 : index
      %c0_24 = arith.constant 0 : index
      %41 = vector.load %arg5[%c0_23, %c0_24] : memref<16x98xf32, #tpu.memory_space<vmem>>, vector<16x98xf32>
      tpu.vector_store %arg5[%c0_23, %c0_24], %40 {strides = array<i32>} : memref<16x98xf32, #tpu.memory_space<vmem>>, vector<16x98xf32>,
    } else {
    }
    return
  }
  func.func @transform_0(%arg0: i32) -> (i32, i32) {
    %c0_i32 = arith.constant 0 : i32
    %c0_i32_0 = arith.constant 0 : i32
    return %arg0, %c0_i32 : i32, i32
  }
  func.func @transform_1(%arg0: i32) -> (i32, i32, i32) {
    %c0_i32 = arith.constant 0 : i32
    %c0_i32_0 = arith.constant 0 : i32
    %c0_i32_1 = arith.constant 0 : i32
    return %arg0, %c0_i32, %c0_i32_0 : i32, i32, i32
  }
  func.func @transform_2(%arg0: i32) -> (i32, i32) {
    %c0_i32 = arith.constant 0 : i32
    %c0_i32_0 = arith.constant 0 : i32
    %c0_i32_1 = arith.constant 0 : i32
    return %c0_i32, %c0_i32_0 : i32, i32
  }
  func.func @transform_3(%arg0: i32) -> (i32, i32) {
    %c0_i32 = arith.constant 0 : i32
    %c0_i32_0 = arith.constant 0 : i32
    %c0_i32_1 = arith.constant 0 : i32
    return %c0_i32, %c0_i32_0 : i32, i32
  }
  func.func @transform_4(%arg0: i32) -> (i32, i32) {
    %c0_i32 = arith.constant 0 : i32
    %c0_i32_0 = arith.constant 0 : i32
    %c0_i32_1 = arith.constant 0 : i32
    return %c0_i32, %c0_i32_0 : i32, i32
  }
}

module attributes {stable_mosaic.version = 11 : i64} {
  func.func @_conv_bn_relu_kernel(%arg0: i32, %arg1: memref<12x98xf32, #tpu.memory_space<vmem>>, %arg2: memref<1x16x12xf32, #tpu.memory_space<vmem>>, %arg3: memref<16x1xf32, #tpu.memory_space<vmem>>, %arg4: memref<16x1xf32, #tpu.memory_space<vmem>>, %arg5: memref<16x98xf32, #tpu.memory_space<vmem>>) attributes {dimension_semantics = [#tpu.dimension_semantics<arbitrary>], iteration_bounds = array<i64: 1>, scalar_prefetch = 0 : i64, scratch_operands = 0 : i64, tpu.core_type = #tpu.core_type<tc>, window_params = [{transform_indices = @transform_0, window_bounds = array<i64: 12, 98>}, {transform_indices = @transform_1, window_bounds = array<i64: 1, 16, 12>}, {pipeline_mode = #tpu.pipeline_mode<synchronous>, transform_indices = @transform_2, window_bounds = array<i64: 16, 1>}, {pipeline_mode = #tpu.pipeline_mode<synchronous>, transform_indices = @transform_3, window_bounds = array<i64: 16, 1>}, {pipeline_mode = #tpu.pipeline_mode<synchronous>, transform_indices = @transform_4, window_bounds = array<i64: 16, 98>}]} {
    %c0_i32 = arith.constant 0 : i32
    %0 = arith.cmpi eq, %arg0, %c0_i32 : i32
    %1 = arith.extui %0 : i1 to i32
    %c0_i32_0 = arith.constant 0 : i32
    %2 = arith.cmpi ne, %1, %c0_i32_0 : i32
    scf.if %2 {
      %cst_11 = arith.constant 0.000000e+00 : f32
      %15 = vector.broadcast %cst_11 : f32 to vector<16x98xf32>
      %c0_12 = arith.constant 0 : index
      %c0_13 = arith.constant 0 : index
      %16 = vector.load %arg5[%c0_12, %c0_13] : memref<16x98xf32, #tpu.memory_space<vmem>>, vector<16x98xf32>
      tpu.vector_store %arg5[%c0_12, %c0_13], %15 {strides = array<i32>} : memref<16x98xf32, #tpu.memory_space<vmem>>, vector<16x98xf32>,
    } else {
    }
    %c0 = arith.constant 0 : index
    %c0_1 = arith.constant 0 : index
    %c0_2 = arith.constant 0 : index
    %3 = vector.load %arg2[%c0, %c0_1, %c0_2] : memref<1x16x12xf32, #tpu.memory_space<vmem>>, vector<1x16x12xf32>
    %4 = vector.shape_cast %3 : vector<1x16x12xf32> to vector<16x12xf32>
    %5 = arith.truncf %4 : vector<16x12xf32> to vector<16x12xbf16>
    %c0_3 = arith.constant 0 : index
    %c0_4 = arith.constant 0 : index
    %6 = vector.load %arg1[%c0_3, %c0_4] : memref<12x98xf32, #tpu.memory_space<vmem>>, vector<12x98xf32>
    %7 = arith.truncf %6 : vector<12x98xf32> to vector<12x98xbf16>
    %c0_5 = arith.constant 0 : index
    %c0_6 = arith.constant 0 : index
    %8 = vector.load %arg5[%c0_5, %c0_6] : memref<16x98xf32, #tpu.memory_space<vmem>>, vector<16x98xf32>
    %cst = arith.constant dense<0.000000e+00> : vector<16x98xf32>
    %9 = tpu.matmul %5, %7, %cst {dimension_numbers = #tpu.dot_dimension_numbers<[1], [0], [0], [1], [0, 0, 1, 1], [], []>} : vector<16x12xbf16>, vector<12x98xbf16>, vector<16x98xf32> -> vector<16x98xf32>
    %10 = arith.addf %8, %9 : vector<16x98xf32>
    %c0_7 = arith.constant 0 : index
    %c0_8 = arith.constant 0 : index
    %11 = vector.load %arg5[%c0_7, %c0_8] : memref<16x98xf32, #tpu.memory_space<vmem>>, vector<16x98xf32>
    tpu.vector_store %arg5[%c0_7, %c0_8], %10 {strides = array<i32>} : memref<16x98xf32, #tpu.memory_space<vmem>>, vector<16x98xf32>,
    %c0_i32_9 = arith.constant 0 : i32
    %12 = arith.cmpi eq, %arg0, %c0_i32_9 : i32
    %13 = arith.extui %12 : i1 to i32
    %c0_i32_10 = arith.constant 0 : i32
    %14 = arith.cmpi ne, %13, %c0_i32_10 : i32
    scf.if %14 {
      %c0_11 = arith.constant 0 : index
      %c0_12 = arith.constant 0 : index
      %15 = vector.load %arg5[%c0_11, %c0_12] : memref<16x98xf32, #tpu.memory_space<vmem>>, vector<16x98xf32>
      %cst_13 = arith.constant dense<0.000000e+00> : vector<16xf32>
      %16 = vector.multi_reduction <add>, %15, %cst_13 [1] : vector<16x98xf32> to vector<16xf32>
      %17 = vector.shape_cast %16 : vector<16xf32> to vector<16x1xf32>
      %cst_14 = arith.constant 9.800000e+01 : f32
      %18 = vector.broadcast %cst_14 : f32 to vector<16x1xf32>
      %19 = arith.divf %17, %18 : vector<16x1xf32>
      %20 = vector.broadcast %19 : vector<16x1xf32> to vector<16x98xf32>
      %21 = arith.subf %15, %20 : vector<16x98xf32>
      %22 = arith.mulf %21, %21 : vector<16x98xf32>
      %cst_15 = arith.constant dense<0.000000e+00> : vector<16xf32>
      %23 = vector.multi_reduction <add>, %22, %cst_15 [1] : vector<16x98xf32> to vector<16xf32>
      %24 = vector.shape_cast %23 : vector<16xf32> to vector<16x1xf32>
      %cst_16 = arith.constant 9.800000e+01 : f32
      %25 = vector.broadcast %cst_16 : f32 to vector<16x1xf32>
      %26 = arith.divf %24, %25 : vector<16x1xf32>
      %c0_17 = arith.constant 0 : index
      %c0_18 = arith.constant 0 : index
      %27 = vector.load %arg3[%c0_17, %c0_18] : memref<16x1xf32, #tpu.memory_space<vmem>>, vector<16x1xf32>
      %cst_19 = arith.constant 9.99999974E-6 : f32
      %28 = vector.broadcast %cst_19 : f32 to vector<16x1xf32>
      %29 = arith.addf %26, %28 : vector<16x1xf32>
      %30 = math.rsqrt %29 : vector<16x1xf32>
      %31 = arith.mulf %27, %30 : vector<16x1xf32>
      %c0_20 = arith.constant 0 : index
      %c0_21 = arith.constant 0 : index
      %32 = vector.load %arg4[%c0_20, %c0_21] : memref<16x1xf32, #tpu.memory_space<vmem>>, vector<16x1xf32>
      %33 = arith.mulf %19, %31 : vector<16x1xf32>
      %34 = arith.subf %32, %33 : vector<16x1xf32>
      %35 = vector.broadcast %31 : vector<16x1xf32> to vector<16x98xf32>
      %36 = arith.mulf %15, %35 : vector<16x98xf32>
      %37 = vector.broadcast %34 : vector<16x1xf32> to vector<16x98xf32>
      %38 = arith.addf %36, %37 : vector<16x98xf32>
      %cst_22 = arith.constant 0.000000e+00 : f32
      %39 = vector.broadcast %cst_22 : f32 to vector<16x98xf32>
      %40 = arith.maximumf %38, %39 : vector<16x98xf32>
      %c0_23 = arith.constant 0 : index
      %c0_24 = arith.constant 0 : index
      %41 = vector.load %arg5[%c0_23, %c0_24] : memref<16x98xf32, #tpu.memory_space<vmem>>, vector<16x98xf32>
      tpu.vector_store %arg5[%c0_23, %c0_24], %40 {strides = array<i32>} : memref<16x98xf32, #tpu.memory_space<vmem>>, vector<16x98xf32>,
    } else {
    }
    return
  }
  func.func @transform_0(%arg0: i32) -> (i32, i32) {
    %c0_i32 = arith.constant 0 : i32
    %c0_i32_0 = arith.constant 0 : i32
    return %arg0, %c0_i32 : i32, i32
  }
  func.func @transform_1(%arg0: i32) -> (i32, i32, i32) {
    %c0_i32 = arith.constant 0 : i32
    %c0_i32_0 = arith.constant 0 : i32
    %c0_i32_1 = arith.constant 0 : i32
    return %arg0, %c0_i32, %c0_i32_0 : i32, i32, i32
  }
  func.func @transform_2(%arg0: i32) -> (i32, i32) {
    %c0_i32 = arith.constant 0 : i32
    %c0_i32_0 = arith.constant 0 : i32
    %c0_i32_1 = arith.constant 0 : i32
    return %c0_i32, %c0_i32_0 : i32, i32
  }
  func.func @transform_3(%arg0: i32) -> (i32, i32) {
    %c0_i32 = arith.constant 0 : i32
    %c0_i32_0 = arith.constant 0 : i32
    %c0_i32_1 = arith.constant 0 : i32
    return %c0_i32, %c0_i32_0 : i32, i32
  }
  func.func @transform_4(%arg0: i32) -> (i32, i32) {
    %c0_i32 = arith.constant 0 : i32
    %c0_i32_0 = arith.constant 0 : i32
    %c0_i32_1 = arith.constant 0 : i32
    return %c0_i32, %c0_i32_0 : i32, i32
  }
}

module attributes {stable_mosaic.version = 11 : i64} {
  func.func @_conv_bn_relu_kernel(%arg0: i32, %arg1: memref<80x98xbf16, #tpu.memory_space<vmem>>, %arg2: memref<1x4x80xf32, #tpu.memory_space<vmem>>, %arg3: memref<4x1xf32, #tpu.memory_space<vmem>>, %arg4: memref<4x1xf32, #tpu.memory_space<vmem>>, %arg5: memref<4x98xf32, #tpu.memory_space<vmem>>) attributes {dimension_semantics = [#tpu.dimension_semantics<arbitrary>], iteration_bounds = array<i64: 2>, scalar_prefetch = 0 : i64, scratch_operands = 0 : i64, tpu.core_type = #tpu.core_type<tc>, window_params = [{transform_indices = @transform_0, window_bounds = array<i64: 80, 98>}, {transform_indices = @transform_1, window_bounds = array<i64: 1, 4, 80>}, {pipeline_mode = #tpu.pipeline_mode<synchronous>, transform_indices = @transform_2, window_bounds = array<i64: 4, 1>}, {pipeline_mode = #tpu.pipeline_mode<synchronous>, transform_indices = @transform_3, window_bounds = array<i64: 4, 1>}, {pipeline_mode = #tpu.pipeline_mode<synchronous>, transform_indices = @transform_4, window_bounds = array<i64: 4, 98>}]} {
    %c0_i32 = arith.constant 0 : i32
    %0 = arith.cmpi eq, %arg0, %c0_i32 : i32
    %1 = arith.extui %0 : i1 to i32
    %c0_i32_0 = arith.constant 0 : i32
    %2 = arith.cmpi ne, %1, %c0_i32_0 : i32
    scf.if %2 {
      %cst_10 = arith.constant 0.000000e+00 : f32
      %14 = vector.broadcast %cst_10 : f32 to vector<4x98xf32>
      %c0_11 = arith.constant 0 : index
      %c0_12 = arith.constant 0 : index
      %15 = vector.load %arg5[%c0_11, %c0_12] : memref<4x98xf32, #tpu.memory_space<vmem>>, vector<4x98xf32>
      tpu.vector_store %arg5[%c0_11, %c0_12], %14 {strides = array<i32>} : memref<4x98xf32, #tpu.memory_space<vmem>>, vector<4x98xf32>,
    } else {
    }
    %c0 = arith.constant 0 : index
    %c0_1 = arith.constant 0 : index
    %c0_2 = arith.constant 0 : index
    %3 = vector.load %arg2[%c0, %c0_1, %c0_2] : memref<1x4x80xf32, #tpu.memory_space<vmem>>, vector<1x4x80xf32>
    %4 = vector.shape_cast %3 : vector<1x4x80xf32> to vector<4x80xf32>
    %5 = arith.truncf %4 : vector<4x80xf32> to vector<4x80xbf16>
    %c0_3 = arith.constant 0 : index
    %c0_4 = arith.constant 0 : index
    %6 = vector.load %arg1[%c0_3, %c0_4] : memref<80x98xbf16, #tpu.memory_space<vmem>>, vector<80x98xbf16>
    %c0_5 = arith.constant 0 : index
    %c0_6 = arith.constant 0 : index
    %7 = vector.load %arg5[%c0_5, %c0_6] : memref<4x98xf32, #tpu.memory_space<vmem>>, vector<4x98xf32>
    %cst = arith.constant dense<0.000000e+00> : vector<4x98xf32>
    %8 = tpu.matmul %5, %6, %cst {dimension_numbers = #tpu.dot_dimension_numbers<[1], [0], [0], [1], [0, 0, 1, 1], [], []>} : vector<4x80xbf16>, vector<80x98xbf16>, vector<4x98xf32> -> vector<4x98xf32>
    %9 = arith.addf %7, %8 : vector<4x98xf32>
    %c0_7 = arith.constant 0 : index
    %c0_8 = arith.constant 0 : index
    %10 = vector.load %arg5[%c0_7, %c0_8] : memref<4x98xf32, #tpu.memory_space<vmem>>, vector<4x98xf32>
    tpu.vector_store %arg5[%c0_7, %c0_8], %9 {strides = array<i32>} : memref<4x98xf32, #tpu.memory_space<vmem>>, vector<4x98xf32>,
    %c1_i32 = arith.constant 1 : i32
    %11 = arith.cmpi eq, %arg0, %c1_i32 : i32
    %12 = arith.extui %11 : i1 to i32
    %c0_i32_9 = arith.constant 0 : i32
    %13 = arith.cmpi ne, %12, %c0_i32_9 : i32
    scf.if %13 {
      %c0_10 = arith.constant 0 : index
      %c0_11 = arith.constant 0 : index
      %14 = vector.load %arg5[%c0_10, %c0_11] : memref<4x98xf32, #tpu.memory_space<vmem>>, vector<4x98xf32>
      %cst_12 = arith.constant dense<0.000000e+00> : vector<4xf32>
      %15 = vector.multi_reduction <add>, %14, %cst_12 [1] : vector<4x98xf32> to vector<4xf32>
      %16 = vector.shape_cast %15 : vector<4xf32> to vector<4x1xf32>
      %cst_13 = arith.constant 9.800000e+01 : f32
      %17 = vector.broadcast %cst_13 : f32 to vector<4x1xf32>
      %18 = arith.divf %16, %17 : vector<4x1xf32>
      %19 = vector.broadcast %18 : vector<4x1xf32> to vector<4x98xf32>
      %20 = arith.subf %14, %19 : vector<4x98xf32>
      %21 = arith.mulf %20, %20 : vector<4x98xf32>
      %cst_14 = arith.constant dense<0.000000e+00> : vector<4xf32>
      %22 = vector.multi_reduction <add>, %21, %cst_14 [1] : vector<4x98xf32> to vector<4xf32>
      %23 = vector.shape_cast %22 : vector<4xf32> to vector<4x1xf32>
      %cst_15 = arith.constant 9.800000e+01 : f32
      %24 = vector.broadcast %cst_15 : f32 to vector<4x1xf32>
      %25 = arith.divf %23, %24 : vector<4x1xf32>
      %c0_16 = arith.constant 0 : index
      %c0_17 = arith.constant 0 : index
      %26 = vector.load %arg3[%c0_16, %c0_17] : memref<4x1xf32, #tpu.memory_space<vmem>>, vector<4x1xf32>
      %cst_18 = arith.constant 9.99999974E-6 : f32
      %27 = vector.broadcast %cst_18 : f32 to vector<4x1xf32>
      %28 = arith.addf %25, %27 : vector<4x1xf32>
      %29 = math.rsqrt %28 : vector<4x1xf32>
      %30 = arith.mulf %26, %29 : vector<4x1xf32>
      %c0_19 = arith.constant 0 : index
      %c0_20 = arith.constant 0 : index
      %31 = vector.load %arg4[%c0_19, %c0_20] : memref<4x1xf32, #tpu.memory_space<vmem>>, vector<4x1xf32>
      %32 = arith.mulf %18, %30 : vector<4x1xf32>
      %33 = arith.subf %31, %32 : vector<4x1xf32>
      %34 = vector.broadcast %30 : vector<4x1xf32> to vector<4x98xf32>
      %35 = arith.mulf %14, %34 : vector<4x98xf32>
      %36 = vector.broadcast %33 : vector<4x1xf32> to vector<4x98xf32>
      %37 = arith.addf %35, %36 : vector<4x98xf32>
      %cst_21 = arith.constant 0.000000e+00 : f32
      %38 = vector.broadcast %cst_21 : f32 to vector<4x98xf32>
      %39 = arith.maximumf %37, %38 : vector<4x98xf32>
      %c0_22 = arith.constant 0 : index
      %c0_23 = arith.constant 0 : index
      %40 = vector.load %arg5[%c0_22, %c0_23] : memref<4x98xf32, #tpu.memory_space<vmem>>, vector<4x98xf32>
      tpu.vector_store %arg5[%c0_22, %c0_23], %39 {strides = array<i32>} : memref<4x98xf32, #tpu.memory_space<vmem>>, vector<4x98xf32>,
    } else {
    }
    return
  }
  func.func @transform_0(%arg0: i32) -> (i32, i32) {
    %c0_i32 = arith.constant 0 : i32
    %c0_i32_0 = arith.constant 0 : i32
    return %arg0, %c0_i32 : i32, i32
  }
  func.func @transform_1(%arg0: i32) -> (i32, i32, i32) {
    %c0_i32 = arith.constant 0 : i32
    %c0_i32_0 = arith.constant 0 : i32
    %c0_i32_1 = arith.constant 0 : i32
    return %arg0, %c0_i32, %c0_i32_0 : i32, i32, i32
  }
  func.func @transform_2(%arg0: i32) -> (i32, i32) {
    %c0_i32 = arith.constant 0 : i32
    %c0_i32_0 = arith.constant 0 : i32
    %c0_i32_1 = arith.constant 0 : i32
    return %c0_i32, %c0_i32_0 : i32, i32
  }
  func.func @transform_3(%arg0: i32) -> (i32, i32) {
    %c0_i32 = arith.constant 0 : i32
    %c0_i32_0 = arith.constant 0 : i32
    %c0_i32_1 = arith.constant 0 : i32
    return %c0_i32, %c0_i32_0 : i32, i32
  }
  func.func @transform_4(%arg0: i32) -> (i32, i32) {
    %c0_i32 = arith.constant 0 : i32
    %c0_i32_0 = arith.constant 0 : i32
    %c0_i32_1 = arith.constant 0 : i32
    return %c0_i32, %c0_i32_0 : i32, i32
  }
}

module attributes {stable_mosaic.version = 11 : i64} {
  func.func @_gap_fc_softmax_kernel(%arg0: i32, %arg1: memref<16x2x49xf32, #tpu.memory_space<vmem>>, %arg2: memref<16x10xf32, #tpu.memory_space<vmem>>, %arg3: memref<1x10xf32, #tpu.memory_space<vmem>>, %arg4: memref<2x10xf32, #tpu.memory_space<vmem>>) attributes {dimension_semantics = [#tpu.dimension_semantics<arbitrary>], iteration_bounds = array<i64: 1>, scalar_prefetch = 0 : i64, scratch_operands = 0 : i64, tpu.core_type = #tpu.core_type<tc>, window_params = [{pipeline_mode = #tpu.pipeline_mode<synchronous>, transform_indices = @transform_0, window_bounds = array<i64: 16, 2, 49>}, {pipeline_mode = #tpu.pipeline_mode<synchronous>, transform_indices = @transform_1, window_bounds = array<i64: 16, 10>}, {pipeline_mode = #tpu.pipeline_mode<synchronous>, transform_indices = @transform_2, window_bounds = array<i64: 1, 10>}, {pipeline_mode = #tpu.pipeline_mode<synchronous>, transform_indices = @transform_3, window_bounds = array<i64: 2, 10>}]} {
    %c0 = arith.constant 0 : index
    %c0_0 = arith.constant 0 : index
    %c0_1 = arith.constant 0 : index
    %0 = vector.load %arg1[%c0, %c0_0, %c0_1] : memref<16x2x49xf32, #tpu.memory_space<vmem>>, vector<16x2x49xf32>
    %cst = arith.constant dense<0.000000e+00> : vector<16x2xf32>
    %1 = vector.multi_reduction <add>, %0, %cst [2] : vector<16x2x49xf32> to vector<16x2xf32>
    %cst_2 = arith.constant 4.900000e+01 : f32
    %2 = vector.broadcast %cst_2 : f32 to vector<16x2xf32>
    %3 = arith.divf %1, %2 : vector<16x2xf32>
    %4 = vector.shape_cast %3 : vector<16x2xf32> to vector<16x2x1xf32>
    %c0_3 = arith.constant 0 : index
    %c0_4 = arith.constant 0 : index
    %5 = vector.load %arg2[%c0_3, %c0_4] : memref<16x10xf32, #tpu.memory_space<vmem>>, vector<16x10xf32>
    %6 = vector.shape_cast %5 : vector<16x10xf32> to vector<16x1x10xf32>
    %7 = vector.broadcast %4 : vector<16x2x1xf32> to vector<16x2x10xf32>
    %8 = vector.broadcast %6 : vector<16x1x10xf32> to vector<16x2x10xf32>
    %9 = arith.mulf %7, %8 : vector<16x2x10xf32>
    %cst_5 = arith.constant dense<0.000000e+00> : vector<2x10xf32>
    %10 = vector.multi_reduction <add>, %9, %cst_5 [0] : vector<16x2x10xf32> to vector<2x10xf32>
    %c0_6 = arith.constant 0 : index
    %c0_7 = arith.constant 0 : index
    %11 = vector.load %arg3[%c0_6, %c0_7] : memref<1x10xf32, #tpu.memory_space<vmem>>, vector<1x10xf32>
    %12 = vector.broadcast %11 : vector<1x10xf32> to vector<2x10xf32>
    %13 = arith.addf %10, %12 : vector<2x10xf32>
    %cst_8 = arith.constant dense<0xFF800000> : vector<2xf32>
    %14 = vector.multi_reduction <maximumf>, %13, %cst_8 [1] : vector<2x10xf32> to vector<2xf32>
    %15 = vector.shape_cast %14 : vector<2xf32> to vector<2x1xf32>
    %16 = vector.broadcast %15 : vector<2x1xf32> to vector<2x10xf32>
    %17 = arith.subf %13, %16 : vector<2x10xf32>
    %18 = math.exp %17 : vector<2x10xf32>
    %cst_9 = arith.constant dense<0.000000e+00> : vector<2xf32>
    %19 = vector.multi_reduction <add>, %18, %cst_9 [1] : vector<2x10xf32> to vector<2xf32>
    %20 = vector.shape_cast %19 : vector<2xf32> to vector<2x1xf32>
    %21 = tpu.reciprocal %20 {approx = true} : vector<2x1xf32> -> vector<2x1xf32>
    %22 = vector.broadcast %21 : vector<2x1xf32> to vector<2x10xf32>
    %23 = arith.mulf %18, %22 : vector<2x10xf32>
    %c0_10 = arith.constant 0 : index
    %c0_11 = arith.constant 0 : index
    %24 = vector.load %arg4[%c0_10, %c0_11] : memref<2x10xf32, #tpu.memory_space<vmem>>, vector<2x10xf32>
    tpu.vector_store %arg4[%c0_10, %c0_11], %23 {strides = array<i32>} : memref<2x10xf32, #tpu.memory_space<vmem>>, vector<2x10xf32>,
    return
  }
  func.func @transform_0(%arg0: i32) -> (i32, i32, i32) {
    %c0_i32 = arith.constant 0 : i32
    %c0_i32_0 = arith.constant 0 : i32
    %c0_i32_1 = arith.constant 0 : i32
    %c0_i32_2 = arith.constant 0 : i32
    return %c0_i32, %c0_i32_0, %c0_i32_1 : i32, i32, i32
  }
  func.func @transform_1(%arg0: i32) -> (i32, i32) {
    %c0_i32 = arith.constant 0 : i32
    %c0_i32_0 = arith.constant 0 : i32
    %c0_i32_1 = arith.constant 0 : i32
    return %c0_i32, %c0_i32_0 : i32, i32
  }
  func.func @transform_2(%arg0: i32) -> (i32, i32) {
    %c0_i32 = arith.constant 0 : i32
    %c0_i32_0 = arith.constant 0 : i32
    %c0_i32_1 = arith.constant 0 : i32
    return %c0_i32, %c0_i32_0 : i32, i32
  }
  func.func @transform_3(%arg0: i32) -> (i32, i32) {
    %c0_i32 = arith.constant 0 : i32
    %c0_i32_0 = arith.constant 0 : i32
    %c0_i32_1 = arith.constant 0 : i32
    return %c0_i32, %c0_i32_0 : i32, i32
  }
}

</mosaic_0001>

<bundles_post_ra>
// kernel: densenet_forward.12
= control target key start
LH: loop header
LB: loop body
LE: loop exit
PB: predicated region body
PF: predicated region fallthrough
CT: control target
= control target key end

     0   :  { %s1394_s15 = smov 0   ;;  %s1780_s0 = inlined_call_operand.vmem [shape: bf16[160,1568], index: 0, kind: input, shape index: {}]   ;;  %s1781_s1 = inlined_call_operand.vmem [shape: f32[2,8,80], index: 1, kind: input, shape index: {}]   ;;  %s1782_s2 = inlined_call_operand.vmem [shape: f32[8,1], index: 2, kind: input, shape index: {}]   ;;  %s1783_s3 = inlined_call_operand.vmem [shape: f32[8,1], index: 3, kind: input, shape index: {}]   ;;  %s1784_s4 = inlined_call_operand.vmem [shape: f32[8,1568], index: 4, kind: output, shape index: {}]  }
   0x1 LB: > { %s1400_s16 = sadd.s32 4294967295, %s1362_s15   ;;  %p1144_p0 = scmp.ge.s32.totalorder %s1362_s15, 1  ;;  %s1362_s15 = sphi %s1394_s15, %s14_s15  }
   0x2   : > { %p168_p1 = scmp.lt.s32.totalorder %s1362_s15, 3 }
   0x4   : > { %p169_p2 = pnand %p1144_p0, %p168_p1 }
   0x5   : > { %s194_s17 = smul.u32 (!%p169_p2), 10, %s1400_s16  ;;  %p201_p3 = scmp.lt.s32.totalorder (!%p169_p2), %s1400_s16, 1 }
   0x6   : > { %172 = sbr.rel (%p169_p2) target bundleno = 797 (0x31d), region = 36  ;;  %p1147_p5 = scmp.ne.s32.totalorder (!%p169_p2), %s1400_s16, 0 }
   0x7   : > { %p195_p4 = scmp.lt.s32.totalorder (!%p169_p2), %s194_s17, 19 }
   0xb   : > { %s202_s18 = scalar_select %p201_p3, %s1400_s16, 1 }
   0xc   : > { %s1786_s17 = smov (!%p195_p4, %s194_s17), 19  ;;  %209 = sbr.rel (%p1147_p5) target bundleno = 25 (0x19), region = 40 }
   0xd   : > { %s1146_s19 = sshll.u32 %s202_s18, 3  ;;  %s1243_s20 = smul.u32 52, %s1786_s17 }
   0xe   : > { %s1410_s23 = scalar_lea.vmem %s1781_s1, %s1146_s19 }
   0xf   : > { %s1415_s26 = scalar_lea.vmem %s1780_s0, %s1243_s20 }
  0x11   : > { %vm222_vm0 = vcmask 261120   ;;  %v1364_v0 = vmov 0.0  }
  0x12   : > { %210 = vst [vmem:[%s1784_s4] sm:$0xff] %v1364_v0  ;;  %211 = vst [vmem:[%s1784_s4 + $0x8] sm:$0xff] %v1364_v0 }
  0x13   : > { %212 = vst [vmem:[%s1784_s4 + $0x10] sm:$0xff] %v1364_v0  ;;  %213 = vst [vmem:[%s1784_s4 + $0x18] sm:$0xff] %v1364_v0 }
  0x14   : > { %214 = vst [vmem:[%s1784_s4 + $0x20] sm:$0xff] %v1364_v0  ;;  %215 = vst [vmem:[%s1784_s4 + $0x28] sm:$0xff] %v1364_v0 }
  0x15   : > { %216 = vst [vmem:[%s1784_s4 + $0x30] sm:$0xff] %v1364_v0  ;;  %217 = vst [vmem:[%s1784_s4 + $0x38] sm:$0xff] %v1364_v0 }
  0x16   : > { %218 = vst [vmem:[%s1784_s4 + $0x40] sm:$0xff] %v1364_v0  ;;  %219 = vst [vmem:[%s1784_s4 + $0x48] sm:$0xff] %v1364_v0 }
  0x17   : > { %220 = vst [vmem:[%s1784_s4 + $0x50] sm:$0xff] %v1364_v0  ;;  %221 = vst [vmem:[%s1784_s4 + $0x58] sm:$0xff] %v1364_v0 }
  0x18   : > { %223 = vst.msk [vmem:[%s1784_s4 + $0x60] sm:$0xff] %vm222_vm0, %v1364_v0 }
  0x19 PF: > { %v1257_v1 = vld [vmem:[%s1415_s26 + $0x1a4] ss:$52 sps:$4 sm:$0xff]   ;;  %v1259_v2 = vld [vmem:[%s1415_s26 + $0x1a0] ss:$52 sps:$4 sm:$0xff]   ;;  %v1365_v3 = vmov 0   ;;  %vm639_vm1 = vcmask 654336  }
  0x1a   : > { %675 = vmatprep.mubr.bf16.mxu0 %v1365_v3  ;;  %716 = vmatprep.mubr.bf16.mxu1 %v1365_v3  ;;  %v1260_v4 = vld [vmem:[%s1415_s26 + $0x13c] ss:$52 sps:$4 sm:$0xff]   ;;  %v1262_v5 = vld [vmem:[%s1415_s26 + $0x138] ss:$52 sps:$4 sm:$0xff]   ;;  %v1263_v6 = vld [vmem:[%s1415_s26 + $0xd4] ss:$52 sps:$4 sm:$0xff]  }
  0x1b   : > { %649 = vmatprep.subr.bf16.mxu0 %v1257_v1  ;;  %v1269_v7 = vld [vmem:[%s1415_s26 + $0x1ac] ss:$52 sps:$4 sm:$0xff]   ;;  %v1271_v8 = vld [vmem:[%s1415_s26 + $0x1a8] ss:$52 sps:$4 sm:$0xff]   ;;  %v1265_v9 = vld [vmem:[%s1415_s26 + $0xd0] ss:$52 sps:$4 sm:$0xff]  }
  0x1c   : > { %650 = vmatpush1.bf16.msra.mxu0 %v1259_v2  ;;  %v1266_v10 = vld [vmem:[%s1415_s26 + $0x6c] ss:$52 sps:$4 sm:$0xff]   ;;  %690 = vmatprep.subr.bf16.mxu1 %v1269_v7  ;;  %v1275_v11 = vld [vmem:[%s1415_s26 + $0x144] ss:$52 sps:$4 sm:$0xff]   ;;  %v1268_v13 = vld [vmem:[%s1415_s26 + $0x68] ss:$52 sps:$4 sm:$0xff]  }
  0x1d   : > { %651 = vmatprep.subr.bf16.mxu0 %v1260_v4  ;;  %691 = vmatpush1.bf16.msra.mxu1 %v1271_v8  ;;  %v1277_v12 = vld [vmem:[%s1415_s26 + $0x140] ss:$52 sps:$4 sm:$0xff]   ;;  %v1281_v14 = vld [vmem:[%s1415_s26 + $0xdc] ss:$52 sps:$4 sm:$0xff]   ;;  %v1272_v15 = vld [vmem:[%s1415_s26 + $0x4] ss:$52 sps:$4 sm:$0xff]  }
  0x1e   : > { %692 = vmatprep.subr.bf16.mxu1 %v1275_v11  ;;  %v1283_v16 = vld [vmem:[%s1415_s26 + $0xd8] ss:$52 sps:$4 sm:$0xff]   ;;  %v1274_v17 = vld [vmem:[%s1415_s26] ss:$52 sps:$4 sm:$0xff]   ;;  %v1289_v21 = vld [vmem:[%s1415_s26 + $0x70] ss:$52 sps:$4 sm:$0xff]  }
  0x1f   : > { %v1287_v18 = vld [vmem:[%s1415_s26 + $0x74] ss:$52 sps:$4 sm:$0xff]   ;;  %v224_v19 = vld [vmem:[%s1410_s23] sm:$0xff]  ;;  %v1301_v27 = vld [vmem:[%s1415_s26 + $0x1bc] ss:$52 sps:$4 sm:$0xff]   ;;  %v1366_v0 = vmov 0.0  }
  0x20   : > { %652 = vmatpush1.bf16.msra.mxu0 %v1262_v5  ;;  %v1280_v20 = vld [vmem:[%s1415_s26 + $0x1b4] ss:$52 sps:$4 sm:$0xff]   ;;  %v1479_v22 = vpack.c.bf16 %v224_v19, %v224_v19  ;;  %v1293_v23 = vld [vmem:[%s1415_s26 + $0xc] ss:$52 sps:$4 sm:$0xff]   ;;  %v1278_v24 = vld [vmem:[%s1415_s26 + $0x1b0] ss:$52 sps:$4 sm:$0xff]  }
  0x21   : > { %653 = vmatprep.subr.bf16.mxu0 %v1263_v6  ;;  %693 = vmatpush1.bf16.msra.mxu1 %v1277_v12  ;;  %v1286_v25 = vld [vmem:[%s1415_s26 + $0x14c] ss:$52 sps:$4 sm:$0xff]   ;;  %v1295_v26 = vld [vmem:[%s1415_s26 + $0x8] ss:$52 sps:$4 sm:$0xff]   ;;  %v1292_v29 = vld [vmem:[%s1415_s26 + $0xe4] ss:$52 sps:$4 sm:$0xff]  }
  0x22   : > { %694 = vmatprep.subr.bf16.mxu1 %v1281_v14  ;;  %v1284_v28 = vld [vmem:[%s1415_s26 + $0x148] ss:$52 sps:$4 sm:$0xff]   ;;  %v1299_v30 = vld [vmem:[%s1415_s26 + $0x1b8] ss:$52 sps:$4 sm:$0xff]   ;;  %v1290_v32 = vld [vmem:[%s1415_s26 + $0xe0] ss:$52 sps:$4 sm:$0xff]  }
  0x23   : > { %v1307_v31 = vld [vmem:[%s1415_s26 + $0x154] ss:$52 sps:$4 sm:$0xff]   ;;  %v1298_v33 = vld [vmem:[%s1415_s26 + $0x7c] ss:$52 sps:$4 sm:$0xff]   ;;  %v1313_v35 = vld [vmem:[%s1415_s26 + $0xec] ss:$52 sps:$4 sm:$0xff]  }
  0x24   : > { %654 = vmatpush1.bf16.msra.mxu0 %v1265_v9  ;;  %v1305_v34 = vld [vmem:[%s1415_s26 + $0x150] ss:$52 sps:$4 sm:$0xff]   ;;  %v1296_v36 = vld [vmem:[%s1415_s26 + $0x78] ss:$52 sps:$4 sm:$0xff]   ;;  %v1304_v37 = vld [vmem:[%s1415_s26 + $0x14] ss:$52 sps:$4 sm:$0xff]  }
  0x25   : > { %655 = vmatprep.subr.bf16.mxu0 %v1266_v10  ;;  %695 = vmatpush1.bf16.msra.mxu1 %v1283_v16  ;;  %v1311_v38 = vld [vmem:[%s1415_s26 + $0xe8] ss:$52 sps:$4 sm:$0xff]   ;;  %v1319_v39 = vld [vmem:[%s1415_s26 + $0x84] ss:$52 sps:$4 sm:$0xff]   ;;  %v1317_v42 = vld [vmem:[%s1415_s26 + $0x80] ss:$52 sps:$4 sm:$0xff]  }
  0x26   : > { %696 = vmatprep.subr.bf16.mxu1 %v1287_v18  ;;  %v1302_v40 = vld [vmem:[%s1415_s26 + $0x10] ss:$52 sps:$4 sm:$0xff]   ;;  %v1308_v44 = vld [vmem:[%s1415_s26 + $0x1c0] ss:$52 sps:$4 sm:$0xff]   ;;  %v1323_v46 = vld [vmem:[%s1415_s26 + $0x18] ss:$52 sps:$4 sm:$0xff]  }
  0x27   : > { %v1310_v41 = vld [vmem:[%s1415_s26 + $0x1c4] ss:$52 sps:$4 sm:$0xff]   ;;  %v1325_v43 = vld [vmem:[%s1415_s26 + $0x1c] ss:$52 sps:$4 sm:$0xff]   ;;  %v1331_v47 = vld [vmem:[%s1415_s26 + $0x1cc] ss:$52 sps:$4 sm:$0xff]  }
  0x28   : > { %656 = vmatpush1.bf16.msra.mxu0 %v1268_v13  ;;  %v1316_v45 = vld [vmem:[%s1415_s26 + $0x15c] ss:$52 sps:$4 sm:$0xff]   ;;  %v1314_v48 = vld [vmem:[%s1415_s26 + $0x158] ss:$52 sps:$4 sm:$0xff]   ;;  %v1322_v49 = vld [vmem:[%s1415_s26 + $0xf4] ss:$52 sps:$4 sm:$0xff]  }
  0x29   : > { %657 = vmatprep.subr.bf16.mxu0 %v1272_v15  ;;  %697 = vmatpush1.bf16.msra.mxu1 %v1289_v21  ;;  %v1329_v50 = vld [vmem:[%s1415_s26 + $0x1c8] ss:$52 sps:$4 sm:$0xff]   ;;  %v1337_v51 = vld [vmem:[%s1415_s26 + $0x164] ss:$52 sps:$4 sm:$0xff]   ;;  %v1328_v53 = vld [vmem:[%s1415_s26 + $0x8c] ss:$52 sps:$4 sm:$0xff]  }
  0x2a   : > { %698 = vmatprep.subr.bf16.mxu1 %v1293_v23  ;;  %v1320_v52 = vld [vmem:[%s1415_s26 + $0xf0] ss:$52 sps:$4 sm:$0xff]   ;;  %v1335_v54 = vld [vmem:[%s1415_s26 + $0x160] ss:$52 sps:$4 sm:$0xff]   ;;  %v1326_v56 = vld [vmem:[%s1415_s26 + $0x88] ss:$52 sps:$4 sm:$0xff]  }
  0x2b   : > { %v1341_v55 = vld [vmem:[%s1415_s26 + $0xfc] ss:$52 sps:$4 sm:$0xff]   ;;  %v1334_v57 = vld [vmem:[%s1415_s26 + $0x24] ss:$52 sps:$4 sm:$0xff]   ;;  %v1345_v59 = vld [vmem:[%s1415_s26 + $0x94] ss:$52 sps:$4 sm:$0xff]  }
  0x2c   : > { %658 = vmatpush1.bf16.msra.mxu0 %v1274_v17  ;;  %v1339_v58 = vld [vmem:[%s1415_s26 + $0xf8] ss:$52 sps:$4 sm:$0xff]   ;;  %v1332_v60 = vld [vmem:[%s1415_s26 + $0x20] ss:$52 sps:$4 sm:$0xff]   ;;  %v1343_v61 = vld [vmem:[%s1415_s26 + $0x90] ss:$52 sps:$4 sm:$0xff]  }
  0x2d   : > { %731 = vmatprep.subr.bf16.mxu0 %v1280_v20  ;;  %699 = vmatpush1.bf16.msra.mxu1 %v1295_v26  ;;  %v1349_v62 = vld [vmem:[%s1415_s26 + $0x2c] ss:$52 sps:$4 sm:$0xff]   ;;  %v1338_v63 = vld [vmem:[%s1415_s26 + $0x1d0] ss:$52 sps:$4 sm:$0xff]   ;;  %v1347_v1 = vld [vmem:[%s1415_s26 + $0x28] ss:$52 sps:$4 sm:$0xff]  }
  0x2e   : > { %772 = vmatprep.subr.bf16.mxu1 %v1301_v27  ;;  %v1342_v2 = vld [vmem:[%s1415_s26 + $0x168] ss:$52 sps:$4 sm:$0xff]   ;;  %vm1367_vm2 = vmmov 0   ;;  %v1350_v4 = vld [vmem:[%s1415_s26 + $0x98] ss:$52 sps:$4 sm:$0xff]   ;;  %v296_v6 = vld [vmem:[%s1784_s4] sm:$0xff] }
  0x2f   : > { %1213 = vmatmul.mubr.msk.bf16.vlgmr.msra.gmra.mxu0 %vm639_vm1, %v1479_v22  ;;  %v1351_v5 = vld [vmem:[%s1415_s26 + $0x30] ss:$52 sps:$4 sm:$0xff]   ;;  %v297_v8 = vld [vmem:[%s1784_s4 + $0x8] sm:$0xff]  ;;  %v299_v16 = vld [vmem:[%s1784_s4 + $0x18] sm:$0xff]  ;;  %vm954_vm3 = vcmask 261120   ;;  %p1220_p6 = scmp.ne.s32.totalorder %s1400_s16, 1 }
  0x30   : > { %732 = vmatpush1.bf16.msra.mxu0 %v1278_v24  ;;  %757 = vmatprep.mubr.bf16.mxu0 %v1365_v3  ;;  %v298_v13 = vld [vmem:[%s1784_s4 + $0x10] sm:$0xff]  ;;  %v301_v24 = vld [vmem:[%s1784_s4 + $0x28] sm:$0xff] }
  0x31   : > { %733 = vmatprep.subr.bf16.mxu0 %v1286_v25  ;;  %1214 = vmatmul.mubr.msk.bf16.vlgmr.msra.gmra.mxu1 %vm639_vm1, %v1479_v22 }
  0x32   : > { %773 = vmatpush1.bf16.msra.mxu1 %v1299_v30  ;;  %798 = vmatprep.mubr.bf16.mxu1 %v1365_v3 }
  0x33   : > { %774 = vmatprep.subr.bf16.mxu1 %v1307_v31 }
  0x34   : > { %734 = vmatpush1.bf16.msra.mxu0 %v1284_v28 }
  0x35   : > { %735 = vmatprep.subr.bf16.mxu0 %v1292_v29  ;;  %v302_v29 = vld [vmem:[%s1784_s4 + $0x30] sm:$0xff] }
  0x36   : > { %775 = vmatpush1.bf16.msra.mxu1 %v1305_v34 }
  0x37   : > { %776 = vmatprep.subr.bf16.mxu1 %v1313_v35 }
  0x38   : > { %736 = vmatpush1.bf16.msra.mxu0 %v1290_v32  ;;  %v303_v32 = vld [vmem:[%s1784_s4 + $0x38] sm:$0xff] }
  0x39   : > { %737 = vmatprep.subr.bf16.mxu0 %v1298_v33 }
  0x3a   : > { %777 = vmatpush1.bf16.msra.mxu1 %v1311_v38  ;;  %v304_v38 = vld [vmem:[%s1784_s4 + $0x40] sm:$0xff] }
  0x3b   : > { %778 = vmatprep.subr.bf16.mxu1 %v1319_v39 }
  0x3c   : > { %738 = vmatpush1.bf16.msra.mxu0 %v1296_v36 }
  0x3d   : > { %739 = vmatprep.subr.bf16.mxu0 %v1304_v37 }
  0x3e   : > { %779 = vmatpush1.bf16.msra.mxu1 %v1317_v42 }
  0x3f   : > { %780 = vmatprep.subr.bf16.mxu1 %v1325_v43 }
  0x40   : > { %740 = vmatpush1.bf16.msra.mxu0 %v1302_v40  ;;  %v305_v40 = vld [vmem:[%s1784_s4 + $0x48] sm:$0xff] }
  0x41   : > { %813 = vmatprep.subr.bf16.mxu0 %v1310_v41 }
  0x42   : > { %781 = vmatpush1.bf16.msra.mxu1 %v1323_v46 }
  0x43   : > { %1215 = vmatmul.mubr.msk.bf16.vlgmr.msra.gmra.mxu0 %vm639_vm1, %v1479_v22  ;;  %854 = vmatprep.subr.bf16.mxu1 %v1331_v47 }
  0x44   : > { %814 = vmatpush1.bf16.msra.mxu0 %v1308_v44  ;;  %839 = vmatprep.mubr.bf16.mxu0 %v1365_v3 }
  0x45   : > { %815 = vmatprep.subr.bf16.mxu0 %v1316_v45  ;;  %1216 = vmatmul.mubr.msk.bf16.vlgmr.msra.gmra.mxu1 %vm639_vm1, %v1479_v22  ;;  %v306_v45 = vld [vmem:[%s1784_s4 + $0x50] sm:$0xff] }
  0x46   : > { %855 = vmatpush1.bf16.msra.mxu1 %v1329_v50  ;;  %880 = vmatprep.mubr.bf16.mxu1 %v1365_v3  ;;  %v1346_v3 = vld [vmem:[%s1415_s26 + $0x100] ss:$52 sps:$4 sm:$0xff]  }
  0x47   : > { %856 = vmatprep.subr.bf16.mxu1 %v1337_v51 }
  0x48   : > { %816 = vmatpush1.bf16.msra.mxu0 %v1314_v48  ;;  %v307_v48 = vld [vmem:[%s1784_s4 + $0x58] sm:$0xff] }
  0x49   : > { %817 = vmatprep.subr.bf16.mxu0 %v1322_v49 }
  0x4a   : > { %857 = vmatpush1.bf16.msra.mxu1 %v1335_v54  ;;  %v308_v54 = vld [vmem:[%s1784_s4 + $0x60] sm:$0xff] }
  0x4b   : > { %858 = vmatprep.subr.bf16.mxu1 %v1341_v55 }
  0x4c   : > { %818 = vmatpush1.bf16.msra.mxu0 %v1320_v52 }
  0x4d   : > { %819 = vmatprep.subr.bf16.mxu0 %v1328_v53 }
  0x4e   : > { %859 = vmatpush1.bf16.msra.mxu1 %v1339_v58 }
  0x4f   : > { %860 = vmatprep.subr.bf16.mxu1 %v1345_v59 }
  0x50   : > { %820 = vmatpush1.bf16.msra.mxu0 %v1326_v56 }
  0x51   : > { %821 = vmatprep.subr.bf16.mxu0 %v1334_v57 }
  0x52   : > { %861 = vmatpush1.bf16.msra.mxu1 %v1343_v61 }
  0x53   : > { %862 = vmatprep.subr.bf16.mxu1 %v1349_v62 }
  0x54   : > { %822 = vmatpush1.bf16.msra.mxu0 %v1332_v60 }
  0x55   : > { %1229 = vmatprep.subr.bf16.mxu0 %v1366_v0 }
  0x56   : > { %863 = vmatpush1.bf16.msra.mxu1 %v1347_v1 }
  0x57   : > { %1217 = vmatmul.mubr.msk.bf16.vlgmr.msra.gmra.mxu0 %vm639_vm1, %v1479_v22 }
  0x58   : > { %1230 = vmatpush3.bf16.msra.mxu0 %v1338_v63  ;;  %1239 = vmatprep.mubr.msk.bf16.mxu0 %vm1367_vm2, %v1366_v0 }
  0x59   : > { %1231 = vmatprep.subr.bf16.mxu0 %v1366_v0  ;;  %1218 = vmatmul.mubr.msk.bf16.vlgmr.msra.gmra.mxu1 %vm639_vm1, %v1479_v22 }
  0x5c   : > { %1232 = vmatpush3.bf16.msra.mxu0 %v1342_v2 }
  0x5d   : > { %1233 = vmatprep.subr.bf16.mxu0 %v1366_v0 }
  0x60   : > { %1234 = vmatpush3.bf16.msra.mxu0 %v1346_v3 }
  0x61   : > { %1235 = vmatprep.subr.bf16.mxu0 %v1366_v0 }
  0x64   : > { %1236 = vmatpush3.bf16.msra.mxu0 %v1350_v4 }
  0x65   : > { %1237 = vmatprep.subr.bf16.mxu0 %v1366_v0 }
  0x68   : > { %1238 = vmatpush3.bf16.msra.mxu0 %v1351_v5 }
  0x6b   : > { %1240 = vmatmul.mubr.msk.bf16.vlgmr.msra.gmra.mxu0 %vm639_vm1, %v1479_v22  ;;  %v300_v22 = vld [vmem:[%s1784_s4 + $0x20] sm:$0xff] }
  0xef   : > { %v677_v7 = vpop.f32.mrf.mxu0 }
  0xf0   : > { %v929_v9 = vadd.f32 %v677_v7, %v296_v6 }
  0xf1   : > { %v679_v10 = vpop.f32.mrf.mxu0  ;;  %v718_v15 = vpop.f32.mrf.mxu1 }
  0xf2   : > { %942 = vst [vmem:[%s1784_s4] sm:$0xff] %v929_v9  ;;  %v930_v11 = vadd.f32 %v679_v10, %v297_v8  ;;  %v931_v17 = vadd.f32 %v718_v15, %v298_v13 }
  0xf3   : > { %v681_v12 = vpop.f32.mrf.mxu0  ;;  %v720_v18 = vpop.f32.mrf.mxu1 }
  0xf4   : > { %943 = vst [vmem:[%s1784_s4 + $0x8] sm:$0xff] %v930_v11  ;;  %944 = vst [vmem:[%s1784_s4 + $0x10] sm:$0xff] %v931_v17  ;;  %v932_v19 = vadd.f32 %v720_v18, %v299_v16 }
  0xf5   : > { %v682_v14 = vpop.f32.mrf.mxu0  ;;  %v722_v20 = vpop.f32.mrf.mxu1 }
  0xf6   : > { %945 = vst [vmem:[%s1784_s4 + $0x18] sm:$0xff] %v932_v19 }
  0xf7   : > { %v723_v21 = vpop.f32.mrf.mxu1 }
 0x103   : > { %v759_v23 = vpop.f32.mrf.mxu0 }
 0x104   : > { %v933_v25 = vadd.f32 %v759_v23, %v300_v22 }
 0x105   : > { %v761_v26 = vpop.f32.mrf.mxu0  ;;  %v800_v31 = vpop.f32.mrf.mxu1 }
 0x106   : > { %946 = vst [vmem:[%s1784_s4 + $0x20] sm:$0xff] %v933_v25  ;;  %v934_v27 = vadd.f32 %v761_v26, %v301_v24  ;;  %v935_v33 = vadd.f32 %v800_v31, %v302_v29 }
 0x107   : > { %v763_v28 = vpop.f32.mrf.mxu0  ;;  %v802_v34 = vpop.f32.mrf.mxu1 }
 0x108   : > { %947 = vst [vmem:[%s1784_s4 + $0x28] sm:$0xff] %v934_v27  ;;  %948 = vst [vmem:[%s1784_s4 + $0x30] sm:$0xff] %v935_v33  ;;  %v936_v35 = vadd.f32 %v802_v34, %v303_v32 }
 0x109   : > { %v764_v30 = vpop.f32.mrf.mxu0  ;;  %v804_v36 = vpop.f32.mrf.mxu1 }
 0x10a   : > { %949 = vst [vmem:[%s1784_s4 + $0x38] sm:$0xff] %v936_v35 }
 0x10b   : > { %v805_v37 = vpop.f32.mrf.mxu1 }
 0x117   : > { %v841_v39 = vpop.f32.mrf.mxu0 }
 0x118   : > { %v937_v41 = vadd.f32 %v841_v39, %v304_v38 }
 0x119   : > { %v843_v42 = vpop.f32.mrf.mxu0  ;;  %v882_v47 = vpop.f32.mrf.mxu1 }
 0x11a   : > { %950 = vst [vmem:[%s1784_s4 + $0x40] sm:$0xff] %v937_v41  ;;  %v938_v43 = vadd.f32 %v843_v42, %v305_v40  ;;  %v939_v49 = vadd.f32 %v882_v47, %v306_v45 }
 0x11b   : > { %v845_v44 = vpop.f32.mrf.mxu0  ;;  %v884_v50 = vpop.f32.mrf.mxu1 }
 0x11c   : > { %951 = vst [vmem:[%s1784_s4 + $0x48] sm:$0xff] %v938_v43  ;;  %952 = vst [vmem:[%s1784_s4 + $0x50] sm:$0xff] %v939_v49  ;;  %v940_v51 = vadd.f32 %v884_v50, %v307_v48 }
 0x11d   : > { %v846_v46 = vpop.f32.mrf.mxu0  ;;  %v886_v52 = vpop.f32.mrf.mxu1 }
 0x11e   : > { %953 = vst [vmem:[%s1784_s4 + $0x58] sm:$0xff] %v940_v51 }
 0x11f   : > { %v887_v53 = vpop.f32.mrf.mxu1 }
 0x12b   : > { %v923_v55 = vpop.f32.mrf.mxu0 }
 0x12c   : > { %v941_v56 = vadd.f32 %v923_v55, %v308_v54 }
 0x12d   : > { %v1241_v57 = vpop.f32.mrf.mxu0  ;;  %959 = sbr.rel (%p1220_p6) target bundleno = 797 (0x31d), region = 44 }
 0x12e   : > { %955 = vst.msk [vmem:[%s1784_s4 + $0x60] sm:$0xff] %vm954_vm3, %v941_v56 }
 0x12f   : > { %v926_v58 = vpop.f32.mrf.mxu0 }
 0x131   : > { %v1242_v59 = vpop.f32.mrf.mxu0 }
 0x132   : > { %v1628_v60 = vld [vmem:[%s1784_s4] sm:$0xff]  ;;  %v1633_v61 = vld [vmem:[%s1784_s4 + $0x8] sm:$0xff]  ;;  %v1638_v62 = vld [vmem:[%s1784_s4 + $0x10] sm:$0xff] }
 0x133   : > { %v973_v63 = vadd.f32 %v1633_v61, %v1628_v60  ;;  %v1645_v0 = vld [vmem:[%s1784_s4 + $0x18] sm:$0xff]  ;;  %v1651_v2 = vld [vmem:[%s1784_s4 + $0x20] sm:$0xff]  ;;  %v1657_v4 = vld [vmem:[%s1784_s4 + $0x28] sm:$0xff] }
 0x134   : > { %v1663_v6 = vld [vmem:[%s1784_s4 + $0x30] sm:$0xff]  ;;  %v1669_v8 = vld [vmem:[%s1784_s4 + $0x38] sm:$0xff]  ;;  %v1675_v10 = vld [vmem:[%s1784_s4 + $0x40] sm:$0xff] }
 0x135   : > { %v974_v1 = vadd.f32 %v973_v63, %v1638_v62  ;;  %v1681_v12 = vld [vmem:[%s1784_s4 + $0x48] sm:$0xff]  ;;  %v1687_v14 = vld [vmem:[%s1784_s4 + $0x50] sm:$0xff]  ;;  %v1692_v15 = vld [vmem:[%s1784_s4 + $0x60] sm:$0xff] }
 0x136   : > { %v1698_v17 = vld [vmem:[%s1784_s4 + $0x58] sm:$0xff]  ;;  %v984_v19 = vsel %vm954_vm3, %v1692_v15, 0.0 }
 0x137   : > { %v975_v3 = vadd.f32 %v974_v1, %v1645_v0 }
 0x139   : > { %v976_v5 = vadd.f32 %v975_v3, %v1651_v2 }
 0x13b   : > { %v977_v7 = vadd.f32 %v976_v5, %v1657_v4  ;;  %v1368_v5 = vmov 0  }
 0x13c   : > { %1352 = vset.pattern.permute.xlu1 %v1368_v5  ;;  %1353 = vset.pattern.permute.xlu0 %v1368_v5 }
 0x13d   : > { %v978_v9 = vadd.f32 %v977_v7, %v1663_v6 }
 0x13f   : > { %v979_v11 = vadd.f32 %v978_v9, %v1669_v8 }
 0x141   : > { %v980_v13 = vadd.f32 %v979_v11, %v1675_v10 }
 0x143   : > { %v981_v16 = vadd.f32 %v980_v13, %v1681_v12  ;;  %v1032_v13 = vld [vmem:[%s1782_s2] sm:$0xff] }
 0x145   : > { %v982_v18 = vadd.f32 %v981_v16, %v1687_v14 }
 0x147   : > { %v983_v20 = vadd.f32 %v982_v18, %v1698_v17 }
 0x149   : > { %v985_v21 = vadd.f32 %v984_v19, %v983_v20  ;;  %v1036_v19 = vld [vmem:[%s1783_s3] sm:$0xff] }
 0x14b   : > { %986 = vadd.xlane.f32.xlu0 %v985_v21 }
 0x1d4   : > { %v987_v22 = vpop.xlane.xlu0 %986 }
 0x1d5   : > { %v989_v23 = vmul.f32 0.0006377551, %v987_v22 }
 0x1d7   : > { %v990_v24 = vsub.f32 %v1628_v60, %v989_v23  ;;  %v991_v25 = vsub.f32 %v1633_v61, %v989_v23  ;;  %v992_v26 = vsub.f32 %v1638_v62, %v989_v23  ;;  %v993_v29 = vsub.f32 %v1645_v0, %v989_v23 }
 0x1d8   : > { %v994_v30 = vsub.f32 %v1651_v2, %v989_v23  ;;  %v995_v33 = vsub.f32 %v1657_v4, %v989_v23  ;;  %v996_v36 = vsub.f32 %v1663_v6, %v989_v23  ;;  %v997_v39 = vsub.f32 %v1669_v8, %v989_v23 }
 0x1d9   : > { %v1003_v27 = vmul.f32 %v990_v24, %v990_v24  ;;  %v1004_v28 = vmul.f32 %v991_v25, %v991_v25  ;;  %v1005_v31 = vmul.f32 %v992_v26, %v992_v26  ;;  %v1006_v34 = vmul.f32 %v993_v29, %v993_v29 }
 0x1da   : > { %v1007_v37 = vmul.f32 %v994_v30, %v994_v30  ;;  %v1008_v40 = vmul.f32 %v995_v33, %v995_v33  ;;  %v998_v42 = vsub.f32 %v1675_v10, %v989_v23  ;;  %v1009_v43 = vmul.f32 %v996_v36, %v996_v36 }
 0x1db   : > { %v1016_v32 = vadd.f32 %v1004_v28, %v1003_v27  ;;  %v999_v45 = vsub.f32 %v1681_v12, %v989_v23  ;;  %v1010_v46 = vmul.f32 %v997_v39, %v997_v39  ;;  %v1000_v48 = vsub.f32 %v1687_v14, %v989_v23 }
 0x1dc   : > { %v1011_v49 = vmul.f32 %v998_v42, %v998_v42  ;;  %v1002_v51 = vsub.f32 %v1692_v15, %v989_v23  ;;  %v1001_v52 = vsub.f32 %v1698_v17, %v989_v23 }
 0x1dd   : > { %v1017_v35 = vadd.f32 %v1016_v32, %v1005_v31  ;;  %v1012_v53 = vmul.f32 %v999_v45, %v999_v45  ;;  %v1013_v55 = vmul.f32 %v1000_v48, %v1000_v48 }
 0x1de   : > { %v1015_v57 = vmul.f32 %v1002_v51, %v1002_v51  ;;  %v1014_v58 = vmul.f32 %v1001_v52, %v1001_v52 }
 0x1df   : > { %v1018_v38 = vadd.f32 %v1017_v35, %v1006_v34 }
 0x1e0   : > { %v1027_v1 = vsel %vm954_vm3, %v1015_v57, 0.0 }
 0x1e1   : > { %v1019_v41 = vadd.f32 %v1018_v38, %v1007_v37 }
 0x1e3   : > { %v1020_v44 = vadd.f32 %v1019_v41, %v1008_v40 }
 0x1e5   : > { %v1021_v47 = vadd.f32 %v1020_v44, %v1009_v43 }
 0x1e7   : > { %v1022_v50 = vadd.f32 %v1021_v47, %v1010_v46 }
 0x1e9   : > { %v1023_v54 = vadd.f32 %v1022_v50, %v1011_v49 }
 0x1eb   : > { %v1024_v56 = vadd.f32 %v1023_v54, %v1012_v53 }
 0x1ed   : > { %v1025_v59 = vadd.f32 %v1024_v56, %v1013_v55 }
 0x1ef   : > { %v1026_v63 = vadd.f32 %v1025_v59, %v1014_v58 }
 0x1f1   : > { %v1028_v3 = vadd.f32 %v1027_v1, %v1026_v63 }
 0x1f3   : > { %1029 = vadd.xlane.f32.xlu0 %v1028_v3 }
 0x27c   : > { %v1030_v7 = vpop.xlane.xlu0 %1029 }
 0x27d   : > { %v1031_v9 = vmul.f32 0.0006377551, %v1030_v7 }
 0x27f   : > { %v1033_v11 = vadd.f32 1e-05, %v1031_v9 }
 0x281   : > { %1354 = vrsqrt.f32 %v1033_v11 }
 0x28e   : > { %v1355_v16 = vpop.eup %1354 }
 0x28f   : > { %v1035_v18 = vmul.f32 %v1355_v16, %v1032_v13 }
 0x291   : > { %1041 = vperm.xlu1 %1352, %v1035_v18   ;;  %v1037_v20 = vmul.f32 %v1035_v18, %v989_v23 }
 0x293   : > { %v1038_v21 = vsub.f32 %v1036_v19, %v1037_v20 }
 0x295   : > { %1059 = vperm.xlu1 %1352, %v1038_v21  }
 0x30c   : > { %v1042_v22 = vpop.permute.xlu1 %1041 }
 0x30d   : > { %v1044_v24 = vmul.f32 %v1042_v22, %v1628_v60  ;;  %v1045_v25 = vmul.f32 %v1042_v22, %v1633_v61  ;;  %v1046_v26 = vmul.f32 %v1042_v22, %v1638_v62  ;;  %v1047_v27 = vmul.f32 %v1042_v22, %v1645_v0 }
 0x30e   : > { %v1048_v28 = vmul.f32 %v1042_v22, %v1651_v2  ;;  %v1049_v29 = vmul.f32 %v1042_v22, %v1657_v4  ;;  %v1050_v30 = vmul.f32 %v1042_v22, %v1663_v6  ;;  %v1051_v31 = vmul.f32 %v1042_v22, %v1669_v8 }
 0x30f   : > { %v1052_v23 = vmul.f32 %v1042_v22, %v1675_v10  ;;  %v1053_v32 = vmul.f32 %v1042_v22, %v1681_v12  ;;  %v1054_v60 = vmul.f32 %v1042_v22, %v1687_v14  ;;  %v1055_v61 = vmul.f32 %v1042_v22, %v1698_v17 }
 0x310   : > { %v1056_v62 = vmul.f32 %v1042_v22, %v1692_v15  ;;  %v1060_v33 = vpop.permute.xlu1 %1059 }
 0x311   : > { %v1062_v0 = vadd.f32 %v1060_v33, %v1044_v24  ;;  %v1063_v34 = vadd.f32 %v1060_v33, %v1045_v25  ;;  %v1064_v2 = vadd.f32 %v1060_v33, %v1046_v26  ;;  %v1065_v35 = vadd.f32 %v1060_v33, %v1047_v27 }
 0x312   : > { %v1066_v4 = vadd.f32 %v1060_v33, %v1048_v28  ;;  %v1067_v36 = vadd.f32 %v1060_v33, %v1049_v29  ;;  %v1068_v6 = vadd.f32 %v1060_v33, %v1050_v30  ;;  %v1069_v37 = vadd.f32 %v1060_v33, %v1051_v31 }
 0x313   : > { %v1070_v8 = vadd.f32 %v1060_v33, %v1052_v23  ;;  %v1071_v38 = vadd.f32 %v1060_v33, %v1053_v32  ;;  %v1072_v10 = vadd.f32 %v1060_v33, %v1054_v60  ;;  %v1073_v39 = vadd.f32 %v1060_v33, %v1055_v61 }
 0x314   : > { %v1074_v12 = vadd.f32 %v1060_v33, %v1056_v62  ;;  %v1075_v40 = vmax.f32 %v1062_v0, 0.0  ;;  %v1076_v14 = vmax.f32 %v1063_v34, 0.0  ;;  %v1077_v41 = vmax.f32 %v1064_v2, 0.0 }
 0x315   : > { %v1078_v17 = vmax.f32 %v1065_v35, 0.0  ;;  %v1079_v42 = vmax.f32 %v1066_v4, 0.0  ;;  %v1080_v15 = vmax.f32 %v1067_v36, 0.0  ;;  %v1081_v43 = vmax.f32 %v1068_v6, 0.0 }
 0x316   : > { %v1082_v44 = vmax.f32 %v1069_v37, 0.0  ;;  %v1083_v45 = vmax.f32 %v1070_v8, 0.0  ;;  %v1084_v46 = vmax.f32 %v1071_v38, 0.0  ;;  %v1085_v47 = vmax.f32 %v1072_v10, 0.0  ;;  %1088 = vst [vmem:[%s1784_s4] sm:$0xff] %v1075_v40  ;;  %1089 = vst [vmem:[%s1784_s4 + $0x8] sm:$0xff] %v1076_v14 }
 0x317   : > { %1090 = vst [vmem:[%s1784_s4 + $0x10] sm:$0xff] %v1077_v41  ;;  %v1086_v48 = vmax.f32 %v1073_v39, 0.0  ;;  %v1087_v49 = vmax.f32 %v1074_v12, 0.0  ;;  %1091 = vst [vmem:[%s1784_s4 + $0x18] sm:$0xff] %v1078_v17 }
 0x318   : > { %1092 = vst [vmem:[%s1784_s4 + $0x20] sm:$0xff] %v1079_v42  ;;  %1093 = vst [vmem:[%s1784_s4 + $0x28] sm:$0xff] %v1080_v15 }
 0x319   : > { %1094 = vst [vmem:[%s1784_s4 + $0x30] sm:$0xff] %v1081_v43  ;;  %1095 = vst [vmem:[%s1784_s4 + $0x38] sm:$0xff] %v1082_v44 }
 0x31a   : > { %1096 = vst [vmem:[%s1784_s4 + $0x40] sm:$0xff] %v1083_v45  ;;  %1097 = vst [vmem:[%s1784_s4 + $0x48] sm:$0xff] %v1084_v46 }
 0x31b   : > { %1098 = vst [vmem:[%s1784_s4 + $0x50] sm:$0xff] %v1085_v47  ;;  %1099 = vst [vmem:[%s1784_s4 + $0x58] sm:$0xff] %v1086_v48 }
 0x31c   : > { %1100 = vst.msk [vmem:[%s1784_s4 + $0x60] sm:$0xff] %vm954_vm3, %v1087_v49 }
 0x31d PF: > { %s14_s15 = sadd.s32 1, %s1362_s15  }
 0x31e   : > { %p11_p7 = scmp.ge.s32.totalorder %s14_s15, 4  }
 0x320   :  { %13 = sbr.rel (!%p11_p7) target bundleno = 1 (0x1), region = 73 }

// kernel: densenet_forward.13
= control target key start
LH: loop header
LB: loop body
LE: loop exit
PB: predicated region body
PF: predicated region fallthrough
CT: control target
= control target key end

     0   :  { %vm305_vm0 = vcmask 1040384   ;;  %s890_s17 = smov 1   ;;  %vm850_vm1 = vcmask 113665   ;;  %vm852_vm2 = vcmask 112640   ;;  %s2089_s1 = inlined_call_operand.vmem [shape: f32[8,2,15,15], index: 1, kind: input, shape index: {}]   ;;  %s2090_s3 = inlined_call_operand.vmem [shape: f32[8,2,15,15], index: 3, kind: input, shape index: {}]   ;;  %s2091_s0 = inlined_call_operand.vmem [shape: f32[8,2,15,15], index: 0, kind: input, shape index: {}]   ;;  %s2092_s2 = inlined_call_operand.vmem [shape: f32[8,2,15,15], index: 2, kind: input, shape index: {}]   ;;  %s2093_s4 = inlined_call_operand.vmem [shape: f32[8,2,14,14], index: 4, kind: output, shape index: {}]  }
   0x1   :  { %v920_v0 = vld [vmem:[%s2089_s1] sm:$0xff]  ;;  %v938_v5 = vld [vmem:[%s2089_s1 + $0x10] sm:$0xff]  ;;  %v958_v11 = vld [vmem:[%s2089_s1 + $0x8] sm:$0x7f] }
   0x2   :  { %v925_v1 = vld [vmem:[%s2090_s3] sm:$0xff]  ;;  %v943_v6 = vld [vmem:[%s2090_s3 + $0x10] sm:$0xff]  ;;  %v963_v12 = vld [vmem:[%s2090_s3 + $0x8] sm:$0x7f] }
   0x3   :  { %v930_v2 = vld [vmem:[%s2091_s0] sm:$0xff]  ;;  %v241_v3 = vmax.f32 %v920_v0, %v925_v1  ;;  %v450_v4 = vrot.slane %v925_v1, 7  ;;  %v948_v7 = vld [vmem:[%s2091_s0 + $0x10] sm:$0xff]  ;;  %v243_v9 = vmax.f32 %v938_v5, %v943_v6  ;;  %v453_v10 = vrot.slane %v943_v6, 7  ;;  %v976_v17 = vld [vmem:[%s2089_s1 + $0x18] sm:$0x7f] }
   0x4   :  { %v968_v13 = vld [vmem:[%s2090_s3 + $0x20] sm:$0xff]  ;;  %v242_v15 = vmax.f32 %v958_v11, %v963_v12  ;;  %v451_v16 = vrot.slane %v963_v12, 7  ;;  %v981_v18 = vld [vmem:[%s2090_s3 + $0x18] sm:$0x7f]  ;;  %v992_v24 = vld [vmem:[%s2089_s1 + $0x28] sm:$0x7f] }
   0x5   :  { %v530_v14 = vmax.f32 %v241_v3, %v450_v4  ;;  %v456_v19 = vrot.slane %v968_v13, 7  ;;  %v532_v20 = vmax.f32 %v243_v9, %v453_v10  ;;  %v244_v22 = vmax.f32 %v976_v17, %v981_v18  ;;  %v997_v25 = vld [vmem:[%s2090_s3 + $0x28] sm:$0x7f]  ;;  %v1002_v26 = vld [vmem:[%s2089_s1 + $0x20] sm:$0xff]  ;;  %v1014_v31 = vld [vmem:[%s2089_s1 + $0x38] sm:$0x7f] }
   0x6   :  { %v454_v23 = vrot.slane %v981_v18, 7  ;;  %v452_v27 = vsel %vm305_vm0, %v450_v4, %v451_v16  ;;  %v246_v28 = vmax.f32 %v992_v24, %v997_v25  ;;  %v457_v29 = vrot.slane %v997_v25, 7  ;;  %v1019_v32 = vld [vmem:[%s2090_s3 + $0x30] sm:$0xff]  ;;  %v1024_v33 = vld [vmem:[%s2090_s3 + $0x38] sm:$0x7f]  ;;  %v1044_v40 = vld [vmem:[%s2090_s3 + $0x40] sm:$0xff] }
   0x7   :  { %594 = vrot.lane.b32.xlu0 %v530_v14, %s890_s17  ;;  %v245_v30 = vmax.f32 %v1002_v26, %v968_v13  ;;  %598 = vrot.lane.b32.xlu1 %v532_v20, %s890_s17  ;;  %v531_v34 = vmax.f32 %v242_v15, %v452_v27  ;;  %v248_v36 = vmax.f32 %v1014_v31, %v1024_v33  ;;  %v459_v37 = vrot.slane %v1019_v32, 7  ;;  %v1034_v38 = vld [vmem:[%s2089_s1 + $0x30] sm:$0xff]  ;;  %v1039_v39 = vld [vmem:[%s2089_s1 + $0x48] sm:$0x7f] }
   0x8   :  { %v455_v35 = vsel %vm305_vm0, %v453_v10, %v454_v23  ;;  %v458_v42 = vsel %vm305_vm0, %v456_v19, %v457_v29  ;;  %v460_v44 = vrot.slane %v1024_v33, 7  ;;  %v1051_v45 = vld [vmem:[%s2090_s3 + $0x48] sm:$0x7f]  ;;  %v1056_v46 = vld [vmem:[%s2089_s1 + $0x40] sm:$0xff]  ;;  %v1061_v47 = vld [vmem:[%s2089_s1 + $0x58] sm:$0x7f]  ;;  %v247_v49 = vmax.f32 %v1034_v38, %v1019_v32 }
   0x9   :  { %v533_v41 = vmax.f32 %v244_v22, %v455_v35  ;;  %v534_v43 = vmax.f32 %v245_v30, %v456_v19  ;;  %v535_v48 = vmax.f32 %v246_v28, %v458_v42  ;;  %v250_v50 = vmax.f32 %v1039_v39, %v1051_v45  ;;  %v1071_v52 = vld [vmem:[%s2090_s3 + $0x50] sm:$0xff]  ;;  %v1076_v53 = vld [vmem:[%s2090_s3 + $0x58] sm:$0x7f]  ;;  %v1093_v59 = vld [vmem:[%s2089_s1 + $0x68] sm:$0x7f] }
   0xa   :  { %v462_v51 = vrot.slane %v1044_v40, 7  ;;  %v1081_v54 = vld [vmem:[%s2089_s1 + $0x50] sm:$0xff]  ;;  %v461_v55 = vsel %vm305_vm0, %v459_v37, %v460_v44  ;;  %v463_v56 = vrot.slane %v1051_v45, 7  ;;  %v249_v57 = vmax.f32 %v1056_v46, %v1044_v40  ;;  %v1098_v60 = vld [vmem:[%s2090_s3 + $0x60] sm:$0xff]  ;;  %v1103_v61 = vld [vmem:[%s2090_s3 + $0x68] sm:$0x7f] }
   0xb   :  { %596 = vrot.lane.b32.xlu0 %v531_v34, %s890_s17  ;;  %v252_v58 = vmax.f32 %v1061_v47, %v1076_v53  ;;  %600 = vrot.lane.b32.xlu1 %v533_v41, %s890_s17  ;;  %v537_v62 = vmax.f32 %v248_v36, %v461_v55  ;;  %v536_v63 = vmax.f32 %v247_v49, %v459_v37  ;;  %v465_v3 = vrot.slane %v1071_v52, 7  ;;  %v1111_v9 = vld [vmem:[%s2089_s1 + $0x60] sm:$0xff]  ;;  %v1116_v10 = vld [vmem:[%s2089_s1 + $0x78] sm:$0x7f] }
   0xc   :  { %v466_v4 = vrot.slane %v1076_v53, 7  ;;  %2133 = vst [vmem:[#allocation2_spill] sm:$0xff] %v1116_v10  ;;  %v1121_v14 = vld [vmem:[%s2090_s3 + $0x70] sm:$0xff]  ;;  %v464_v15 = vsel %vm305_vm0, %v462_v51, %v463_v56  ;;  %v1124_v16 = vmax.f32 %v249_v57, %v462_v51  ;;  %v251_v19 = vmax.f32 %v1081_v54, %v1071_v52  ;;  %v1133_v22 = vld [vmem:[%s2090_s3 + $0x78] sm:$0x7f]  ;;  %v1153_v35 = vld [vmem:[%s2090_s3 + $0x80] sm:$0xff] }
   0xd   :  { %2134 = vst [vmem:[#allocation3_spill] sm:$0xff] %v1121_v14  ;;  %v254_v20 = vmax.f32 %v1093_v59, %v1103_v61  ;;  %2135 = vst [vmem:[#allocation4_spill] sm:$0xff] %v1133_v22  ;;  %v1138_v23 = vld [vmem:[%s2089_s1 + $0x70] sm:$0xff]  ;;  %v1143_v27 = vld [vmem:[%s2089_s1 + $0x88] sm:$0x7f]  ;;  %v1145_v28 = vmax.f32 %v250_v50, %v464_v15  ;;  %v468_v30 = vrot.slane %v1098_v60, 7  ;;  %v253_v42 = vmax.f32 %v1111_v9, %v1098_v60 }
   0xe   :  { %2136 = vst [vmem:[#allocation5_spill] sm:$0xff] %v1138_v23  ;;  %2137 = vst [vmem:[#allocation6_spill] sm:$0xff] %v1143_v27  ;;  %v467_v29 = vsel %vm305_vm0, %v465_v3, %v466_v4  ;;  %v469_v34 = vrot.slane %v1103_v61, 7  ;;  %v1158_v36 = vld [vmem:[%s2090_s3 + $0x88] sm:$0x7f]  ;;  %v1163_v41 = vmax.f32 %v251_v19, %v465_v3  ;;  %v256_v44 = vmax.f32 %v1116_v10, %v1133_v22  ;;  %v1172_v49 = vld [vmem:[%s2089_s1 + $0x80] sm:$0xff] }
   0xf   :  { %2138 = vst [vmem:[#allocation7_spill] sm:$0xff] %v1153_v35  ;;  %2139 = vst [vmem:[#allocation8_spill] sm:$0xff] %v1158_v36  ;;  %602 = vrot.lane.b32.xlu0 %v534_v43, %s890_s17  ;;  %v1161_v37 = vmax.f32 %v252_v58, %v467_v29  ;;  %v1177_v50 = vld [vmem:[%s2089_s1 + $0x98] sm:$0x7f]  ;;  %604 = vrot.lane.b32.xlu1 %v535_v48, %s890_s17  ;;  %v471_v51 = vrot.slane %v1121_v14, 7  ;;  %v472_v55 = vrot.slane %v1133_v22, 7 }
  0x10   :  { %2140 = vst [vmem:[#allocation9_spill] sm:$0xff] %v1172_v49  ;;  %2141 = vst [vmem:[#allocation10_spill] sm:$0xff] %v1177_v50  ;;  %v470_v43 = vsel %vm305_vm0, %v468_v30, %v469_v34  ;;  %v255_v56 = vmax.f32 %v1138_v23, %v1121_v14  ;;  %v1188_v57 = vld [vmem:[%s2090_s3 + $0x90] sm:$0xff]  ;;  %v1193_v58 = vld [vmem:[%s2090_s3 + $0x98] sm:$0x7f]  ;;  %v1197_v3 = vmax.f32 %v253_v42, %v468_v30  ;;  %v474_v15 = vrot.slane %v1153_v35, 7 }
  0x11   :  { %2142 = vst [vmem:[#allocation11_spill] sm:$0xff] %v1188_v57  ;;  %2143 = vst [vmem:[#allocation12_spill] sm:$0xff] %v1193_v58  ;;  %v1195_v48 = vmax.f32 %v254_v20, %v470_v43  ;;  %v258_v4 = vmax.f32 %v1143_v27, %v1158_v36  ;;  %v1205_v19 = vld [vmem:[%s2089_s1 + $0x90] sm:$0xff]  ;;  %v1210_v29 = vld [vmem:[%s2089_s1 + $0xa8] sm:$0x7f]  ;;  %v473_v30 = vsel %vm305_vm0, %v471_v51, %v472_v55  ;;  %v475_v42 = vrot.slane %v1158_v36, 7 }
  0x12   :  { %2144 = vst [vmem:[#allocation13_spill] sm:$0xff] %v1205_v19  ;;  %2145 = vst [vmem:[#allocation14_spill] sm:$0xff] %v1210_v29  ;;  %v1215_v20 = vld [vmem:[%s2090_s3 + $0xa8] sm:$0x7f]  ;;  %v1218_v34 = vmax.f32 %v255_v56, %v471_v51  ;;  %v257_v43 = vmax.f32 %v1172_v49, %v1153_v35  ;;  %v1226_v21 = vld [vmem:[%s2090_s3 + $0xa0] sm:$0xff]  ;;  %v1234_v55 = vmax.f32 %v256_v44, %v473_v30  ;;  %v477_v56 = vrot.slane %v1188_v57, 7 }
  0x13   :  { %2146 = vst [vmem:[#allocation15_spill] sm:$0xff] %v1215_v20  ;;  %2147 = vst [vmem:[#allocation16_spill] sm:$0xff] %v1226_v21  ;;  %v1231_v8 = vld [vmem:[%s2089_s1 + $0xa0] sm:$0xff]  ;;  %606 = vrot.lane.b32.xlu0 %v536_v63, %s890_s17  ;;  %v260_v51 = vmax.f32 %v1177_v50, %v1193_v58  ;;  %v478_v49 = vrot.slane %v1193_v58, 7  ;;  %v1243_v27 = vld [vmem:[%s2089_s1 + $0xb8] sm:$0x7f]  ;;  %608 = vrot.lane.b32.xlu1 %v537_v62, %s890_s17  ;;  %v476_v63 = vsel %vm305_vm0, %v474_v15, %v475_v42 }
  0x14   :  { %2148 = vst [vmem:[#allocation17_spill] sm:$0xff] %v1231_v8  ;;  %2149 = vst [vmem:[#allocation18_spill] sm:$0xff] %v1243_v27  ;;  %v1248_v36 = vld [vmem:[%s2090_s3 + $0xb8] sm:$0x7f]  ;;  %v1252_v44 = vmax.f32 %v257_v43, %v474_v15  ;;  %v259_v30 = vmax.f32 %v1205_v19, %v1188_v57  ;;  %v262_v50 = vmax.f32 %v1210_v29, %v1215_v20  ;;  %v1261_v58 = vld [vmem:[%s2090_s3 + $0xb0] sm:$0xff]  ;;  %v480_v43 = vrot.slane %v1226_v21, 7 }
  0x15   :  { %2150 = vst [vmem:[#allocation19_spill] sm:$0xff] %v1248_v36  ;;  %2151 = vst [vmem:[#allocation20_spill] sm:$0xff] %v1261_v58  ;;  %v1266_v35 = vld [vmem:[%s2089_s1 + $0xb0] sm:$0xff]  ;;  %v1271_v62 = vld [vmem:[%s2089_s1 + $0xc8] sm:$0x7f]  ;;  %v1273_v15 = vmax.f32 %v258_v4, %v476_v63  ;;  %v479_v42 = vsel %vm305_vm0, %v477_v56, %v478_v49  ;;  %v481_v29 = vrot.slane %v1215_v20, 7  ;;  %v261_v49 = vmax.f32 %v1231_v8, %v1226_v21 }
  0x16   :  { %2152 = vst [vmem:[#allocation21_spill] sm:$0xff] %v1266_v35  ;;  %2153 = vst [vmem:[#allocation22_spill] sm:$0xff] %v1271_v62  ;;  %v1281_v19 = vld [vmem:[%s2090_s3 + $0xc0] sm:$0xff]  ;;  %v1286_v57 = vld [vmem:[%s2090_s3 + $0xc8] sm:$0x7f]  ;;  %v1288_v23 = vmax.f32 %v260_v51, %v479_v42  ;;  %v1290_v4 = vmax.f32 %v259_v30, %v477_v56  ;;  %v264_v63 = vmax.f32 %v1243_v27, %v1248_v36  ;;  %v483_v56 = vrot.slane %v1261_v58, 7 }
  0x17   :  { %2154 = vst [vmem:[#allocation23_spill] sm:$0xff] %v1281_v19  ;;  %2155 = vst [vmem:[#allocation24_spill] sm:$0xff] %v1286_v57  ;;  %v1299_v20 = vld [vmem:[%s2089_s1 + $0xc0] sm:$0xff]  ;;  %v1304_v10 = vld [vmem:[%s2089_s1 + $0xd8] sm:$0x7f]  ;;  %610 = vrot.lane.b32.xlu0 %v1124_v16, %s890_s17  ;;  %v482_v51 = vsel %vm305_vm0, %v480_v43, %v481_v29  ;;  %v484_v30 = vrot.slane %v1248_v36, 7  ;;  %v263_v42 = vmax.f32 %v1266_v35, %v1261_v58  ;;  %612 = vrot.lane.b32.xlu1 %v1145_v28, %s890_s17 }
  0x18   :  { %2156 = vst [vmem:[#allocation25_spill] sm:$0xff] %v1299_v20  ;;  %2157 = vst [vmem:[#allocation26_spill] sm:$0xff] %v1304_v10  ;;  %v1316_v27 = vld [vmem:[%s2090_s3 + $0xd0] sm:$0xff]  ;;  %v1321_v8 = vld [vmem:[%s2090_s3 + $0xd8] sm:$0x7f]  ;;  %v1325_v16 = vmax.f32 %v262_v50, %v482_v51  ;;  %v1327_v29 = vmax.f32 %v261_v49, %v480_v43  ;;  %v266_v35 = vmax.f32 %v1271_v62, %v1286_v57  ;;  %v486_v36 = vrot.slane %v1281_v19, 7 }
  0x19   :  { %2158 = vst [vmem:[#allocation27_spill] sm:$0xff] %v1316_v27  ;;  %2159 = vst [vmem:[#allocation28_spill] sm:$0xff] %v1321_v8  ;;  %v1335_v58 = vld [vmem:[%s2089_s1 + $0xd0] sm:$0xff]  ;;  %v1340_v21 = vld [vmem:[%s2089_s1 + $0xe8] sm:$0x7f]  ;;  %v485_v50 = vsel %vm305_vm0, %v483_v56, %v484_v30  ;;  %v1348_v43 = vmax.f32 %v263_v42, %v483_v56  ;;  %v487_v49 = vrot.slane %v1286_v57, 7  ;;  %v265_v51 = vmax.f32 %v1299_v20, %v1281_v19 }
  0x1a   :  { %2160 = vst [vmem:[#allocation29_spill] sm:$0xff] %v1335_v58  ;;  %2161 = vst [vmem:[#allocation30_spill] sm:$0xff] %v1340_v21  ;;  %v1345_v28 = vld [vmem:[%s2090_s3 + $0xe8] sm:$0x7f]  ;;  %v1356_v62 = vld [vmem:[%s2090_s3 + $0xe0] sm:$0xff]  ;;  %v1363_v14 = vmax.f32 %v264_v63, %v485_v50  ;;  %v268_v56 = vmax.f32 %v1304_v10, %v1321_v8  ;;  %v489_v30 = vrot.slane %v1316_v27, 7  ;;  %v267_v10 = vmax.f32 %v1335_v58, %v1316_v27 }
  0x1b   :  { %2162 = vst [vmem:[#allocation31_spill] sm:$0xff] %v1345_v28  ;;  %2163 = vst [vmem:[#allocation32_spill] sm:$0xff] %v1356_v62  ;;  %v1361_v22 = vld [vmem:[%s2089_s1 + $0xe0] sm:$0xff]  ;;  %v490_v42 = vrot.slane %v1321_v8, 7  ;;  %v1372_v20 = vld [vmem:[%s2089_s1 + $0xf8] sm:$0x7f]  ;;  %614 = vrot.lane.b32.xlu0 %v1163_v41, %s890_s17  ;;  %v488_v63 = vsel %vm305_vm0, %v486_v36, %v487_v49  ;;  %v1382_v50 = vmax.f32 %v265_v51, %v486_v36  ;;  %616 = vrot.lane.b32.xlu1 %v1161_v37, %s890_s17 }
  0x1c   :  { %2164 = vst [vmem:[#allocation33_spill] sm:$0xff] %v1361_v22  ;;  %2165 = vst [vmem:[#allocation34_spill] sm:$0xff] %v1363_v14  ;;  %v1377_v57 = vld [vmem:[%s2090_s3 + $0xf8] sm:$0x7f]  ;;  %v270_v8 = vmax.f32 %v1340_v21, %v1345_v28  ;;  %v1391_v19 = vld [vmem:[%s2090_s3 + $0xf0] sm:$0xff]  ;;  %v1400_v36 = vmax.f32 %v266_v35, %v488_v63  ;;  %v492_v49 = vrot.slane %v1356_v62, 7  ;;  %v269_v35 = vmax.f32 %v1361_v22, %v1356_v62 }
  0x1d   :  { %2166 = vst [vmem:[#allocation35_spill] sm:$0xff] %v1372_v20  ;;  %2167 = vst [vmem:[#allocation36_spill] sm:$0xff] %v1377_v57  ;;  %v1396_v14 = vld [vmem:[%s2089_s1 + $0xf0] sm:$0xff]  ;;  %v491_v41 = vsel %vm305_vm0, %v489_v30, %v490_v42  ;;  %v493_v51 = vrot.slane %v1345_v28, 7  ;;  %v81_v21 = vld [vmem:[%s2092_s2] sm:$0xff]  ;;  %v272_v37 = vmax.f32 %v1372_v20, %v1377_v57 }
  0x1e   :  { %2168 = vst [vmem:[#allocation37_spill] sm:$0xff] %v1382_v50  ;;  %2169 = vst [vmem:[#allocation38_spill] sm:$0xff] %v1396_v14  ;;  %v83_v58 = vld [vmem:[%s2092_s2 + $0x10] sm:$0xff]  ;;  %v1411_v27 = vmax.f32 %v268_v56, %v491_v41  ;;  %v1413_v50 = vmax.f32 %v267_v10, %v489_v30  ;;  %v82_v42 = vld [vmem:[%s2092_s2 + $0x8] sm:$0x7f]  ;;  %v495_v56 = vrot.slane %v1391_v19, 7  ;;  %v271_v30 = vmax.f32 %v1396_v14, %v1391_v19 }
  0x1f   :  { %v18_v63 = vld [vmem:[%s2091_s0 + $0x8] sm:$0x7f]  ;;  %v494_v28 = vsel %vm305_vm0, %v492_v49, %v493_v51  ;;  %v496_v10 = vrot.slane %v1377_v57, 7  ;;  %618 = vrot.lane.b32.xlu0 %v1197_v3, %s890_s17  ;;  %v1434_v20 = vmax.f32 %v269_v35, %v492_v49  ;;  %v177_v22 = vmax.f32 %v81_v21, %v925_v1  ;;  %v84_v51 = vld [vmem:[%s2092_s2 + $0x18] sm:$0x7f]  ;;  %620 = vrot.lane.b32.xlu1 %v1195_v48, %s890_s17 }
  0x20   :  { %v1432_v41 = vmax.f32 %v270_v8, %v494_v28  ;;  %v179_v62 = vmax.f32 %v83_v58, %v943_v6  ;;  %v1444_v57 = vmax.f32 %v271_v30, %v495_v56  ;;  %v178_v8 = vmax.f32 %v82_v42, %v963_v12  ;;  %v20_v1 = vld [vmem:[%s2091_s0 + $0x18] sm:$0x7f]  ;;  %v85_v6 = vld [vmem:[%s2092_s2 + $0x20] sm:$0xff]  ;;  %v86_v21 = vld [vmem:[%s2092_s2 + $0x28] sm:$0x7f] }
  0x21   :  { %v497_v14 = vsel %vm305_vm0, %v495_v56, %v496_v10  ;;  %v146_v3 = vmax.f32 %v18_v63, %v958_v11  ;;  %v306_v48 = vrot.slane %v177_v22, 7  ;;  %v2170_v12 = vmax.f32 %v930_v2, %v920_v0  ;;  %v22_v49 = vld [vmem:[%s2091_s0 + $0x28] sm:$0x7f] }
  0x22   :  { %v1457_v58 = vmax.f32 %v272_v37, %v497_v14  ;;  %v309_v11 = vrot.slane %v179_v62, 7  ;;  %v2171_v35 = vmax.f32 %v948_v7, %v938_v5  ;;  %v307_v63 = vrot.slane %v178_v8, 7  ;;  %v21_v5 = vld [vmem:[%s2091_s0 + $0x20] sm:$0xff]  ;;  %v87_v7 = vld [vmem:[%s2092_s2 + $0x30] sm:$0xff] }
  0x23   :  { %v209_v28 = vmax.f32 %v2170_v12, %v177_v22  ;;  %v1468_v56 = vmax.f32 %v146_v3, %v178_v8  ;;  %v180_v14 = vmax.f32 %v84_v51, %v981_v18  ;;  %622 = vrot.lane.b32.xlu0 %v1218_v34, %s890_s17  ;;  %v148_v0 = vmax.f32 %v20_v1, %v976_v17  ;;  %v23_v8 = vld [vmem:[%s2091_s0 + $0x30] sm:$0xff] }
  0x24   :  { %v211_v42 = vmax.f32 %v2171_v35, %v179_v62  ;;  %v181_v2 = vmax.f32 %v85_v6, %v968_v13  ;;  %v182_v22 = vmax.f32 %v86_v21, %v997_v25  ;;  %624 = vrot.lane.b32.xlu1 %v1234_v55, %s890_s17  ;;  %v1489_v34 = vsel %vm305_vm0, %v306_v48, %v307_v63  ;;  %v88_v25 = vld [vmem:[%s2092_s2 + $0x38] sm:$0x7f]  ;;  %v89_v21 = vld [vmem:[%s2092_s2 + $0x40] sm:$0xff] }
  0x25   :  { %v1473_v37 = vmax.f32 %v209_v28, %v306_v48  ;;  %v310_v17 = vrot.slane %v180_v14, 7  ;;  %v150_v13 = vmax.f32 %v22_v49, %v992_v24  ;;  %v24_v62 = vld [vmem:[%s2091_s0 + $0x38] sm:$0x7f]  ;;  %v1500_v55 = vmax.f32 %v148_v0, %v180_v14  ;;  %v90_v48 = vld [vmem:[%s2092_s2 + $0x48] sm:$0x7f]  ;;  %v25_v49 = vld [vmem:[%s2091_s0 + $0x40] sm:$0xff] }
  0x26   :  { %v1486_v18 = vmax.f32 %v211_v42, %v309_v11  ;;  %v312_v30 = vrot.slane %v181_v2, 7  ;;  %v313_v51 = vrot.slane %v182_v22, 7  ;;  %v149_v1 = vmax.f32 %v21_v5, %v1002_v26 }
  0x27   :  { %v1506_v24 = vsel %vm305_vm0, %v309_v11, %v310_v17  ;;  %v1508_v3 = vmax.f32 %v150_v13, %v182_v22  ;;  %v183_v6 = vmax.f32 %v87_v7, %v1019_v32  ;;  %626 = vrot.lane.b32.xlu0 %v1252_v44, %s890_s17  ;;  %v184_v26 = vmax.f32 %v88_v25, %v1024_v33  ;;  %v26_v11 = vld [vmem:[%s2091_s0 + $0x48] sm:$0x7f]  ;;  %v28_v17 = vld [vmem:[%s2091_s0 + $0x58] sm:$0x7f]  ;;  %v93_v25 = vld [vmem:[%s2092_s2 + $0x60] sm:$0xff] }
  0x28   :  { %v1523_v28 = vsel %vm305_vm0, %v312_v30, %v313_v51  ;;  %v152_v32 = vmax.f32 %v24_v62, %v1014_v31  ;;  %628 = vrot.lane.b32.xlu1 %v1273_v15, %s890_s17  ;;  %v213_v35 = vmax.f32 %v149_v1, %v181_v2  ;;  %v151_v33 = vmax.f32 %v23_v8, %v1034_v38  ;;  %v91_v31 = vld [vmem:[%s2092_s2 + $0x50] sm:$0xff]  ;;  %v92_v38 = vld [vmem:[%s2092_s2 + $0x58] sm:$0x7f]  ;;  %v30_v8 = vld [vmem:[%s2091_s0 + $0x68] sm:$0x7f] }
  0x29   :  { %v315_v42 = vrot.slane %v183_v6, 7  ;;  %v316_v63 = vrot.slane %v184_v26, 7  ;;  %v185_v0 = vmax.f32 %v89_v21, %v1044_v40  ;;  %v186_v22 = vmax.f32 %v90_v48, %v1051_v45  ;;  %v29_v48 = vld [vmem:[%s2091_s0 + $0x60] sm:$0xff] }
  0x2a   :  { %v1541_v14 = vmax.f32 %v152_v32, %v184_v26  ;;  %v1545_v5 = vmax.f32 %v213_v35, %v312_v30  ;;  %v215_v15 = vmax.f32 %v151_v33, %v183_v6  ;;  %v154_v7 = vmax.f32 %v26_v11, %v1039_v39  ;;  %v95_v26 = vld [vmem:[%s2092_s2 + $0x70] sm:$0xff] }
  0x2b   :  { %v153_v2 = vmax.f32 %v25_v49, %v1056_v46  ;;  %630 = vrot.lane.b32.xlu0 %v1290_v4, %s890_s17  ;;  %v1558_v40 = vsel %vm305_vm0, %v315_v42, %v316_v63  ;;  %v318_v45 = vrot.slane %v185_v0, 7  ;;  %v319_v13 = vrot.slane %v186_v22, 7  ;;  %v27_v46 = vld [vmem:[%s2091_s0 + $0x50] sm:$0xff] }
  0x2c   :  { %v187_v39 = vmax.f32 %v91_v31, %v1071_v52  ;;  %632 = vrot.lane.b32.xlu1 %v1288_v23, %s890_s17  ;;  %v1571_v62 = vmax.f32 %v215_v15, %v315_v42  ;;  %v1573_v30 = vmax.f32 %v154_v7, %v186_v22  ;;  %v94_v52 = vld [vmem:[%s2092_s2 + $0x68] sm:$0x7f]  ;;  %v188_v23 = vmax.f32 %v92_v38, %v1076_v53  ;;  %v31_v15 = vld [vmem:[%s2091_s0 + $0x70] sm:$0xff] }
  0x2d   :  { %v217_v51 = vmax.f32 %v153_v2, %v185_v0  ;;  %v1582_v1 = vsel %vm305_vm0, %v318_v45, %v319_v13  ;;  %v156_v21 = vmax.f32 %v28_v17, %v1061_v47  ;;  %v155_v49 = vmax.f32 %v27_v46, %v1081_v54  ;;  %v96_v47 = vld [vmem:[%s2092_s2 + $0x78] sm:$0x7f]  ;;  %v2172_v0 = vld [vmem:[#allocation3_spill] sm:$0xff]  ;;  %v2201_v4 = vld [vmem:[#allocation28_spill] sm:$0xff] }
  0x2e   :  { %v321_v6 = vrot.slane %v187_v39, 7  ;;  %v189_v53 = vmax.f32 %v93_v25, %v1098_v60  ;;  %v322_v35 = vrot.slane %v188_v23, 7  ;;  %v190_v33 = vmax.f32 %v94_v52, %v1103_v61  ;;  %v98_v38 = vld [vmem:[%s2092_s2 + $0x88] sm:$0x7f]  ;;  %v2174_v52 = vld [vmem:[#allocation2_spill] sm:$0xff] }
  0x2f   :  { %v1594_v11 = vmax.f32 %v217_v51, %v318_v45  ;;  %634 = vrot.lane.b32.xlu0 %v1327_v29, %s890_s17  ;;  %v1603_v42 = vmax.f32 %v156_v21, %v188_v23  ;;  %v158_v31 = vmax.f32 %v30_v8, %v1093_v59  ;;  %v219_v54 = vmax.f32 %v155_v49, %v187_v39  ;;  %v32_v29 = vld [vmem:[%s2091_s0 + $0x78] sm:$0x7f]  ;;  %v34_v46 = vld [vmem:[%s2091_s0 + $0x88] sm:$0x7f] }
  0x30   :  { %636 = vrot.lane.b32.xlu1 %v1325_v16, %s890_s17  ;;  %v324_v63 = vrot.slane %v189_v53, 7  ;;  %v157_v60 = vmax.f32 %v29_v48, %v1111_v9  ;;  %v191_v22 = vmax.f32 %v95_v26, %v2172_v0  ;;  %v1618_v61 = vsel %vm305_vm0, %v321_v6, %v322_v35  ;;  %v2173_v16 = vld [vmem:[#allocation4_spill] sm:$0xff]  ;;  %v97_v9 = vld [vmem:[%s2092_s2 + $0x80] sm:$0xff]  ;;  %v2175_v23 = vld [vmem:[#allocation5_spill] sm:$0xff] }
  0x31   :  { %v325_v59 = vrot.slane %v190_v33, 7  ;;  %v1620_v7 = vmax.f32 %v158_v31, %v190_v33  ;;  %v192_v2 = vmax.f32 %v96_v47, %v2173_v16  ;;  %v1631_v45 = vmax.f32 %v219_v54, %v321_v6  ;;  %v33_v6 = vld [vmem:[%s2091_s0 + $0x80] sm:$0xff]  ;;  %v99_v48 = vld [vmem:[%s2092_s2 + $0x90] sm:$0xff]  ;;  %v100_v31 = vld [vmem:[%s2092_s2 + $0x98] sm:$0x7f] }
  0x32   :  { %v221_v13 = vmax.f32 %v157_v60, %v189_v53  ;;  %v327_v39 = vrot.slane %v191_v22, 7  ;;  %v160_v8 = vmax.f32 %v32_v29, %v2174_v52  ;;  %v159_v21 = vmax.f32 %v31_v15, %v2175_v23  ;;  %v2176_v26 = vld [vmem:[#allocation34_spill] sm:$0xff]  ;;  %v2177_v53 = vld [vmem:[#allocation7_spill] sm:$0xff]  ;;  %v2178_v35 = vld [vmem:[#allocation8_spill] sm:$0xff] }
  0x33   :  { %638 = vrot.lane.b32.xlu0 %v1348_v43, %s890_s17  ;;  %v1639_v25 = vsel %vm305_vm0, %v324_v63, %v325_v59  ;;  %v328_v51 = vrot.slane %v192_v2, 7  ;;  %v193_v47 = vmax.f32 %v97_v9, %v2177_v53  ;;  %v194_v33 = vmax.f32 %v98_v38, %v2178_v35  ;;  %v2179_v29 = vld [vmem:[#allocation6_spill] sm:$0xff]  ;;  %v2180_v9 = vld [vmem:[#allocation9_spill] sm:$0xff]  ;;  %v106_v17 = vld [vmem:[%s2092_s2 + $0xc8] sm:$0x7f] }
  0x34   :  { %640 = vrot.lane.b32.xlu1 %v2176_v26, %s890_s17  ;;  %v1653_v49 = vmax.f32 %v221_v13, %v324_v63  ;;  %v1663_v60 = vmax.f32 %v160_v8, %v192_v2  ;;  %v223_v0 = vmax.f32 %v159_v21, %v191_v22  ;;  %v162_v15 = vmax.f32 %v34_v46, %v2179_v29  ;;  %v36_v63 = vld [vmem:[%s2091_s0 + $0x98] sm:$0x7f]  ;;  %v2181_v13 = vld [vmem:[#allocation11_spill] sm:$0xff]  ;;  %v101_v22 = vld [vmem:[%s2092_s2 + $0xa0] sm:$0xff] }
  0x35   :  { %v1661_v54 = vsel %vm305_vm0, %v327_v39, %v328_v51  ;;  %v330_v59 = vrot.slane %v193_v47, 7  ;;  %v331_v16 = vrot.slane %v194_v33, 7  ;;  %v161_v38 = vmax.f32 %v33_v6, %v2180_v9  ;;  %v35_v51 = vld [vmem:[%s2091_s0 + $0x90] sm:$0xff]  ;;  %v2182_v2 = vld [vmem:[#allocation37_spill] sm:$0xff]  ;;  %v38_v26 = vld [vmem:[%s2091_s0 + $0xa8] sm:$0x7f] }
  0x36   :  { %v195_v52 = vmax.f32 %v99_v48, %v2181_v13  ;;  %v1681_v8 = vmax.f32 %v223_v0, %v327_v39  ;;  %v1683_v23 = vmax.f32 %v162_v15, %v194_v33  ;;  %v2183_v21 = vld [vmem:[#allocation12_spill] sm:$0xff]  ;;  %v102_v48 = vld [vmem:[%s2092_s2 + $0xa8] sm:$0x7f]  ;;  %v2184_v33 = vld [vmem:[#allocation10_spill] sm:$0xff] }
  0x37   :  { %642 = vrot.lane.b32.xlu0 %v2182_v2, %s890_s17  ;;  %v196_v6 = vmax.f32 %v100_v31, %v2183_v21  ;;  %v1695_v53 = vsel %vm305_vm0, %v330_v59, %v331_v16  ;;  %v225_v39 = vmax.f32 %v161_v38, %v193_v47  ;;  %v164_v0 = vmax.f32 %v36_v63, %v2184_v33  ;;  %v37_v31 = vld [vmem:[%s2091_s0 + $0xa0] sm:$0xff]  ;;  %v2185_v9 = vld [vmem:[#allocation13_spill] sm:$0xff]  ;;  %v2186_v2 = vld [vmem:[#allocation16_spill] sm:$0xff] }
  0x38   :  { %644 = vrot.lane.b32.xlu1 %v1400_v36, %s890_s17  ;;  %v333_v35 = vrot.slane %v195_v52, 7  ;;  %v163_v13 = vmax.f32 %v35_v51, %v2185_v9  ;;  %v197_v21 = vmax.f32 %v101_v22, %v2186_v2  ;;  %v103_v36 = vld [vmem:[%s2092_s2 + $0xb0] sm:$0xff]  ;;  %v2187_v63 = vld [vmem:[#allocation15_spill] sm:$0xff]  ;;  %v2188_v33 = vld [vmem:[#allocation14_spill] sm:$0xff] }
  0x39   :  { %v334_v15 = vrot.slane %v196_v6, 7  ;;  %v1708_v47 = vmax.f32 %v225_v39, %v330_v59  ;;  %v1710_v16 = vmax.f32 %v164_v0, %v196_v6  ;;  %v198_v38 = vmax.f32 %v102_v48, %v2187_v63  ;;  %v104_v29 = vld [vmem:[%s2092_s2 + $0xb8] sm:$0x7f]  ;;  %v105_v0 = vld [vmem:[%s2092_s2 + $0xc0] sm:$0xff]  ;;  %v2191_v63 = vld [vmem:[#allocation19_spill] sm:$0xff] }
  0x3a   :  { %v166_v46 = vmax.f32 %v38_v26, %v2188_v33  ;;  %v40_v51 = vld [vmem:[%s2091_s0 + $0xb8] sm:$0x7f]  ;;  %v227_v22 = vmax.f32 %v163_v13, %v195_v52  ;;  %v336_v6 = vrot.slane %v197_v21, 7  ;;  %v39_v26 = vld [vmem:[%s2091_s0 + $0xb0] sm:$0xff]  ;;  %v200_v33 = vmax.f32 %v104_v29, %v2191_v63  ;;  %v41_v29 = vld [vmem:[%s2091_s0 + $0xc0] sm:$0xff] }
  0x3b   :  { %646 = vrot.lane.b32.xlu0 %v1413_v50, %s890_s17  ;;  %v1723_v59 = vsel %vm305_vm0, %v333_v35, %v334_v15  ;;  %v2189_v39 = vld [vmem:[#allocation17_spill] sm:$0xff]  ;;  %v337_v15 = vrot.slane %v198_v38, 7  ;;  %v2190_v52 = vld [vmem:[#allocation20_spill] sm:$0xff]  ;;  %v2197_v50 = vld [vmem:[#allocation22_spill] sm:$0xff] }
  0x3c   :  { %v165_v48 = vmax.f32 %v37_v31, %v2189_v39  ;;  %648 = vrot.lane.b32.xlu1 %v1411_v27, %s890_s17  ;;  %v1736_v9 = vmax.f32 %v166_v46, %v198_v38  ;;  %v199_v13 = vmax.f32 %v103_v36, %v2190_v52  ;;  %v1739_v31 = vmax.f32 %v227_v22, %v333_v35  ;;  %v2192_v39 = vld [vmem:[#allocation18_spill] sm:$0xff]  ;;  %v42_v27 = vld [vmem:[%s2091_s0 + $0xc8] sm:$0x7f]  ;;  %v2193_v36 = vld [vmem:[#allocation21_spill] sm:$0xff] }
  0x3d   :  { %v168_v43 = vmax.f32 %v40_v51, %v2192_v39  ;;  %v1750_v46 = vsel %vm305_vm0, %v336_v6, %v337_v15  ;;  %v167_v35 = vmax.f32 %v39_v26, %v2193_v36  ;;  %v2194_v22 = vld [vmem:[#allocation23_spill] sm:$0xff]  ;;  %v107_v51 = vld [vmem:[%s2092_s2 + $0xd0] sm:$0xff]  ;;  %v170_v32 = vmax.f32 %v42_v27, %v2197_v50 }
  0x3e   :  { %v229_v2 = vmax.f32 %v165_v48, %v197_v21  ;;  %v339_v38 = vrot.slane %v199_v13, 7  ;;  %v201_v21 = vmax.f32 %v105_v0, %v2194_v22  ;;  %v108_v48 = vld [vmem:[%s2092_s2 + $0xd8] sm:$0x7f]  ;;  %v340_v0 = vrot.slane %v200_v33, 7  ;;  %v2196_v39 = vld [vmem:[#allocation24_spill] sm:$0xff] }
  0x3f   :  { %650 = vrot.lane.b32.xlu0 %v1434_v20, %s890_s17  ;;  %v1769_v52 = vmax.f32 %v168_v43, %v200_v33  ;;  %v231_v63 = vmax.f32 %v167_v35, %v199_v13  ;;  %v202_v36 = vmax.f32 %v106_v17, %v2196_v39  ;;  %v44_v20 = vld [vmem:[%s2091_s0 + $0xd8] sm:$0x7f]  ;;  %v2200_v43 = vld [vmem:[#allocation27_spill] sm:$0xff]  ;;  %v204_v44 = vmax.f32 %v108_v48, %v2201_v4  ;;  %v109_v17 = vld [vmem:[%s2092_s2 + $0xe0] sm:$0xff] }
  0x40   :  { %v1767_v15 = vmax.f32 %v229_v2, %v336_v6  ;;  %652 = vrot.lane.b32.xlu1 %v1432_v41, %s890_s17  ;;  %v342_v22 = vrot.slane %v201_v21, 7  ;;  %v1779_v26 = vsel %vm305_vm0, %v339_v38, %v340_v0  ;;  %v2199_v6 = vld [vmem:[#allocation25_spill] sm:$0xff]  ;;  %v203_v33 = vmax.f32 %v107_v51, %v2200_v43  ;;  %v43_v41 = vld [vmem:[%s2091_s0 + $0xd0] sm:$0xff]  ;;  %v110_v50 = vld [vmem:[%s2092_s2 + $0xe8] sm:$0x7f] }
  0x41   :  { %2195 = vst [vmem:[#allocation3_spill] sm:$0xff] %v1769_v52  ;;  %2198 = vst [vmem:[#allocation4_spill] sm:$0xff] %v1779_v26  ;;  %v169_v2 = vmax.f32 %v41_v29, %v2199_v6  ;;  %v1795_v27 = vmax.f32 %v231_v63, %v339_v38  ;;  %v343_v35 = vrot.slane %v202_v36, 7  ;;  %v1797_v29 = vmax.f32 %v170_v32, %v202_v36  ;;  %v2203_v0 = vld [vmem:[#allocation26_spill] sm:$0xff]  ;;  %v46_v6 = vld [vmem:[%s2091_s0 + $0xe8] sm:$0x7f] }
  0x42   :  { %v345_v51 = vrot.slane %v203_v33, 7  ;;  %v346_v48 = vrot.slane %v204_v44, 7  ;;  %v172_v39 = vmax.f32 %v44_v20, %v2203_v0  ;;  %v2205_v32 = vld [vmem:[#allocation29_spill] sm:$0xff]  ;;  %v2206_v36 = vld [vmem:[#allocation32_spill] sm:$0xff]  ;;  %v45_v20 = vld [vmem:[%s2091_s0 + $0xe0] sm:$0xff] }
  0x43   :  { %2202 = vst [vmem:[#allocation2_spill] sm:$0xff] %v1797_v29  ;;  %654 = vrot.lane.b32.xlu0 %v1444_v57, %s890_s17  ;;  %v233_v4 = vmax.f32 %v169_v2, %v201_v21  ;;  %v1808_v38 = vsel %vm305_vm0, %v342_v22, %v343_v35  ;;  %v171_v63 = vmax.f32 %v43_v41, %v2205_v32  ;;  %v2207_v57 = vld [vmem:[#allocation31_spill] sm:$0xff]  ;;  %v111_v2 = vld [vmem:[%s2092_s2 + $0xf0] sm:$0xff]  ;;  %v48_v0 = vld [vmem:[%s2091_s0 + $0xf8] sm:$0x7f] }
  0x44   :  { %656 = vrot.lane.b32.xlu1 %v1457_v58, %s890_s17  ;;  %2204 = vst [vmem:[#allocation5_spill] sm:$0xff] %v1808_v38  ;;  %v205_v43 = vmax.f32 %v109_v17, %v2206_v36  ;;  %v206_v21 = vmax.f32 %v110_v50, %v2207_v57  ;;  %v112_v58 = vld [vmem:[%s2092_s2 + $0xf8] sm:$0x7f]  ;;  %v1827_v17 = vsel %vm305_vm0, %v345_v51, %v346_v48  ;;  %v2209_v13 = vld [vmem:[#allocation30_spill] sm:$0xff]  ;;  %v47_v35 = vld [vmem:[%s2091_s0 + $0xf0] sm:$0xff]  ;;  %s891_s0 = smov 127  }
  0x45   :  { %v1824_v41 = vmax.f32 %v233_v4, %v342_v22  ;;  %v1829_v50 = vmax.f32 %v172_v39, %v204_v44  ;;  %v235_v32 = vmax.f32 %v171_v63, %v203_v33  ;;  %v174_v12 = vmax.f32 %v46_v6, %v2209_v13  ;;  %v2210_v4 = vld [vmem:[#allocation33_spill] sm:$0xff]  ;;  %v2211_v39 = vld [vmem:[#allocation36_spill] sm:$0xff]  ;;  %v2212_v13 = vld [vmem:[#allocation35_spill] sm:$0xff] }
  0x46   :  { %v348_v36 = vrot.slane %v205_v43, 7  ;;  %v349_v57 = vrot.slane %v206_v21, 7  ;;  %v173_v48 = vmax.f32 %v45_v20, %v2210_v4  ;;  %v207_v44 = vmax.f32 %v111_v2, %v1391_v19  ;;  %v2213_v52 = vld [vmem:[#allocation38_spill] sm:$0xff] }
  0x47   :  { %2208 = vst [vmem:[#allocation34_spill] sm:$0xff] %v1824_v41  ;;  %v208_v10 = vmax.f32 %v112_v58, %v2211_v39  ;;  %v1843_v38 = vmax.f32 %v235_v32, %v345_v51  ;;  %v1848_v63 = vmax.f32 %v174_v12, %v206_v21  ;;  %v176_v6 = vmax.f32 %v48_v0, %v2212_v13 }
  0x48   :  { %v1846_v33 = vsel %vm305_vm0, %v348_v36, %v349_v57  ;;  %v237_v29 = vmax.f32 %v173_v48, %v205_v43  ;;  %v351_v41 = vrot.slane %v207_v44, 7  ;;  %v175_v22 = vmax.f32 %v47_v35, %v2213_v52 }
  0x49   :  { %v352_v26 = vrot.slane %v208_v10, 7  ;;  %v415_v20 = vmax.f32 %v1848_v63, %v1846_v33  ;;  %v1854_v19 = vmax.f32 %v176_v6, %v208_v10 }
  0x4a   :  { %v1856_v2 = vmax.f32 %v237_v29, %v348_v36  ;;  %v239_v58 = vmax.f32 %v175_v22, %v207_v44 }
  0x4b   :  { %v1859_v51 = vsel %vm305_vm0, %v351_v41, %v352_v26  ;;  %v2214_v26 = vmax.f32 %v1468_v56, %v1489_v34 }
  0x4c   :  { %v417_v12 = vmax.f32 %v1854_v19, %v1859_v51  ;;  %v1863_v21 = vmax.f32 %v239_v58, %v351_v41  ;;  %v2215_v41 = vmax.f32 %v1500_v55, %v1506_v24  ;;  %v2217_v55 = vmax.f32 %v1541_v14, %v1558_v40 }
  0x4d   :  { %v2219_v14 = vmax.f32 %v1603_v42, %v1618_v61  ;;  %v2221_v42 = vmax.f32 %v1663_v60, %v1661_v54  ;;  %v2223_v54 = vmax.f32 %v1710_v16, %v1723_v59  ;;  %v2225_v16 = vld [vmem:[#allocation3_spill] sm:$0xff]  ;;  %v2226_v59 = vld [vmem:[#allocation4_spill] sm:$0xff] }
  0x79   :  { %v595_v43 = vpop.permute.xlu0 %594  ;;  %v599_v52 = vpop.permute.xlu1 %598 }
  0x7a   :  { %v690_v0 = vmax.f32 %v1473_v37, %v595_v43  ;;  %v692_v10 = vmax.f32 %v1486_v18, %v599_v52  ;;  %v2216_v18 = vmax.f32 %v1508_v3, %v1523_v28  ;;  %v2218_v3 = vmax.f32 %v1573_v30, %v1582_v1 }
  0x7b   :  { %v2220_v30 = vmax.f32 %v1620_v7, %v1639_v25  ;;  %v2222_v7 = vmax.f32 %v1683_v23, %v1695_v53  ;;  %v2224_v23 = vmax.f32 %v1736_v9, %v1750_v46  ;;  %v2229_v9 = vld [vmem:[#allocation2_spill] sm:$0xff]  ;;  %v2230_v46 = vld [vmem:[#allocation5_spill] sm:$0xff] }
  0x7c   :  { %754 = vrot.lane.b32.xlu0 %v690_v0, %s891_s0 }
  0x7d   :  { %v597_v29 = vpop.permute.xlu0 %596  ;;  %v601_v32 = vpop.permute.xlu1 %600 }
  0x7e   :  { %v691_v35 = vmax.f32 %v2214_v26, %v597_v29  ;;  %v693_v37 = vmax.f32 %v2215_v41, %v601_v32 }
  0x80   :  { %756 = vrot.lane.b32.xlu1 %v691_v35, %s891_s0  ;;  %758 = vrot.lane.b32.xlu0 %v692_v10, %s891_s0 }
  0x81   :  { %v603_v36 = vpop.permute.xlu0 %602  ;;  %v605_v57 = vpop.permute.xlu1 %604 }
  0x82   :  { %v694_v22 = vmax.f32 %v1545_v5, %v603_v36  ;;  %v695_v56 = vmax.f32 %v2216_v18, %v605_v57  ;;  %v2227_v57 = vmax.f32 %v2225_v16, %v2226_v59 }
  0x84   :  { %760 = vrot.lane.b32.xlu1 %v693_v37, %s891_s0  ;;  %762 = vrot.lane.b32.xlu0 %v694_v22, %s891_s0 }
  0x85   :  { %v607_v34 = vpop.permute.xlu0 %606  ;;  %v609_v4 = vpop.permute.xlu1 %608 }
  0x86   :  { %v696_v48 = vmax.f32 %v1571_v62, %v607_v34  ;;  %v697_v24 = vmax.f32 %v2217_v55, %v609_v4  ;;  %v2231_v4 = vmax.f32 %v2229_v9, %v2230_v46 }
  0x88   :  { %764 = vrot.lane.b32.xlu1 %v695_v56, %s891_s0  ;;  %766 = vrot.lane.b32.xlu0 %v696_v48, %s891_s0  ;;  %v2228_v56 = vld [vmem:[#allocation34_spill] sm:$0xff] }
  0x89   :  { %v611_v5 = vpop.permute.xlu0 %610  ;;  %v613_v44 = vpop.permute.xlu1 %612 }
  0x8a   :  { %v698_v39 = vmax.f32 %v1594_v11, %v611_v5  ;;  %v699_v28 = vmax.f32 %v2218_v3, %v613_v44  ;;  %v2232_v5 = vmax.f32 %v1829_v50, %v1827_v17 }
  0x8c   :  { %768 = vrot.lane.b32.xlu1 %v697_v24, %s891_s0  ;;  %770 = vrot.lane.b32.xlu0 %v698_v39, %s891_s0 }
  0x8d   :  { %v615_v62 = vpop.permute.xlu0 %614  ;;  %v617_v13 = vpop.permute.xlu1 %616 }
  0x8e   :  { %v700_v6 = vmax.f32 %v1631_v45, %v615_v62  ;;  %v701_v40 = vmax.f32 %v2219_v14, %v617_v13 }
  0x90   :  { %772 = vrot.lane.b32.xlu1 %v699_v28, %s891_s0  ;;  %774 = vrot.lane.b32.xlu0 %v700_v6, %s891_s0 }
  0x91   :  { %v619_v11 = vpop.permute.xlu0 %618  ;;  %v621_v58 = vpop.permute.xlu1 %620 }
  0x92   :  { %v702_v43 = vmax.f32 %v1653_v49, %v619_v11  ;;  %v703_v1 = vmax.f32 %v2220_v30, %v621_v58 }
  0x94   :  { %776 = vrot.lane.b32.xlu1 %v701_v40, %s891_s0  ;;  %778 = vrot.lane.b32.xlu0 %v702_v43, %s891_s0 }
  0x95   :  { %v623_v45 = vpop.permute.xlu0 %622 }
  0x96   :  { %v625_v0 = vpop.permute.xlu1 %624  ;;  %v704_v52 = vmax.f32 %v1681_v8, %v623_v45 }
  0x97   :  { %v705_v61 = vmax.f32 %v2221_v42, %v625_v0 }
  0x98   :  { %780 = vrot.lane.b32.xlu1 %v703_v1, %s891_s0  ;;  %782 = vrot.lane.b32.xlu0 %v704_v52, %s891_s0 }
  0x99   :  { %v627_v49 = vpop.permute.xlu0 %626 }
  0x9a   :  { %v629_v10 = vpop.permute.xlu1 %628  ;;  %v706_v29 = vmax.f32 %v1708_v47, %v627_v49 }
  0x9b   :  { %v707_v25 = vmax.f32 %v2222_v7, %v629_v10 }
  0x9c   :  { %784 = vrot.lane.b32.xlu1 %v705_v61, %s891_s0  ;;  %786 = vrot.lane.b32.xlu0 %v706_v29, %s891_s0 }
  0x9d   :  { %v631_v8 = vpop.permute.xlu0 %630 }
  0x9e   :  { %v633_v26 = vpop.permute.xlu1 %632  ;;  %v708_v35 = vmax.f32 %v1739_v31, %v631_v8 }
  0x9f   :  { %v709_v60 = vmax.f32 %v2223_v54, %v633_v26 }
  0xa0   :  { %788 = vrot.lane.b32.xlu1 %v707_v25, %s891_s0  ;;  %790 = vrot.lane.b32.xlu0 %v708_v35, %s891_s0 }
  0xa1   :  { %v635_v47 = vpop.permute.xlu0 %634 }
  0xa2   :  { %v637_v32 = vpop.permute.xlu1 %636  ;;  %v710_v41 = vmax.f32 %v1767_v15, %v635_v47 }
  0xa3   :  { %v711_v53 = vmax.f32 %v2224_v23, %v637_v32 }
  0xa4   :  { %792 = vrot.lane.b32.xlu1 %v709_v60, %s891_s0  ;;  %794 = vrot.lane.b32.xlu0 %v710_v41, %s891_s0 }
  0xa5   :  { %v639_v31 = vpop.permute.xlu0 %638 }
  0xa6   :  { %v641_v37 = vpop.permute.xlu1 %640  ;;  %v712_v36 = vmax.f32 %v1795_v27, %v639_v31 }
  0xa7   :  { %v713_v22 = vmax.f32 %v2227_v57, %v641_v37 }
  0xa8   :  { %796 = vrot.lane.b32.xlu1 %v711_v53, %s891_s0  ;;  %798 = vrot.lane.b32.xlu0 %v712_v36, %s891_s0 }
  0xa9   :  { %v643_v15 = vpop.permute.xlu0 %642 }
  0xaa   :  { %v645_v18 = vpop.permute.xlu1 %644  ;;  %v714_v34 = vmax.f32 %v2228_v56, %v643_v15 }
  0xab   :  { %v715_v48 = vmax.f32 %v2231_v4, %v645_v18 }
  0xac   :  { %800 = vrot.lane.b32.xlu1 %v713_v22, %s891_s0  ;;  %802 = vrot.lane.b32.xlu0 %v714_v34, %s891_s0 }
  0xad   :  { %v647_v27 = vpop.permute.xlu0 %646 }
  0xae   :  { %v649_v55 = vpop.permute.xlu1 %648  ;;  %v716_v24 = vmax.f32 %v1843_v38, %v647_v27 }
  0xaf   :  { %v717_v44 = vmax.f32 %v2232_v5, %v649_v55 }
  0xb0   :  { %804 = vrot.lane.b32.xlu1 %v715_v48, %s891_s0  ;;  %806 = vrot.lane.b32.xlu0 %v716_v24, %s891_s0 }
  0xb1   :  { %v651_v39 = vpop.permute.xlu0 %650 }
  0xb2   :  { %v653_v3 = vpop.permute.xlu1 %652  ;;  %v718_v28 = vmax.f32 %v1856_v2, %v651_v39 }
  0xb3   :  { %v719_v62 = vmax.f32 %v415_v20, %v653_v3 }
  0xb4   :  { %808 = vrot.lane.b32.xlu1 %v717_v44, %s891_s0  ;;  %810 = vrot.lane.b32.xlu0 %v718_v28, %s891_s0 }
  0xb5   :  { %v655_v38 = vpop.permute.xlu0 %654 }
  0xb6   :  { %v657_v13 = vpop.permute.xlu1 %656  ;;  %v720_v6 = vmax.f32 %v1863_v21, %v655_v38 }
  0xb7   :  { %v721_v17 = vmax.f32 %v417_v12, %v657_v13 }
  0xb8   :  { %812 = vrot.lane.b32.xlu1 %v719_v62, %s891_s0  ;;  %814 = vrot.lane.b32.xlu0 %v720_v6, %s891_s0 }
  0xbc   :  { %816 = vrot.lane.b32.xlu1 %v721_v17, %s891_s0 }
  0xee   :  { %v755_v50 = vpop.permute.xlu0 %754 }
  0xef   :  { %851 = vst.msk [vmem:[%s2093_s4 - $0x1] sm:$0xfe] %vm850_vm1, %v755_v50 }
  0xf2   :  { %v757_v33 = vpop.permute.xlu1 %756  ;;  %v759_v63 = vpop.permute.xlu0 %758 }
  0xf3   :  { %853 = vst.msk [vmem:[%s2093_s4 + $0x7] sm:$0x7f] %vm852_vm2, %v757_v33 }
  0xf4   :  { %854 = vst.msk [vmem:[%s2093_s4 + $0xf] sm:$0xfe] %vm850_vm1, %v759_v63 }
  0xf6   :  { %v761_v20 = vpop.permute.xlu1 %760  ;;  %v763_v19 = vpop.permute.xlu0 %762 }
  0xf7   :  { %855 = vst.msk [vmem:[%s2093_s4 + $0x17] sm:$0x7f] %vm852_vm2, %v761_v20 }
  0xf8   :  { %856 = vst.msk [vmem:[%s2093_s4 + $0x1f] sm:$0xfe] %vm850_vm1, %v763_v19 }
  0xfa   :  { %v765_v2 = vpop.permute.xlu1 %764  ;;  %v767_v51 = vpop.permute.xlu0 %766 }
  0xfb   :  { %857 = vst.msk [vmem:[%s2093_s4 + $0x27] sm:$0x7f] %vm852_vm2, %v765_v2 }
  0xfc   :  { %858 = vst.msk [vmem:[%s2093_s4 + $0x2f] sm:$0xfe] %vm850_vm1, %v767_v51 }
  0xfe   :  { %v769_v12 = vpop.permute.xlu1 %768  ;;  %v771_v21 = vpop.permute.xlu0 %770 }
  0xff   :  { %859 = vst.msk [vmem:[%s2093_s4 + $0x37] sm:$0x7f] %vm852_vm2, %v769_v12 }
 0x100   :  { %860 = vst.msk [vmem:[%s2093_s4 + $0x3f] sm:$0xfe] %vm850_vm1, %v771_v21 }
 0x102   :  { %v773_v14 = vpop.permute.xlu1 %772  ;;  %v775_v40 = vpop.permute.xlu0 %774 }
 0x103   :  { %861 = vst.msk [vmem:[%s2093_s4 + $0x47] sm:$0x7f] %vm852_vm2, %v773_v14 }
 0x104   :  { %862 = vst.msk [vmem:[%s2093_s4 + $0x4f] sm:$0xfe] %vm850_vm1, %v775_v40 }
 0x106   :  { %v777_v11 = vpop.permute.xlu1 %776  ;;  %v779_v58 = vpop.permute.xlu0 %778 }
 0x107   :  { %863 = vst.msk [vmem:[%s2093_s4 + $0x57] sm:$0x7f] %vm852_vm2, %v777_v11 }
 0x108   :  { %864 = vst.msk [vmem:[%s2093_s4 + $0x5f] sm:$0xfe] %vm850_vm1, %v779_v58 }
 0x10a   :  { %v781_v43 = vpop.permute.xlu1 %780  ;;  %v783_v30 = vpop.permute.xlu0 %782 }
 0x10b   :  { %865 = vst.msk [vmem:[%s2093_s4 + $0x67] sm:$0x7f] %vm852_vm2, %v781_v43 }
 0x10c   :  { %866 = vst.msk [vmem:[%s2093_s4 + $0x6f] sm:$0xfe] %vm850_vm1, %v783_v30 }
 0x10e   :  { %v785_v1 = vpop.permute.xlu1 %784  ;;  %v787_v45 = vpop.permute.xlu0 %786 }
 0x10f   :  { %867 = vst.msk [vmem:[%s2093_s4 + $0x77] sm:$0x7f] %vm852_vm2, %v785_v1 }
 0x110   :  { %868 = vst.msk [vmem:[%s2093_s4 + $0x7f] sm:$0xfe] %vm850_vm1, %v787_v45 }
 0x112   :  { %v789_v0 = vpop.permute.xlu1 %788  ;;  %v791_v52 = vpop.permute.xlu0 %790 }
 0x113   :  { %869 = vst.msk [vmem:[%s2093_s4 + $0x87] sm:$0x7f] %vm852_vm2, %v789_v0 }
 0x114   :  { %870 = vst.msk [vmem:[%s2093_s4 + $0x8f] sm:$0xfe] %vm850_vm1, %v791_v52 }
 0x116   :  { %v793_v42 = vpop.permute.xlu1 %792  ;;  %v795_v61 = vpop.permute.xlu0 %794 }
 0x117   :  { %871 = vst.msk [vmem:[%s2093_s4 + $0x97] sm:$0x7f] %vm852_vm2, %v793_v42 }
 0x118   :  { %872 = vst.msk [vmem:[%s2093_s4 + $0x9f] sm:$0xfe] %vm850_vm1, %v795_v61 }
 0x11a   :  { %v797_v49 = vpop.permute.xlu1 %796  ;;  %v799_v10 = vpop.permute.xlu0 %798 }
 0x11b   :  { %873 = vst.msk [vmem:[%s2093_s4 + $0xa7] sm:$0x7f] %vm852_vm2, %v797_v49 }
 0x11c   :  { %874 = vst.msk [vmem:[%s2093_s4 + $0xaf] sm:$0xfe] %vm850_vm1, %v799_v10 }
 0x11e   :  { %v801_v29 = vpop.permute.xlu1 %800  ;;  %v803_v7 = vpop.permute.xlu0 %802 }
 0x11f   :  { %875 = vst.msk [vmem:[%s2093_s4 + $0xb7] sm:$0x7f] %vm852_vm2, %v801_v29 }
 0x120   :  { %876 = vst.msk [vmem:[%s2093_s4 + $0xbf] sm:$0xfe] %vm850_vm1, %v803_v7 }
 0x122   :  { %v805_v25 = vpop.permute.xlu1 %804  ;;  %v807_v8 = vpop.permute.xlu0 %806 }
 0x123   :  { %877 = vst.msk [vmem:[%s2093_s4 + $0xc7] sm:$0x7f] %vm852_vm2, %v805_v25 }
 0x124   :  { %878 = vst.msk [vmem:[%s2093_s4 + $0xcf] sm:$0xfe] %vm850_vm1, %v807_v8 }
 0x126   :  { %v809_v26 = vpop.permute.xlu1 %808  ;;  %v811_v35 = vpop.permute.xlu0 %810 }
 0x127   :  { %879 = vst.msk [vmem:[%s2093_s4 + $0xd7] sm:$0x7f] %vm852_vm2, %v809_v26 }
 0x128   :  { %880 = vst.msk [vmem:[%s2093_s4 + $0xdf] sm:$0xfe] %vm850_vm1, %v811_v35 }
 0x12a   :  { %v813_v54 = vpop.permute.xlu1 %812  ;;  %v815_v60 = vpop.permute.xlu0 %814 }
 0x12b   :  { %881 = vst.msk [vmem:[%s2093_s4 + $0xe7] sm:$0x7f] %vm852_vm2, %v813_v54 }
 0x12c   :  { %882 = vst.msk [vmem:[%s2093_s4 + $0xef] sm:$0xfe] %vm850_vm1, %v815_v60 }
 0x12e   :  { %v817_v47 = vpop.permute.xlu1 %816 }
 0x12f   :  { %883 = vst.msk [vmem:[%s2093_s4 + $0xf7] sm:$0x7f] %vm852_vm2, %v817_v47 }

// kernel: densenet_forward.14
= control target key start
LH: loop header
LB: loop body
LE: loop exit
PB: predicated region body
PF: predicated region fallthrough
CT: control target
= control target key end

     0   :  { %vm25_vm0 = vcmask 64512   ;;  %vm54_vm1 = vcmask 1043456   ;;  %v307_v3 = vmov 0   ;;  %v308_v4 = vmov 0.0   ;;  %s468_s0 = inlined_call_operand.vmem [shape: f32[8,392], index: 0, kind: input, shape index: {}]   ;;  %s469_s1 = inlined_call_operand.vmem [shape: f32[1,16,8], index: 1, kind: input, shape index: {}]   ;;  %s470_s4 = inlined_call_operand.vmem [shape: f32[16,392], index: 4, kind: output, shape index: {}]   ;;  %s471_s2 = inlined_call_operand.vmem [shape: f32[16,1], index: 2, kind: input, shape index: {}]   ;;  %s472_s3 = inlined_call_operand.vmem [shape: f32[16,1], index: 3, kind: input, shape index: {}]  }
   0x1   :  { %v35_v0 = vld [vmem:[%s468_s0 + $0x8] sm:$0xff]  ;;  %v37_v1 = vld [vmem:[%s468_s0 + $0x18] sm:$0xff]  ;;  %v34_v2 = vld [vmem:[%s468_s0] sm:$0xff]  ;;  %99 = vmatprep.mubr.bf16.mxu0 %v307_v3  ;;  %142 = vmatprep.mubr.bf16.mxu1 %v307_v3  ;;  %26 = vst.msk [vmem:[%s470_s4 + $0x18] sm:$0xff] %vm25_vm0, %v308_v4 }
   0x2   :  { %30 = vst.msk [vmem:[%s470_s4 + $0x38] sm:$0xff] %vm25_vm0, %v308_v4  ;;  %v39_v5 = vpack.c.bf16 %v35_v0, %v35_v0  ;;  %v41_v6 = vpack.c.bf16 %v37_v1, %v37_v1  ;;  %v38_v7 = vpack.c.bf16 %v34_v2, %v34_v2  ;;  %v36_v8 = vld [vmem:[%s468_s0 + $0x10] sm:$0xff]  ;;  %v31_v9 = vld [vmem:[%s469_s1] sm:$0xff]  ;;  %v32_v10 = vld [vmem:[%s469_s1 + $0x8] sm:$0xff]  ;;  %301 = vset.pattern.permute.xlu0 %v307_v3 }
   0x3   :  { %302 = vset.pattern.permute.xlu1 %v307_v3  ;;  %v40_v11 = vpack.c.bf16 %v36_v8, %v36_v8  ;;  %v33_v13 = vpack.c.bf16 %v32_v10, %v31_v9  ;;  %v226_v10 = vld [vmem:[%s471_s2 + $0x8] sm:$0xff] }
   0x4   :  { %295 = vmatprep.subr.msk.bf16.mxu0 %vm54_vm1, %v39_v5  ;;  %297 = vmatprep.subr.msk.bf16.mxu1 %vm54_vm1, %v41_v6  ;;  %v56_v12 = vsel %vm54_vm1, %v38_v7, 0  ;;  %v225_v7 = vld [vmem:[%s471_s2] sm:$0xff] }
   0x5   :  { %82 = vmatpush1.bf16.msra.mxu0 %v56_v12  ;;  %v62_v14 = vsel %vm54_vm1, %v40_v11, 0 }
   0x6   :  { %125 = vmatpush1.bf16.msra.mxu1 %v62_v14  ;;  %v233_v14 = vld [vmem:[%s472_s3] sm:$0xff] }
   0x8   :  { %296 = vmatmul.mubr.msk.bf16.vlgmr.msra.gmra.mxu0 %vm25_vm0, %v33_v13  ;;  %v45_v17 = vld [vmem:[%s470_s4 + $0x18] sm:$0xff] }
   0x9   :  { %298 = vmatmul.mubr.msk.bf16.vlgmr.msra.gmra.mxu1 %vm25_vm0, %v33_v13  ;;  %v49_v23 = vld [vmem:[%s470_s4 + $0x38] sm:$0xff] }
  0xc8   :  { %v366_v15 = vpop.f32.mrf.mxu0 }
  0xc9   :  { %v368_v16 = vpop.f32.mrf.mxu1 }
  0xca   :  { %v373_v18 = vpop.f32.mrf.mxu0 }
  0xcb   :  { %v146_v19 = vpop.f32.mrf.mxu1  ;;  %v180_v27 = vadd.f32 %v373_v18, %v366_v15 }
  0xcc   :  { %v156_v20 = vadd.f32 %v146_v19, %v45_v17  ;;  %v375_v21 = vpop.f32.mrf.mxu0 }
  0xcd   :  { %v377_v22 = vpop.f32.mrf.mxu1  ;;  %v181_v29 = vadd.f32 %v180_v27, %v368_v16 }
  0xce   :  { %164 = vst.msk [vmem:[%s470_s4 + $0x18] sm:$0xff] %vm25_vm0, %v156_v20  ;;  %v386_v24 = vpop.f32.mrf.mxu0  ;;  %v234_v20 = vld [vmem:[%s472_s3 + $0x8] sm:$0xff] }
  0xcf   :  { %v150_v25 = vpop.f32.mrf.mxu1  ;;  %v186_v30 = vadd.f32 %v386_v24, %v375_v21 }
  0xd0   :  { %v160_v26 = vadd.f32 %v150_v25, %v49_v23 }
  0xd1   :  { %v187_v34 = vadd.f32 %v186_v30, %v377_v22 }
  0xd2   :  { %168 = vst.msk [vmem:[%s470_s4 + $0x38] sm:$0xff] %vm25_vm0, %v160_v26 }
  0xd5   :  { %v397_v28 = vld [vmem:[%s470_s4 + $0x18] sm:$0xff] }
  0xd6   :  { %v182_v31 = vsel %vm25_vm0, %v397_v28, 0.0 }
  0xd7   :  { %v183_v32 = vadd.f32 %v182_v31, %v181_v29 }
  0xd9   :  { %184 = vadd.xlane.f32.xlu0 %v183_v32  ;;  %v407_v33 = vld [vmem:[%s470_s4 + $0x38] sm:$0xff] }
  0xda   :  { %v188_v35 = vsel %vm25_vm0, %v407_v33, 0.0 }
  0xdb   :  { %v189_v36 = vadd.f32 %v188_v35, %v187_v34 }
  0xdd   :  { %190 = vadd.xlane.f32.xlu0 %v189_v36 }
 0x162   :  { %v185_v37 = vpop.xlane.xlu0 %184 }
 0x163   :  { %v193_v38 = vmul.f32 0.0025510204, %v185_v37 }
 0x165   :  { %v195_v39 = vsub.f32 %v366_v15, %v193_v38  ;;  %v196_v40 = vsub.f32 %v373_v18, %v193_v38  ;;  %v197_v41 = vsub.f32 %v368_v16, %v193_v38  ;;  %v198_v42 = vsub.f32 %v397_v28, %v193_v38 }
 0x166   :  { %v191_v43 = vpop.xlane.xlu0 %190 }
 0x167   :  { %v194_v44 = vmul.f32 0.0025510204, %v191_v43  ;;  %v203_v45 = vmul.f32 %v195_v39, %v195_v39  ;;  %v204_v46 = vmul.f32 %v196_v40, %v196_v40  ;;  %v205_v47 = vmul.f32 %v197_v41, %v197_v41 }
 0x168   :  { %v206_v48 = vmul.f32 %v198_v42, %v198_v42 }
 0x169   :  { %v211_v49 = vadd.f32 %v204_v46, %v203_v45  ;;  %v199_v50 = vsub.f32 %v375_v21, %v194_v44  ;;  %v200_v51 = vsub.f32 %v386_v24, %v194_v44  ;;  %v201_v52 = vsub.f32 %v377_v22, %v194_v44 }
 0x16a   :  { %v202_v53 = vsub.f32 %v407_v33, %v194_v44  ;;  %v213_v57 = vsel %vm25_vm0, %v206_v48, 0.0 }
 0x16b   :  { %v212_v54 = vadd.f32 %v211_v49, %v205_v47  ;;  %v207_v55 = vmul.f32 %v199_v50, %v199_v50  ;;  %v208_v56 = vmul.f32 %v200_v51, %v200_v51  ;;  %v209_v60 = vmul.f32 %v201_v52, %v201_v52 }
 0x16c   :  { %v210_v58 = vmul.f32 %v202_v53, %v202_v53 }
 0x16d   :  { %v214_v59 = vadd.f32 %v213_v57, %v212_v54  ;;  %v217_v61 = vadd.f32 %v208_v56, %v207_v55 }
 0x16e   :  { %v219_v63 = vsel %vm25_vm0, %v210_v58, 0.0 }
 0x16f   :  { %215 = vadd.xlane.f32.xlu1 %v214_v59  ;;  %v218_v62 = vadd.f32 %v217_v61, %v209_v60 }
 0x171   :  { %v220_v0 = vadd.f32 %v219_v63, %v218_v62 }
 0x173   :  { %221 = vadd.xlane.f32.xlu1 %v220_v0 }
 0x1f8   :  { %v216_v1 = vpop.xlane.xlu1 %215 }
 0x1f9   :  { %v223_v2 = vmul.f32 0.0025510204, %v216_v1 }
 0x1fb   :  { %v227_v3 = vadd.f32 1e-05, %v223_v2 }
 0x1fc   :  { %v222_v4 = vpop.xlane.xlu1 %221 }
 0x1fd   :  { %303 = vrsqrt.f32 %v227_v3  ;;  %v224_v5 = vmul.f32 0.0025510204, %v222_v4 }
 0x1ff   :  { %v228_v6 = vadd.f32 1e-05, %v224_v5 }
 0x201   :  { %305 = vrsqrt.f32 %v228_v6 }
 0x20a   :  { %v304_v8 = vpop.eup %303 }
 0x20b   :  { %v231_v9 = vmul.f32 %v304_v8, %v225_v7 }
 0x20d   :  { %241 = vperm.xlu0 %301, %v231_v9   ;;  %v235_v13 = vmul.f32 %v231_v9, %v193_v38 }
 0x20e   :  { %v306_v11 = vpop.eup %305 }
 0x20f   :  { %v232_v12 = vmul.f32 %v306_v11, %v226_v10  ;;  %v237_v17 = vsub.f32 %v233_v14, %v235_v13 }
 0x211   :  { %246 = vperm.xlu1 %302, %v232_v12   ;;  %v236_v19 = vmul.f32 %v232_v12, %v194_v44 }
 0x213   :  { %v238_v23 = vsub.f32 %v234_v20, %v236_v19 }
 0x215   :  { %259 = vperm.xlu1 %302, %v237_v17  }
 0x219   :  { %264 = vperm.xlu1 %302, %v238_v23  }
 0x288   :  { %v242_v25 = vpop.permute.xlu0 %241 }
 0x289   :  { %v249_v27 = vmul.f32 %v242_v25, %v366_v15  ;;  %v250_v29 = vmul.f32 %v242_v25, %v373_v18  ;;  %v251_v30 = vmul.f32 %v242_v25, %v368_v16  ;;  %v252_v31 = vmul.f32 %v242_v25, %v397_v28 }
 0x28c   :  { %v247_v26 = vpop.permute.xlu1 %246 }
 0x28d   :  { %v253_v38 = vmul.f32 %v247_v26, %v375_v21  ;;  %v254_v39 = vmul.f32 %v247_v26, %v386_v24  ;;  %v255_v40 = vmul.f32 %v247_v26, %v377_v22  ;;  %v256_v41 = vmul.f32 %v247_v26, %v407_v33 }
 0x290   :  { %v260_v32 = vpop.permute.xlu1 %259 }
 0x291   :  { %v267_v34 = vadd.f32 %v260_v32, %v249_v27  ;;  %v268_v35 = vadd.f32 %v260_v32, %v250_v29  ;;  %v269_v36 = vadd.f32 %v260_v32, %v251_v30  ;;  %v270_v37 = vadd.f32 %v260_v32, %v252_v31 }
 0x293   :  { %v275_v15 = vmax.f32 %v267_v34, 0.0  ;;  %v276_v42 = vmax.f32 %v268_v35, 0.0  ;;  %v277_v18 = vmax.f32 %v269_v36, 0.0  ;;  %v278_v43 = vmax.f32 %v270_v37, 0.0 }
 0x294   :  { %v265_v16 = vpop.permute.xlu1 %264 }
 0x295   :  { %283 = vst [vmem:[%s470_s4] sm:$0xff] %v275_v15  ;;  %284 = vst [vmem:[%s470_s4 + $0x8] sm:$0xff] %v276_v42  ;;  %v271_v21 = vadd.f32 %v265_v16, %v253_v38  ;;  %v272_v22 = vadd.f32 %v265_v16, %v254_v39  ;;  %v273_v24 = vadd.f32 %v265_v16, %v255_v40 }
 0x296   :  { %285 = vst [vmem:[%s470_s4 + $0x10] sm:$0xff] %v277_v18  ;;  %286 = vst.msk [vmem:[%s470_s4 + $0x18] sm:$0xff] %vm25_vm0, %v278_v43  ;;  %v274_v28 = vadd.f32 %v265_v16, %v256_v41 }
 0x297   :  { %v279_v33 = vmax.f32 %v271_v21, 0.0  ;;  %v280_v44 = vmax.f32 %v272_v22, 0.0  ;;  %v281_v45 = vmax.f32 %v273_v24, 0.0 }
 0x298   :  { %v282_v46 = vmax.f32 %v274_v28, 0.0 }
 0x299   :  { %287 = vst [vmem:[%s470_s4 + $0x20] sm:$0xff] %v279_v33  ;;  %288 = vst [vmem:[%s470_s4 + $0x28] sm:$0xff] %v280_v44 }
 0x29a   :  { %289 = vst [vmem:[%s470_s4 + $0x30] sm:$0xff] %v281_v45  ;;  %290 = vst.msk [vmem:[%s470_s4 + $0x38] sm:$0xff] %vm25_vm0, %v282_v46 }

// kernel: densenet_forward.15
= control target key start
LH: loop header
LB: loop body
LE: loop exit
PB: predicated region body
PF: predicated region fallthrough
CT: control target
= control target key end

     0   :  { %s691_s15 = smov 0   ;;  %s793_s0 = inlined_call_operand.vmem [shape: bf16[160,392], index: 0, kind: input, shape index: {}]   ;;  %s794_s1 = inlined_call_operand.vmem [shape: f32[2,4,80], index: 1, kind: input, shape index: {}]   ;;  %s795_s2 = inlined_call_operand.vmem [shape: f32[4,1], index: 2, kind: input, shape index: {}]   ;;  %s796_s3 = inlined_call_operand.vmem [shape: f32[4,1], index: 3, kind: input, shape index: {}]   ;;  %s797_s4 = inlined_call_operand.vmem [shape: f32[4,392], index: 4, kind: output, shape index: {}]  }
   0x1 LB: > { %s697_s16 = sadd.s32 4294967295, %s660_s15   ;;  %p575_p0 = scmp.ge.s32.totalorder %s660_s15, 1  ;;  %s660_s15 = sphi %s691_s15, %s14_s15  }
   0x2   : > { %p168_p1 = scmp.lt.s32.totalorder %s660_s15, 3 }
   0x4   : > { %p169_p2 = pnand %p575_p0, %p168_p1 }
   0x5   : > { %s194_s17 = smul.u32 (!%p169_p2), 10, %s697_s16  ;;  %p201_p3 = scmp.lt.s32.totalorder (!%p169_p2), %s697_s16, 1 }
   0x6   : > { %172 = sbr.rel (%p169_p2) target bundleno = 706 (0x2c2), region = 36  ;;  %p579_p5 = scmp.ne.s32.totalorder (!%p169_p2), %s697_s16, 0 }
   0x7   : > { %p195_p4 = scmp.lt.s32.totalorder (!%p169_p2), %s194_s17, 19 }
   0xb   : > { %s202_s18 = scalar_select %p201_p3, %s697_s16, 1 }
   0xc   : > { %s801_s17 = smov (!%p195_p4, %s194_s17), 19  ;;  %209 = sbr.rel (%p579_p5) target bundleno = 20 (0x14), region = 40 }
   0xd   : > { %s578_s19 = sshll.u32 %s202_s18, 2  ;;  %s605_s20 = sshll.u32 %s801_s17, 4 }
   0xe   : > { %s707_s23 = scalar_lea.vmem %s794_s1, %s578_s19  ;;  %s712_s26 = scalar_lea.vmem %s793_s0, %s605_s20 }
  0x11   : > { %vm211_vm0 = vcmask 1043456   ;;  %vm212_vm1 = vcmask 64516   ;;  %v662_v0 = vmov 0.0  }
  0x12   : > { %210 = vst [vmem:[%s797_s4] sm:$0xff] %v662_v0  ;;  %vm213_vm2 = vmor %vm212_vm1, %vm211_vm0 }
  0x13   : > { %214 = vst.msk [vmem:[%s797_s4 + $0x8] sm:$0xff] %vm213_vm2, %v662_v0 }
  0x14 PF: > { %v618_v1 = vld [vmem:[%s712_s26 + $0x84] ss:$16 sps:$4 sm:$0xff]   ;;  %v620_v2 = vld [vmem:[%s712_s26 + $0x8c] ss:$16 sps:$4 sm:$0xff]   ;;  %v663_v3 = vmov 0   ;;  %vm339_vm3 = vcmask 654336  }
  0x15   : > { %375 = vmatprep.mubr.bf16.mxu0 %v663_v3  ;;  %416 = vmatprep.mubr.bf16.mxu1 %v663_v3  ;;  %v622_v4 = vld [vmem:[%s712_s26 + $0x80] ss:$16 sps:$4 sm:$0xff]   ;;  %v623_v5 = vld [vmem:[%s712_s26 + $0x88] ss:$16 sps:$4 sm:$0xff]   ;;  %v624_v6 = vld [vmem:[%s712_s26 + $0x64] ss:$16 sps:$4 sm:$0xff]  }
  0x16   : > { %349 = vmatprep.subr.bf16.mxu0 %v618_v1  ;;  %390 = vmatprep.subr.bf16.mxu1 %v620_v2  ;;  %v626_v7 = vld [vmem:[%s712_s26 + $0x6c] ss:$16 sps:$4 sm:$0xff]   ;;  %v628_v8 = vld [vmem:[%s712_s26 + $0x60] ss:$16 sps:$4 sm:$0xff]   ;;  %v629_v9 = vld [vmem:[%s712_s26 + $0x68] ss:$16 sps:$4 sm:$0xff]  }
  0x17   : > { %350 = vmatpush1.bf16.msra.mxu0 %v622_v4  ;;  %391 = vmatpush1.bf16.msra.mxu1 %v623_v5  ;;  %v630_v10 = vld [vmem:[%s712_s26 + $0x44] ss:$16 sps:$4 sm:$0xff]   ;;  %v632_v11 = vld [vmem:[%s712_s26 + $0x4c] ss:$16 sps:$4 sm:$0xff]   ;;  %v634_v12 = vld [vmem:[%s712_s26 + $0x40] ss:$16 sps:$4 sm:$0xff]  }
  0x18   : > { %351 = vmatprep.subr.bf16.mxu0 %v624_v6  ;;  %392 = vmatprep.subr.bf16.mxu1 %v626_v7  ;;  %v635_v13 = vld [vmem:[%s712_s26 + $0x48] ss:$16 sps:$4 sm:$0xff]   ;;  %v636_v14 = vld [vmem:[%s712_s26 + $0x24] ss:$16 sps:$4 sm:$0xff]   ;;  %v638_v15 = vld [vmem:[%s712_s26 + $0x2c] ss:$16 sps:$4 sm:$0xff]  }
  0x19   : > { %v640_v16 = vld [vmem:[%s712_s26 + $0x20] ss:$16 sps:$4 sm:$0xff]   ;;  %v641_v17 = vld [vmem:[%s712_s26 + $0x28] ss:$16 sps:$4 sm:$0xff]   ;;  %v642_v18 = vld [vmem:[%s712_s26 + $0x4] ss:$16 sps:$4 sm:$0xff]  }
  0x1a   : > { %v644_v19 = vld [vmem:[%s712_s26 + $0xc] ss:$16 sps:$4 sm:$0xff]   ;;  %v646_v20 = vld [vmem:[%s712_s26] ss:$16 sps:$4 sm:$0xff]   ;;  %v647_v21 = vld [vmem:[%s712_s26 + $0x8] ss:$16 sps:$4 sm:$0xff]  }
  0x1b   : > { %352 = vmatpush1.bf16.msra.mxu0 %v628_v8  ;;  %393 = vmatpush1.bf16.msra.mxu1 %v629_v9  ;;  %v215_v22 = vld [vmem:[%s707_s23] sm:$0xf]  ;;  %vm436_vm4 = vcmask 1043456   ;;  %vm437_vm5 = vcmask 64516   ;;  %v238_v28 = vld [vmem:[%s797_s4 + $0x8] sm:$0xff]  ;;  %p602_p6 = scmp.ne.s32.totalorder %s697_s16, 1 }
  0x1c   : > { %353 = vmatprep.subr.bf16.mxu0 %v630_v10  ;;  %394 = vmatprep.subr.bf16.mxu1 %v632_v11  ;;  %v216_v23 = vpack.c.bf16 %v215_v22, %v215_v22  ;;  %v237_v26 = vld [vmem:[%s797_s4] sm:$0xff]  ;;  %vm749_vm6 = vmor %vm437_vm5, %vm436_vm4 }
  0x1f   : > { %354 = vmatpush1.bf16.msra.mxu0 %v634_v12  ;;  %395 = vmatpush1.bf16.msra.mxu1 %v635_v13 }
  0x20   : > { %355 = vmatprep.subr.bf16.mxu0 %v636_v14  ;;  %396 = vmatprep.subr.bf16.mxu1 %v638_v15 }
  0x23   : > { %356 = vmatpush1.bf16.msra.mxu0 %v640_v16  ;;  %397 = vmatpush1.bf16.msra.mxu1 %v641_v17 }
  0x24   : > { %357 = vmatprep.subr.bf16.mxu0 %v642_v18  ;;  %398 = vmatprep.subr.bf16.mxu1 %v644_v19 }
  0x27   : > { %358 = vmatpush1.bf16.msra.mxu0 %v646_v20  ;;  %399 = vmatpush1.bf16.msra.mxu1 %v647_v21 }
  0x2a   : > { %600 = vmatmul.mubr.msk.bf16.vlgmr.msra.gmra.mxu0 %vm339_vm3, %v216_v23  ;;  %601 = vmatmul.mubr.msk.bf16.vlgmr.msra.gmra.mxu1 %vm339_vm3, %v216_v23 }
  0xea   : > { %v377_v24 = vpop.f32.mrf.mxu0  ;;  %v418_v25 = vpop.f32.mrf.mxu1 }
  0xec   : > { %v379_v27 = vpop.f32.mrf.mxu0  ;;  %v420_v29 = vpop.f32.mrf.mxu1 }
  0xed   : > { %v429_v30 = vcombine.low %v377_v24, %v379_v27  ;;  %v430_v31 = vcombine.low %v418_v25, %v420_v29  ;;  %443 = sbr.rel (%p602_p6) target bundleno = 706 (0x2c2), region = 44 }
  0xee   : > { %v381_v33 = vpop.f32.mrf.mxu0  ;;  %v422_v34 = vpop.f32.mrf.mxu1 }
  0xef   : > { %v433_v35 = vadd.f32 %v429_v30, %v237_v26  ;;  %v434_v36 = vadd.f32 %v430_v31, %v238_v28 }
  0xf0   : > { %v382_v37 = vpop.f32.mrf.mxu0  ;;  %v423_v38 = vpop.f32.mrf.mxu1 }
  0xf1   : > { %435 = vst [vmem:[%s797_s4] sm:$0xff] %v433_v35  ;;  %439 = vst.msk [vmem:[%s797_s4 + $0x8] sm:$0xff] %vm749_vm6, %v434_v36 }
  0xf2   : > { %vm457_vm7 = vcmask 60416   ;;  %v664_v50 = vmov 839922192   ;;  %v468_v52 = vlaneseq  ;;  %v665_v8 = vmov 0   ;;  %v493_v12 = vld [vmem:[%s795_s2] sm:$0xf] }
  0xf3   : > { %v466_v51 = vunpack.c.l.s4 %v664_v50  ;;  %648 = vset.pattern.permute.xlu1 %v665_v8  ;;  %649 = vset.pattern.permute.xlu0 %v665_v8  ;;  %v497_v15 = vld [vmem:[%s796_s3] sm:$0xf] }
  0xf4   : > { %v469_v54 = vshrl.u32 %v468_v52, 7 }
  0xf5   : > { %v467_v53 = vunpack.c.0.s8 %v466_v51 }
  0xf7   : > { %v470_v55 = vsub.s32 %v467_v53, %v469_v54 }
  0xf8   : > { %v444_v39 = vld [vmem:[%s797_s4] sm:$0xff]  ;;  %v445_v40 = vld [vmem:[%s797_s4 + $0x8] sm:$0xff] }
  0xf9   : > { %v448_v41 = vcombine.high %v444_v39, %v444_v39  ;;  %v449_v42 = vcombine.high %v445_v40, %v445_v40  ;;  %v452_v43 = vsel %vm436_vm4, %v444_v39, 0.0  ;;  %v455_v45 = vsel %vm436_vm4, %v445_v40, 0.0 }
  0xfb   : > { %v453_v44 = vsel %vm436_vm4, %v448_v41, 0.0  ;;  %v458_v47 = vsel %vm457_vm7, %v449_v42, 0.0 }
  0xfc   : > { %v454_v46 = vadd.f32 %v453_v44, %v452_v43 }
  0xfe   : > { %v456_v48 = vadd.f32 %v455_v45, %v454_v46 }
 0x100   : > { %v459_v49 = vadd.f32 %v458_v47, %v456_v48 }
 0x102   : > { %460 = vadd.xlane.f32.xlu0 %v459_v49 }
 0x18b   : > { %v461_v56 = vpop.xlane.xlu0 %460 }
 0x18c   : > { %v463_v57 = vmul.f32 0.0025510204, %v461_v56 }
 0x18e   : > { %v471_v58 = vrot.slane %v463_v57, %v470_v55 }
 0x190   : > { %v473_v59 = vsub.f32 %v444_v39, %v471_v58  ;;  %v474_v60 = vsub.f32 %v445_v40, %v471_v58 }
 0x192   : > { %v475_v61 = vmul.f32 %v473_v59, %v473_v59  ;;  %v476_v62 = vmul.f32 %v474_v60, %v474_v60 }
 0x194   : > { %v479_v63 = vcombine.high %v475_v61, %v475_v61  ;;  %v480_v0 = vcombine.high %v476_v62, %v476_v62  ;;  %v483_v1 = vsel %vm436_vm4, %v475_v61, 0.0  ;;  %v486_v4 = vsel %vm436_vm4, %v476_v62, 0.0 }
 0x196   : > { %v484_v2 = vsel %vm436_vm4, %v479_v63, 0.0  ;;  %v488_v6 = vsel %vm457_vm7, %v480_v0, 0.0 }
 0x197   : > { %v485_v3 = vadd.f32 %v484_v2, %v483_v1 }
 0x199   : > { %v487_v5 = vadd.f32 %v486_v4, %v485_v3 }
 0x19b   : > { %v489_v7 = vadd.f32 %v488_v6, %v487_v5 }
 0x19d   : > { %490 = vadd.xlane.f32.xlu0 %v489_v7 }
 0x226   : > { %v491_v9 = vpop.xlane.xlu0 %490 }
 0x227   : > { %v492_v10 = vmul.f32 0.0025510204, %v491_v9 }
 0x229   : > { %v494_v11 = vadd.f32 1e-05, %v492_v10 }
 0x22b   : > { %652 = vrsqrt.f32 %v494_v11 }
 0x238   : > { %v653_v13 = vpop.eup %652 }
 0x239   : > { %v496_v14 = vmul.f32 %v653_v13, %v493_v12 }
 0x23b   : > { %502 = vperm.xlu1 %648, %v496_v14   ;;  %v498_v16 = vmul.f32 %v496_v14, %v463_v57 }
 0x23d   : > { %v499_v17 = vsub.f32 %v497_v15, %v498_v16 }
 0x23f   : > { %516 = vperm.xlu1 %648, %v499_v17  }
 0x2b6   : > { %v503_v18 = vpop.permute.xlu1 %502 }
 0x2b7   : > { %v510_v19 = vrot.slane %v503_v18, %v470_v55 }
 0x2b9   : > { %v512_v21 = vmul.f32 %v510_v19, %v444_v39  ;;  %v513_v22 = vmul.f32 %v510_v19, %v445_v40 }
 0x2ba   : > { %v517_v20 = vpop.permute.xlu1 %516 }
 0x2bb   : > { %v524_v23 = vrot.slane %v517_v20, %v470_v55 }
 0x2bd   : > { %v526_v24 = vadd.f32 %v524_v23, %v512_v21  ;;  %v527_v25 = vadd.f32 %v524_v23, %v513_v22 }
 0x2bf   : > { %v528_v26 = vmax.f32 %v526_v24, 0.0  ;;  %v529_v27 = vmax.f32 %v527_v25, 0.0 }
 0x2c1   : > { %530 = vst [vmem:[%s797_s4] sm:$0xff] %v528_v26  ;;  %531 = vst.msk [vmem:[%s797_s4 + $0x8] sm:$0xff] %vm749_vm6, %v529_v27 }
 0x2c2 PF: > { %s14_s15 = sadd.s32 1, %s660_s15  }
 0x2c3   : > { %p11_p7 = scmp.ge.s32.totalorder %s14_s15, 4  }
 0x2c5   :  { %13 = sbr.rel (!%p11_p7) target bundleno = 1 (0x1), region = 73 }

// kernel: densenet_forward.16
= control target key start
LH: loop header
LB: loop body
LE: loop exit
PB: predicated region body
PF: predicated region fallthrough
CT: control target
= control target key end

     0   :  { %vm58_vm0 = vcmask 1045504   ;;  %v312_v3 = vmov 0   ;;  %vm54_vm1 = vcmask 97280   ;;  %vm25_vm2 = vcmask 64512   ;;  %s483_s0 = inlined_call_operand.vmem [shape: f32[12,392], index: 0, kind: input, shape index: {}]   ;;  %s484_s1 = inlined_call_operand.vmem [shape: f32[1,16,12], index: 1, kind: input, shape index: {}]   ;;  %s485_s4 = inlined_call_operand.vmem [shape: f32[16,392], index: 4, kind: output, shape index: {}]   ;;  %s486_s2 = inlined_call_operand.vmem [shape: f32[16,1], index: 2, kind: input, shape index: {}]   ;;  %s487_s3 = inlined_call_operand.vmem [shape: f32[16,1], index: 3, kind: input, shape index: {}]  }
   0x1   :  { %v35_v0 = vld [vmem:[%s483_s0 + $0x8] sm:$0xff]  ;;  %v37_v2 = vld [vmem:[%s483_s0 + $0x18] sm:$0xff]  ;;  %103 = vmatprep.mubr.bf16.mxu0 %v312_v3  ;;  %146 = vmatprep.mubr.bf16.mxu1 %v312_v3  ;;  %v34_v6 = vld [vmem:[%s483_s0] sm:$0xff]  ;;  %v313_v18 = vmov 0.0  }
   0x2   :  { %v39_v1 = vld [vmem:[%s483_s0 + $0x28] sm:$0xf]  ;;  %v41_v5 = vld [vmem:[%s483_s0 + $0x38] sm:$0xf]  ;;  %v38_v7 = vld [vmem:[%s483_s0 + $0x20] sm:$0xf]  ;;  %306 = vset.pattern.permute.xlu0 %v312_v3  ;;  %307 = vset.pattern.permute.xlu1 %v312_v3 }
   0x3   :  { %v43_v4 = vpack.c.bf16 %v39_v1, %v35_v0  ;;  %v45_v8 = vpack.c.bf16 %v41_v5, %v37_v2  ;;  %v42_v9 = vpack.c.bf16 %v38_v7, %v34_v6  ;;  %v36_v10 = vld [vmem:[%s483_s0 + $0x10] sm:$0xff]  ;;  %v31_v12 = vld [vmem:[%s484_s1] sm:$0xff]  ;;  %v32_v14 = vld [vmem:[%s484_s1 + $0x8] sm:$0xff]  ;;  %26 = vst.msk [vmem:[%s485_s4 + $0x18] sm:$0xff] %vm25_vm2, %v313_v18 }
   0x4   :  { %v40_v11 = vld [vmem:[%s483_s0 + $0x30] sm:$0xf]  ;;  %v33_v16 = vpack.c.bf16 %v32_v14, %v31_v12  ;;  %30 = vst.msk [vmem:[%s485_s4 + $0x38] sm:$0xff] %vm25_vm2, %v313_v18  ;;  %v231_v14 = vld [vmem:[%s486_s2 + $0x8] sm:$0xff]  ;;  %v238_v18 = vld [vmem:[%s487_s3] sm:$0xff] }
   0x5   :  { %300 = vmatprep.subr.msk.bf16.mxu0 %vm58_vm0, %v43_v4  ;;  %v44_v13 = vpack.c.bf16 %v40_v11, %v36_v10  ;;  %302 = vmatprep.subr.msk.bf16.mxu1 %vm58_vm0, %v45_v8  ;;  %v60_v15 = vsel %vm58_vm0, %v42_v9, 0  ;;  %v230_v11 = vld [vmem:[%s486_s2] sm:$0xff] }
   0x6   :  { %86 = vmatpush1.bf16.msra.mxu0 %v60_v15 }
   0x7   :  { %v66_v17 = vsel %vm58_vm0, %v44_v13, 0 }
   0x8   :  { %129 = vmatpush1.bf16.msra.mxu1 %v66_v17 }
   0x9   :  { %301 = vmatmul.mubr.msk.bf16.vlgmr.msra.gmra.mxu0 %vm54_vm1, %v33_v16 }
   0xa   :  { %v49_v21 = vld [vmem:[%s485_s4 + $0x18] sm:$0xff] }
   0xb   :  { %303 = vmatmul.mubr.msk.bf16.vlgmr.msra.gmra.mxu1 %vm54_vm1, %v33_v16  ;;  %v53_v27 = vld [vmem:[%s485_s4 + $0x38] sm:$0xff] }
  0xc9   :  { %v381_v19 = vpop.f32.mrf.mxu0 }
  0xcb   :  { %v383_v20 = vpop.f32.mrf.mxu1  ;;  %v388_v22 = vpop.f32.mrf.mxu0 }
  0xcc   :  { %v185_v31 = vadd.f32 %v388_v22, %v381_v19 }
  0xcd   :  { %v150_v23 = vpop.f32.mrf.mxu1  ;;  %v390_v25 = vpop.f32.mrf.mxu0 }
  0xce   :  { %v160_v24 = vadd.f32 %v150_v23, %v49_v21  ;;  %v186_v33 = vadd.f32 %v185_v31, %v383_v20 }
  0xcf   :  { %v392_v26 = vpop.f32.mrf.mxu1  ;;  %v401_v28 = vpop.f32.mrf.mxu0 }
  0xd0   :  { %169 = vst.msk [vmem:[%s485_s4 + $0x18] sm:$0xff] %vm25_vm2, %v160_v24  ;;  %v191_v34 = vadd.f32 %v401_v28, %v390_v25  ;;  %v239_v24 = vld [vmem:[%s487_s3 + $0x8] sm:$0xff] }
  0xd1   :  { %v154_v29 = vpop.f32.mrf.mxu1 }
  0xd2   :  { %v164_v30 = vadd.f32 %v154_v29, %v53_v27  ;;  %v192_v38 = vadd.f32 %v191_v34, %v392_v26 }
  0xd4   :  { %173 = vst.msk [vmem:[%s485_s4 + $0x38] sm:$0xff] %vm25_vm2, %v164_v30 }
  0xd7   :  { %v412_v32 = vld [vmem:[%s485_s4 + $0x18] sm:$0xff] }
  0xd8   :  { %v187_v35 = vsel %vm25_vm2, %v412_v32, 0.0 }
  0xd9   :  { %v188_v36 = vadd.f32 %v187_v35, %v186_v33 }
  0xdb   :  { %189 = vadd.xlane.f32.xlu0 %v188_v36  ;;  %v422_v37 = vld [vmem:[%s485_s4 + $0x38] sm:$0xff] }
  0xdc   :  { %v193_v39 = vsel %vm25_vm2, %v422_v37, 0.0 }
  0xdd   :  { %v194_v40 = vadd.f32 %v193_v39, %v192_v38 }
  0xdf   :  { %195 = vadd.xlane.f32.xlu0 %v194_v40 }
 0x164   :  { %v190_v41 = vpop.xlane.xlu0 %189 }
 0x165   :  { %v198_v42 = vmul.f32 0.0025510204, %v190_v41 }
 0x167   :  { %v200_v43 = vsub.f32 %v381_v19, %v198_v42  ;;  %v201_v44 = vsub.f32 %v388_v22, %v198_v42  ;;  %v202_v45 = vsub.f32 %v383_v20, %v198_v42  ;;  %v203_v46 = vsub.f32 %v412_v32, %v198_v42 }
 0x168   :  { %v196_v47 = vpop.xlane.xlu0 %195 }
 0x169   :  { %v199_v48 = vmul.f32 0.0025510204, %v196_v47  ;;  %v208_v49 = vmul.f32 %v200_v43, %v200_v43  ;;  %v209_v50 = vmul.f32 %v201_v44, %v201_v44  ;;  %v210_v51 = vmul.f32 %v202_v45, %v202_v45 }
 0x16a   :  { %v211_v52 = vmul.f32 %v203_v46, %v203_v46 }
 0x16b   :  { %v216_v53 = vadd.f32 %v209_v50, %v208_v49  ;;  %v204_v54 = vsub.f32 %v390_v25, %v199_v48  ;;  %v205_v55 = vsub.f32 %v401_v28, %v199_v48  ;;  %v206_v56 = vsub.f32 %v392_v26, %v199_v48 }
 0x16c   :  { %v207_v57 = vsub.f32 %v422_v37, %v199_v48  ;;  %v218_v61 = vsel %vm25_vm2, %v211_v52, 0.0 }
 0x16d   :  { %v217_v58 = vadd.f32 %v216_v53, %v210_v51  ;;  %v212_v59 = vmul.f32 %v204_v54, %v204_v54  ;;  %v213_v60 = vmul.f32 %v205_v55, %v205_v55  ;;  %v214_v0 = vmul.f32 %v206_v56, %v206_v56 }
 0x16e   :  { %v215_v62 = vmul.f32 %v207_v57, %v207_v57 }
 0x16f   :  { %v219_v63 = vadd.f32 %v218_v61, %v217_v58  ;;  %v222_v1 = vadd.f32 %v213_v60, %v212_v59 }
 0x170   :  { %v224_v3 = vsel %vm25_vm2, %v215_v62, 0.0 }
 0x171   :  { %220 = vadd.xlane.f32.xlu1 %v219_v63  ;;  %v223_v2 = vadd.f32 %v222_v1, %v214_v0 }
 0x173   :  { %v225_v4 = vadd.f32 %v224_v3, %v223_v2 }
 0x175   :  { %226 = vadd.xlane.f32.xlu1 %v225_v4 }
 0x1fa   :  { %v221_v5 = vpop.xlane.xlu1 %220 }
 0x1fb   :  { %v228_v6 = vmul.f32 0.0025510204, %v221_v5 }
 0x1fd   :  { %v232_v7 = vadd.f32 1e-05, %v228_v6 }
 0x1fe   :  { %v227_v8 = vpop.xlane.xlu1 %226 }
 0x1ff   :  { %308 = vrsqrt.f32 %v232_v7  ;;  %v229_v9 = vmul.f32 0.0025510204, %v227_v8 }
 0x201   :  { %v233_v10 = vadd.f32 1e-05, %v229_v9 }
 0x203   :  { %310 = vrsqrt.f32 %v233_v10 }
 0x20c   :  { %v309_v12 = vpop.eup %308 }
 0x20d   :  { %v236_v13 = vmul.f32 %v309_v12, %v230_v11 }
 0x20f   :  { %246 = vperm.xlu0 %306, %v236_v13   ;;  %v240_v17 = vmul.f32 %v236_v13, %v198_v42 }
 0x210   :  { %v311_v15 = vpop.eup %310 }
 0x211   :  { %v237_v16 = vmul.f32 %v311_v15, %v231_v14  ;;  %v242_v21 = vsub.f32 %v238_v18, %v240_v17 }
 0x213   :  { %251 = vperm.xlu1 %307, %v237_v16   ;;  %v241_v23 = vmul.f32 %v237_v16, %v199_v48 }
 0x215   :  { %v243_v27 = vsub.f32 %v239_v24, %v241_v23 }
 0x217   :  { %264 = vperm.xlu1 %307, %v242_v21  }
 0x21b   :  { %269 = vperm.xlu1 %307, %v243_v27  }
 0x28a   :  { %v247_v29 = vpop.permute.xlu0 %246 }
 0x28b   :  { %v254_v31 = vmul.f32 %v247_v29, %v381_v19  ;;  %v255_v33 = vmul.f32 %v247_v29, %v388_v22  ;;  %v256_v34 = vmul.f32 %v247_v29, %v383_v20  ;;  %v257_v35 = vmul.f32 %v247_v29, %v412_v32 }
 0x28e   :  { %v252_v30 = vpop.permute.xlu1 %251 }
 0x28f   :  { %v258_v42 = vmul.f32 %v252_v30, %v390_v25  ;;  %v259_v43 = vmul.f32 %v252_v30, %v401_v28  ;;  %v260_v44 = vmul.f32 %v252_v30, %v392_v26  ;;  %v261_v45 = vmul.f32 %v252_v30, %v422_v37 }
 0x292   :  { %v265_v36 = vpop.permute.xlu1 %264 }
 0x293   :  { %v272_v38 = vadd.f32 %v265_v36, %v254_v31  ;;  %v273_v39 = vadd.f32 %v265_v36, %v255_v33  ;;  %v274_v40 = vadd.f32 %v265_v36, %v256_v34  ;;  %v275_v41 = vadd.f32 %v265_v36, %v257_v35 }
 0x295   :  { %v280_v19 = vmax.f32 %v272_v38, 0.0  ;;  %v281_v46 = vmax.f32 %v273_v39, 0.0  ;;  %v282_v22 = vmax.f32 %v274_v40, 0.0  ;;  %v283_v47 = vmax.f32 %v275_v41, 0.0 }
 0x296   :  { %v270_v20 = vpop.permute.xlu1 %269 }
 0x297   :  { %288 = vst [vmem:[%s485_s4] sm:$0xff] %v280_v19  ;;  %289 = vst [vmem:[%s485_s4 + $0x8] sm:$0xff] %v281_v46  ;;  %v276_v25 = vadd.f32 %v270_v20, %v258_v42  ;;  %v277_v26 = vadd.f32 %v270_v20, %v259_v43  ;;  %v278_v28 = vadd.f32 %v270_v20, %v260_v44 }
 0x298   :  { %290 = vst [vmem:[%s485_s4 + $0x10] sm:$0xff] %v282_v22  ;;  %291 = vst.msk [vmem:[%s485_s4 + $0x18] sm:$0xff] %vm25_vm2, %v283_v47  ;;  %v279_v32 = vadd.f32 %v270_v20, %v261_v45 }
 0x299   :  { %v284_v37 = vmax.f32 %v276_v25, 0.0  ;;  %v285_v48 = vmax.f32 %v277_v26, 0.0  ;;  %v286_v49 = vmax.f32 %v278_v28, 0.0 }
 0x29a   :  { %v287_v50 = vmax.f32 %v279_v32, 0.0 }
 0x29b   :  { %292 = vst [vmem:[%s485_s4 + $0x20] sm:$0xff] %v284_v37  ;;  %293 = vst [vmem:[%s485_s4 + $0x28] sm:$0xff] %v285_v48 }
 0x29c   :  { %294 = vst [vmem:[%s485_s4 + $0x30] sm:$0xff] %v286_v49  ;;  %295 = vst.msk [vmem:[%s485_s4 + $0x38] sm:$0xff] %vm25_vm2, %v287_v50 }

// kernel: densenet_forward.18
= control target key start
LH: loop header
LB: loop body
LE: loop exit
PB: predicated region body
PF: predicated region fallthrough
CT: control target
= control target key end

     0   :  { %v327_v0 = vmov 0.0   ;;  %vm328_vm0 = vmmov 0   ;;  %vm32_vm1 = vcmask 130048   ;;  %vm205_vm2 = vcmask 801792   ;;  %s434_s0 = inlined_call_operand.vmem [shape: f32[16,98], index: 0, kind: input, shape index: {}]   ;;  %s435_s1 = inlined_call_operand.vmem [shape: f32[16,98], index: 1, kind: input, shape index: {}]   ;;  %s436_s4 = inlined_call_operand.vmem [shape: f32[8,16], index: 4, kind: input, shape index: {}]   ;;  %s437_s2 = inlined_call_operand.vmem [shape: f32[16,98], index: 2, kind: input, shape index: {}]   ;;  %s438_s3 = inlined_call_operand.vmem [shape: f32[16,98], index: 3, kind: input, shape index: {}]   ;;  %s439_s5 = inlined_call_operand.vmem [shape: f32[8,1], index: 5, kind: input, shape index: {}]   ;;  %s440_s6 = inlined_call_operand.vmem [shape: f32[8,1], index: 6, kind: input, shape index: {}]   ;;  %s441_s7 = inlined_call_operand.vmem [shape: f32[8,98], index: 7, kind: output, shape index: {}]  }
   0x1   :  { %296 = vmatprep.subr.bf16.mxu0 %v327_v0  ;;  %302 = vmatprep.subr.bf16.mxu1 %v327_v0  ;;  %v29_v1 = vld [vmem:[%s434_s0] sm:$0xff]  ;;  %v30_v2 = vld [vmem:[%s434_s0 + $0x8] sm:$0xff]  ;;  %v329_v55 = vmov 0  }
   0x2   :  { %v76_v3 = vld [vmem:[%s435_s1] sm:$0xff]  ;;  %v31_v4 = vpack.c.bf16 %v30_v2, %v29_v1  ;;  %v77_v5 = vld [vmem:[%s435_s1 + $0x8] sm:$0xff]  ;;  %298 = vmatprep.mubr.msk.bf16.mxu0 %vm328_vm0, %v327_v0  ;;  %304 = vmatprep.mubr.msk.bf16.mxu1 %vm328_vm0, %v327_v0 }
   0x3   :  { %v27_v6 = vld [vmem:[%s436_s4] sm:$0xff]  ;;  %v78_v8 = vpack.c.bf16 %v77_v5, %v76_v3  ;;  %v120_v10 = vld [vmem:[%s437_s2 + $0x8] sm:$0xff]  ;;  %323 = vset.pattern.permute.xlu0 %v329_v55  ;;  %324 = vset.pattern.permute.xlu1 %v329_v55 }
   0x4   :  { %v119_v7 = vld [vmem:[%s437_s2] sm:$0xff]  ;;  %v28_v9 = vpack.c.bf16 %v27_v6, %v27_v6  ;;  %v163_v12 = vld [vmem:[%s438_s3 + $0x8] sm:$0xff]  ;;  %297 = vmatpush3.bf16.msra.mxu0 %v31_v4 }
   0x5   :  { %v162_v11 = vld [vmem:[%s438_s3] sm:$0xff]  ;;  %v121_v13 = vpack.c.bf16 %v120_v10, %v119_v7  ;;  %303 = vmatpush3.bf16.msra.mxu1 %v78_v8  ;;  %308 = vmatprep.subr.bf16.mxu0 %v327_v0 }
   0x6   :  { %v164_v14 = vpack.c.bf16 %v163_v12, %v162_v11  ;;  %314 = vmatprep.subr.bf16.mxu1 %v327_v0  ;;  %v246_v1 = vld [vmem:[%s439_s5] sm:$0xff] }
   0x7   :  { %299 = vmatmul.mubr.msk.bf16.vlgmr.msra.gmra.mxu0 %vm32_vm1, %v28_v9  ;;  %v250_v4 = vld [vmem:[%s440_s6] sm:$0xff] }
   0x8   :  { %305 = vmatmul.mubr.msk.bf16.vlgmr.msra.gmra.mxu1 %vm32_vm1, %v28_v9  ;;  %309 = vmatpush3.bf16.msra.mxu0 %v121_v13 }
   0x9   :  { %315 = vmatpush3.bf16.msra.mxu1 %v164_v14  ;;  %310 = vmatprep.mubr.msk.bf16.mxu0 %vm328_vm0, %v327_v0 }
   0xa   :  { %316 = vmatprep.mubr.msk.bf16.mxu1 %vm328_vm0, %v327_v0 }
   0xf   :  { %311 = vmatmul.mubr.msk.bf16.vlgmr.msra.gmra.mxu0 %vm32_vm1, %v28_v9 }
  0x10   :  { %317 = vmatmul.mubr.msk.bf16.vlgmr.msra.gmra.mxu1 %vm32_vm1, %v28_v9 }
  0xc7   :  { %v401_v15 = vpop.f32.mrf.mxu0 }
  0xc8   :  { %v403_v16 = vpop.f32.mrf.mxu1  ;;  %v206_v17 = vsel %vm205_vm2, %v401_v15, 0.0 }
  0xc9   :  { %207 = vadd.xlane.f32.xlu0 %v206_v17  ;;  %v300_v18 = vpop.f32.mrf.mxu0  ;;  %v209_v20 = vsel %vm205_vm2, %v403_v16, 0.0 }
  0xca   :  { %v306_v19 = vpop.f32.mrf.mxu1 }
  0xcb   :  { %v73_v21 = vpop.f32.mrf.mxu0 }
  0xcc   :  { %v116_v22 = vpop.f32.mrf.mxu1 }
  0xcd   :  { %210 = vadd.xlane.f32.xlu0 %v209_v20  ;;  %v301_v23 = vpop.f32.mrf.mxu0 }
  0xce   :  { %v307_v24 = vpop.f32.mrf.mxu1 }
  0xcf   :  { %v156_v25 = vpop.f32.mrf.mxu0 }
  0xd0   :  { %v409_v26 = vpop.f32.mrf.mxu1  ;;  %v213_v27 = vsel %vm205_vm2, %v156_v25, 0.0 }
  0xd1   :  { %214 = vadd.xlane.f32.xlu1 %v213_v27  ;;  %v312_v28 = vpop.f32.mrf.mxu0  ;;  %v217_v30 = vsel %vm205_vm2, %v409_v26, 0.0 }
  0xd2   :  { %v318_v29 = vpop.f32.mrf.mxu1 }
  0xd3   :  { %v159_v31 = vpop.f32.mrf.mxu0 }
  0xd4   :  { %v202_v32 = vpop.f32.mrf.mxu1 }
  0xd5   :  { %218 = vadd.xlane.f32.xlu1 %v217_v30  ;;  %v313_v33 = vpop.f32.mrf.mxu0 }
  0xd6   :  { %v319_v34 = vpop.f32.mrf.mxu1 }
 0x152   :  { %v208_v35 = vpop.xlane.xlu0 %207 }
 0x156   :  { %v211_v36 = vpop.xlane.xlu0 %210 }
 0x157   :  { %v212_v38 = vadd.f32 %v211_v36, %v208_v35 }
 0x15a   :  { %v215_v37 = vpop.xlane.xlu1 %214 }
 0x15b   :  { %v216_v39 = vadd.f32 %v215_v37, %v212_v38 }
 0x15e   :  { %v219_v40 = vpop.xlane.xlu1 %218 }
 0x15f   :  { %v220_v41 = vadd.f32 %v219_v40, %v216_v39 }
 0x161   :  { %v221_v42 = vmul.f32 0.0025510204, %v220_v41 }
 0x163   :  { %v227_v43 = vsub.f32 %v403_v16, %v221_v42  ;;  %v222_v44 = vsub.f32 %v401_v15, %v221_v42  ;;  %v239_v45 = vsub.f32 %v409_v26, %v221_v42  ;;  %v233_v46 = vsub.f32 %v156_v25, %v221_v42 }
 0x165   :  { %v228_v47 = vmul.f32 %v227_v43, %v227_v43  ;;  %v223_v48 = vmul.f32 %v222_v44, %v222_v44  ;;  %v240_v51 = vmul.f32 %v239_v45, %v239_v45  ;;  %v234_v52 = vmul.f32 %v233_v46, %v233_v46 }
 0x167   :  { %v229_v49 = vsel %vm205_vm2, %v228_v47, 0.0  ;;  %v224_v50 = vsel %vm205_vm2, %v223_v48, 0.0  ;;  %v241_v53 = vsel %vm205_vm2, %v240_v51, 0.0  ;;  %v235_v54 = vsel %vm205_vm2, %v234_v52, 0.0 }
 0x168   :  { %230 = vadd.xlane.f32.xlu1 %v229_v49  ;;  %225 = vadd.xlane.f32.xlu0 %v224_v50 }
 0x16c   :  { %242 = vadd.xlane.f32.xlu1 %v241_v53  ;;  %236 = vadd.xlane.f32.xlu0 %v235_v54 }
 0x1f1   :  { %v231_v56 = vpop.xlane.xlu1 %230  ;;  %v226_v57 = vpop.xlane.xlu0 %225 }
 0x1f2   :  { %v232_v58 = vadd.f32 %v231_v56, %v226_v57 }
 0x1f5   :  { %v237_v59 = vpop.xlane.xlu0 %236  ;;  %v243_v61 = vpop.xlane.xlu1 %242 }
 0x1f6   :  { %v238_v60 = vadd.f32 %v237_v59, %v232_v58 }
 0x1f8   :  { %v244_v62 = vadd.f32 %v243_v61, %v238_v60 }
 0x1fa   :  { %v245_v63 = vmul.f32 0.0025510204, %v244_v62 }
 0x1fc   :  { %v247_v0 = vadd.f32 1e-05, %v245_v63 }
 0x1fe   :  { %325 = vrsqrt.f32 %v247_v0 }
 0x20b   :  { %v326_v2 = vpop.eup %325 }
 0x20c   :  { %v249_v3 = vmul.f32 %v326_v2, %v246_v1 }
 0x20e   :  { %255 = vperm.xlu0 %323, %v249_v3   ;;  %v251_v5 = vmul.f32 %v249_v3, %v221_v42 }
 0x210   :  { %v252_v6 = vsub.f32 %v250_v4, %v251_v5 }
 0x212   :  { %261 = vperm.xlu1 %324, %v252_v6  }
 0x289   :  { %v256_v7 = vpop.permute.xlu0 %255 }
 0x28a   :  { %v258_v8 = vmul.f32 %v256_v7, %v401_v15  ;;  %v266_v9 = vmul.f32 %v256_v7, %v403_v16  ;;  %v270_v10 = vmul.f32 %v256_v7, %v156_v25  ;;  %v274_v12 = vmul.f32 %v256_v7, %v409_v26 }
 0x28d   :  { %v262_v11 = vpop.permute.xlu1 %261 }
 0x28e   :  { %v264_v13 = vadd.f32 %v262_v11, %v258_v8  ;;  %v267_v14 = vadd.f32 %v266_v9, %v262_v11  ;;  %v271_v17 = vadd.f32 %v270_v10, %v262_v11  ;;  %v275_v20 = vadd.f32 %v274_v12, %v262_v11 }
 0x290   :  { %v265_v18 = vmax.f32 %v264_v13, 0.0  ;;  %v268_v19 = vmax.f32 %v267_v14, 0.0  ;;  %v272_v22 = vmax.f32 %v271_v17, 0.0  ;;  %v276_v24 = vmax.f32 %v275_v20, 0.0 }
 0x292   :  { %v269_v21 = vadd.f32 %v268_v19, %v265_v18 }
 0x294   :  { %v273_v23 = vadd.f32 %v272_v22, %v269_v21 }
 0x296   :  { %v277_v27 = vadd.f32 %v276_v24, %v273_v23 }
 0x298   :  { %v278_v28 = vmul.f32 0.25, %v277_v27 }
 0x29a   :  { %279 = vst.msk [vmem:[%s441_s7] sm:$0xff] %vm205_vm2, %v278_v28 }

// kernel: densenet_forward.19
= control target key start
LH: loop header
LB: loop body
LE: loop exit
PB: predicated region body
PF: predicated region fallthrough
CT: control target
= control target key end

     0   :  { %vm22_vm0 = vcmask 801792   ;;  %v176_v0 = vmov 0.0   ;;  %vm36_vm1 = vcmask 1043456   ;;  %vm177_vm2 = vmmov 0   ;;  %s265_s4 = inlined_call_operand.vmem [shape: f32[16,98], index: 4, kind: output, shape index: {}]   ;;  %s266_s0 = inlined_call_operand.vmem [shape: f32[8,98], index: 0, kind: input, shape index: {}]   ;;  %s267_s1 = inlined_call_operand.vmem [shape: f32[1,16,8], index: 1, kind: input, shape index: {}]   ;;  %s268_s2 = inlined_call_operand.vmem [shape: f32[16,1], index: 2, kind: input, shape index: {}]   ;;  %s269_s3 = inlined_call_operand.vmem [shape: f32[16,1], index: 3, kind: input, shape index: {}]  }
   0x1   :  { %23 = vst.msk [vmem:[%s265_s4] sm:$0xff] %vm22_vm0, %v176_v0  ;;  %24 = vst.msk [vmem:[%s265_s4 + $0x8] sm:$0xff] %vm22_vm0, %v176_v0  ;;  %161 = vmatprep.subr.bf16.mxu0 %v176_v0  ;;  %v28_v1 = vld [vmem:[%s266_s0] sm:$0xff]  ;;  %163 = vmatprep.mubr.msk.bf16.mxu0 %vm177_vm2, %v176_v0  ;;  %v26_v3 = vld [vmem:[%s267_s1 + $0x8] sm:$0xff]  ;;  %vm32_vm3 = vcmask 64512   ;;  %v178_v29 = vmov 0  }
   0x2   :  { %v25_v2 = vld [vmem:[%s267_s1] sm:$0xff]  ;;  %v29_v4 = vpack.c.bf16 %v28_v1, %v28_v1  ;;  %170 = vset.pattern.permute.xlu0 %v178_v29  ;;  %171 = vset.pattern.permute.xlu1 %v178_v29  ;;  %v113_v39 = vld [vmem:[%s268_s2 + $0x8] sm:$0xff] }
   0x3   :  { %v27_v6 = vpack.c.bf16 %v26_v3, %v25_v2  ;;  %v112_v36 = vld [vmem:[%s268_s2] sm:$0xff]  ;;  %v121_v46 = vld [vmem:[%s269_s3 + $0x8] sm:$0xff] }
   0x4   :  { %v38_v5 = vsel %vm36_vm1, %v29_v4, 0  ;;  %v120_v43 = vld [vmem:[%s269_s3] sm:$0xff] }
   0x5   :  { %162 = vmatpush3.bf16.msra.mxu0 %v38_v5 }
   0x8   :  { %164 = vmatmul.mubr.msk.bf16.vlgmr.msra.gmra.mxu0 %vm32_vm3, %v27_v6  ;;  %v30_v7 = vld [vmem:[%s265_s4] sm:$0xff]  ;;  %v31_v11 = vld [vmem:[%s265_s4 + $0x8] sm:$0xff] }
  0xc8   :  { %v74_v8 = vpop.f32.mrf.mxu0 }
  0xc9   :  { %v81_v9 = vadd.f32 %v74_v8, %v30_v7 }
  0xca   :  { %v165_v10 = vpop.f32.mrf.mxu0 }
  0xcb   :  { %84 = vst.msk [vmem:[%s265_s4] sm:$0xff] %vm22_vm0, %v81_v9 }
  0xcc   :  { %v77_v12 = vpop.f32.mrf.mxu0 }
  0xcd   :  { %v82_v13 = vadd.f32 %v77_v12, %v31_v11 }
  0xce   :  { %v166_v14 = vpop.f32.mrf.mxu0 }
  0xcf   :  { %85 = vst.msk [vmem:[%s265_s4 + $0x8] sm:$0xff] %vm22_vm0, %v82_v13 }
  0xd2   :  { %v89_v15 = vld [vmem:[%s265_s4] sm:$0xff] }
  0xd3   :  { %v91_v16 = vsel %vm22_vm0, %v89_v15, 0.0 }
  0xd4   :  { %92 = vadd.xlane.f32.xlu0 %v91_v16 }
  0xd6   :  { %v90_v17 = vld [vmem:[%s265_s4 + $0x8] sm:$0xff] }
  0xd7   :  { %v94_v18 = vsel %vm22_vm0, %v90_v17, 0.0 }
  0xd8   :  { %95 = vadd.xlane.f32.xlu0 %v94_v18 }
 0x15d   :  { %v93_v19 = vpop.xlane.xlu0 %92 }
 0x15e   :  { %v98_v20 = vmul.f32 0.010204081, %v93_v19 }
 0x160   :  { %v100_v21 = vsub.f32 %v89_v15, %v98_v20 }
 0x161   :  { %v96_v22 = vpop.xlane.xlu0 %95 }
 0x162   :  { %v99_v23 = vmul.f32 0.010204081, %v96_v22  ;;  %v102_v24 = vmul.f32 %v100_v21, %v100_v21 }
 0x164   :  { %v101_v25 = vsub.f32 %v90_v17, %v99_v23  ;;  %v104_v26 = vsel %vm22_vm0, %v102_v24, 0.0 }
 0x165   :  { %105 = vadd.xlane.f32.xlu1 %v104_v26 }
 0x166   :  { %v103_v27 = vmul.f32 %v101_v25, %v101_v25 }
 0x168   :  { %v107_v28 = vsel %vm22_vm0, %v103_v27, 0.0 }
 0x169   :  { %108 = vadd.xlane.f32.xlu1 %v107_v28 }
 0x1ee   :  { %v106_v30 = vpop.xlane.xlu1 %105 }
 0x1ef   :  { %v110_v31 = vmul.f32 0.010204081, %v106_v30 }
 0x1f1   :  { %v114_v32 = vadd.f32 1e-05, %v110_v31 }
 0x1f2   :  { %v109_v33 = vpop.xlane.xlu1 %108 }
 0x1f3   :  { %172 = vrsqrt.f32 %v114_v32  ;;  %v111_v34 = vmul.f32 0.010204081, %v109_v33 }
 0x1f5   :  { %v115_v35 = vadd.f32 1e-05, %v111_v34 }
 0x1f7   :  { %174 = vrsqrt.f32 %v115_v35 }
 0x200   :  { %v173_v37 = vpop.eup %172 }
 0x201   :  { %v118_v38 = vmul.f32 %v173_v37, %v112_v36 }
 0x203   :  { %128 = vperm.xlu0 %170, %v118_v38   ;;  %v122_v42 = vmul.f32 %v118_v38, %v98_v20 }
 0x204   :  { %v175_v40 = vpop.eup %174 }
 0x205   :  { %v119_v41 = vmul.f32 %v175_v40, %v113_v39  ;;  %v124_v44 = vsub.f32 %v120_v43, %v122_v42 }
 0x207   :  { %133 = vperm.xlu1 %171, %v119_v41   ;;  %v123_v45 = vmul.f32 %v119_v41, %v99_v23 }
 0x209   :  { %v125_v47 = vsub.f32 %v121_v46, %v123_v45 }
 0x20b   :  { %140 = vperm.xlu1 %171, %v124_v44  }
 0x20f   :  { %145 = vperm.xlu1 %171, %v125_v47  }
 0x27e   :  { %v129_v48 = vpop.permute.xlu0 %128 }
 0x27f   :  { %v136_v50 = vmul.f32 %v129_v48, %v89_v15 }
 0x282   :  { %v134_v49 = vpop.permute.xlu1 %133 }
 0x283   :  { %v137_v53 = vmul.f32 %v134_v49, %v90_v17 }
 0x286   :  { %v141_v51 = vpop.permute.xlu1 %140 }
 0x287   :  { %v148_v52 = vadd.f32 %v141_v51, %v136_v50 }
 0x289   :  { %v150_v54 = vmax.f32 %v148_v52, 0.0 }
 0x28a   :  { %v146_v55 = vpop.permute.xlu1 %145 }
 0x28b   :  { %152 = vst.msk [vmem:[%s265_s4] sm:$0xff] %vm22_vm0, %v150_v54  ;;  %v149_v56 = vadd.f32 %v146_v55, %v137_v53 }
 0x28d   :  { %v151_v57 = vmax.f32 %v149_v56, 0.0 }
 0x28f   :  { %153 = vst.msk [vmem:[%s265_s4 + $0x8] sm:$0xff] %vm22_vm0, %v151_v57 }

// kernel: densenet_forward.21
= control target key start
LH: loop header
LB: loop body
LE: loop exit
PB: predicated region body
PF: predicated region fallthrough
CT: control target
= control target key end

     0   :  { %vm22_vm0 = vcmask 801792   ;;  %v177_v0 = vmov 0.0   ;;  %vm37_vm1 = vcmask 1045504   ;;  %vm178_vm2 = vmmov 0   ;;  %s269_s4 = inlined_call_operand.vmem [shape: f32[16,98], index: 4, kind: output, shape index: {}]   ;;  %s270_s0 = inlined_call_operand.vmem [shape: f32[12,98], index: 0, kind: input, shape index: {}]   ;;  %s271_s1 = inlined_call_operand.vmem [shape: f32[1,16,12], index: 1, kind: input, shape index: {}]   ;;  %s272_s2 = inlined_call_operand.vmem [shape: f32[16,1], index: 2, kind: input, shape index: {}]   ;;  %s273_s3 = inlined_call_operand.vmem [shape: f32[16,1], index: 3, kind: input, shape index: {}]  }
   0x1   :  { %23 = vst.msk [vmem:[%s269_s4] sm:$0xff] %vm22_vm0, %v177_v0  ;;  %24 = vst.msk [vmem:[%s269_s4 + $0x8] sm:$0xff] %vm22_vm0, %v177_v0  ;;  %162 = vmatprep.subr.bf16.mxu0 %v177_v0  ;;  %v28_v1 = vld [vmem:[%s270_s0] sm:$0xff]  ;;  %v29_v2 = vld [vmem:[%s270_s0 + $0x8] sm:$0xf]  ;;  %164 = vmatprep.mubr.msk.bf16.mxu0 %vm178_vm2, %v177_v0  ;;  %vm33_vm3 = vcmask 97280  }
   0x2   :  { %v25_v3 = vld [vmem:[%s271_s1] sm:$0xff]  ;;  %v30_v4 = vpack.c.bf16 %v29_v2, %v28_v1  ;;  %v26_v5 = vld [vmem:[%s271_s1 + $0x8] sm:$0xff]  ;;  %v179_v30 = vmov 0  }
   0x3   :  { %v27_v7 = vpack.c.bf16 %v26_v5, %v25_v3  ;;  %171 = vset.pattern.permute.xlu0 %v179_v30  ;;  %172 = vset.pattern.permute.xlu1 %v179_v30  ;;  %v113_v37 = vld [vmem:[%s272_s2] sm:$0xff]  ;;  %v114_v40 = vld [vmem:[%s272_s2 + $0x8] sm:$0xff] }
   0x4   :  { %v39_v6 = vsel %vm37_vm1, %v30_v4, 0  ;;  %v121_v44 = vld [vmem:[%s273_s3] sm:$0xff]  ;;  %v122_v47 = vld [vmem:[%s273_s3 + $0x8] sm:$0xff] }
   0x5   :  { %163 = vmatpush3.bf16.msra.mxu0 %v39_v6 }
   0x8   :  { %165 = vmatmul.mubr.msk.bf16.vlgmr.msra.gmra.mxu0 %vm33_vm3, %v27_v7  ;;  %v31_v8 = vld [vmem:[%s269_s4] sm:$0xff]  ;;  %v32_v12 = vld [vmem:[%s269_s4 + $0x8] sm:$0xff] }
  0xc8   :  { %v75_v9 = vpop.f32.mrf.mxu0 }
  0xc9   :  { %v82_v10 = vadd.f32 %v75_v9, %v31_v8 }
  0xca   :  { %v166_v11 = vpop.f32.mrf.mxu0 }
  0xcb   :  { %85 = vst.msk [vmem:[%s269_s4] sm:$0xff] %vm22_vm0, %v82_v10 }
  0xcc   :  { %v78_v13 = vpop.f32.mrf.mxu0 }
  0xcd   :  { %v83_v14 = vadd.f32 %v78_v13, %v32_v12 }
  0xce   :  { %v167_v15 = vpop.f32.mrf.mxu0 }
  0xcf   :  { %86 = vst.msk [vmem:[%s269_s4 + $0x8] sm:$0xff] %vm22_vm0, %v83_v14 }
  0xd2   :  { %v90_v16 = vld [vmem:[%s269_s4] sm:$0xff] }
  0xd3   :  { %v92_v17 = vsel %vm22_vm0, %v90_v16, 0.0 }
  0xd4   :  { %93 = vadd.xlane.f32.xlu0 %v92_v17 }
  0xd6   :  { %v91_v18 = vld [vmem:[%s269_s4 + $0x8] sm:$0xff] }
  0xd7   :  { %v95_v19 = vsel %vm22_vm0, %v91_v18, 0.0 }
  0xd8   :  { %96 = vadd.xlane.f32.xlu0 %v95_v19 }
 0x15d   :  { %v94_v20 = vpop.xlane.xlu0 %93 }
 0x15e   :  { %v99_v21 = vmul.f32 0.010204081, %v94_v20 }
 0x160   :  { %v101_v22 = vsub.f32 %v90_v16, %v99_v21 }
 0x161   :  { %v97_v23 = vpop.xlane.xlu0 %96 }
 0x162   :  { %v100_v24 = vmul.f32 0.010204081, %v97_v23  ;;  %v103_v25 = vmul.f32 %v101_v22, %v101_v22 }
 0x164   :  { %v102_v26 = vsub.f32 %v91_v18, %v100_v24  ;;  %v105_v27 = vsel %vm22_vm0, %v103_v25, 0.0 }
 0x165   :  { %106 = vadd.xlane.f32.xlu1 %v105_v27 }
 0x166   :  { %v104_v28 = vmul.f32 %v102_v26, %v102_v26 }
 0x168   :  { %v108_v29 = vsel %vm22_vm0, %v104_v28, 0.0 }
 0x169   :  { %109 = vadd.xlane.f32.xlu1 %v108_v29 }
 0x1ee   :  { %v107_v31 = vpop.xlane.xlu1 %106 }
 0x1ef   :  { %v111_v32 = vmul.f32 0.010204081, %v107_v31 }
 0x1f1   :  { %v115_v33 = vadd.f32 1e-05, %v111_v32 }
 0x1f2   :  { %v110_v34 = vpop.xlane.xlu1 %109 }
 0x1f3   :  { %173 = vrsqrt.f32 %v115_v33  ;;  %v112_v35 = vmul.f32 0.010204081, %v110_v34 }
 0x1f5   :  { %v116_v36 = vadd.f32 1e-05, %v112_v35 }
 0x1f7   :  { %175 = vrsqrt.f32 %v116_v36 }
 0x200   :  { %v174_v38 = vpop.eup %173 }
 0x201   :  { %v119_v39 = vmul.f32 %v174_v38, %v113_v37 }
 0x203   :  { %129 = vperm.xlu0 %171, %v119_v39   ;;  %v123_v43 = vmul.f32 %v119_v39, %v99_v21 }
 0x204   :  { %v176_v41 = vpop.eup %175 }
 0x205   :  { %v120_v42 = vmul.f32 %v176_v41, %v114_v40  ;;  %v125_v45 = vsub.f32 %v121_v44, %v123_v43 }
 0x207   :  { %134 = vperm.xlu1 %172, %v120_v42   ;;  %v124_v46 = vmul.f32 %v120_v42, %v100_v24 }
 0x209   :  { %v126_v48 = vsub.f32 %v122_v47, %v124_v46 }
 0x20b   :  { %141 = vperm.xlu1 %172, %v125_v45  }
 0x20f   :  { %146 = vperm.xlu1 %172, %v126_v48  }
 0x27e   :  { %v130_v49 = vpop.permute.xlu0 %129 }
 0x27f   :  { %v137_v51 = vmul.f32 %v130_v49, %v90_v16 }
 0x282   :  { %v135_v50 = vpop.permute.xlu1 %134 }
 0x283   :  { %v138_v54 = vmul.f32 %v135_v50, %v91_v18 }
 0x286   :  { %v142_v52 = vpop.permute.xlu1 %141 }
 0x287   :  { %v149_v53 = vadd.f32 %v142_v52, %v137_v51 }
 0x289   :  { %v151_v55 = vmax.f32 %v149_v53, 0.0 }
 0x28a   :  { %v147_v56 = vpop.permute.xlu1 %146 }
 0x28b   :  { %153 = vst.msk [vmem:[%s269_s4] sm:$0xff] %vm22_vm0, %v151_v55  ;;  %v150_v57 = vadd.f32 %v147_v56, %v138_v54 }
 0x28d   :  { %v152_v58 = vmax.f32 %v150_v57, 0.0 }
 0x28f   :  { %154 = vst.msk [vmem:[%s269_s4 + $0x8] sm:$0xff] %vm22_vm0, %v152_v58 }

// kernel: densenet_forward.20
= control target key start
LH: loop header
LB: loop body
LE: loop exit
PB: predicated region body
PF: predicated region fallthrough
CT: control target
= control target key end

     0   :  { %s470_s15 = smov 0   ;;  %s519_s0 = inlined_call_operand.vmem [shape: bf16[160,98], index: 0, kind: input, shape index: {}]   ;;  %s520_s1 = inlined_call_operand.vmem [shape: f32[2,4,80], index: 1, kind: input, shape index: {}]   ;;  %s521_s2 = inlined_call_operand.vmem [shape: f32[4,1], index: 2, kind: input, shape index: {}]   ;;  %s522_s3 = inlined_call_operand.vmem [shape: f32[4,1], index: 3, kind: input, shape index: {}]   ;;  %s523_s4 = inlined_call_operand.vmem [shape: f32[4,98], index: 4, kind: output, shape index: {}]  }
   0x1 LB: > { %s476_s16 = sadd.s32 4294967295, %s439_s15   ;;  %p379_p0 = scmp.ge.s32.totalorder %s439_s15, 1  ;;  %s439_s15 = sphi %s470_s15, %s14_s15  }
   0x2   : > { %p167_p1 = scmp.lt.s32.totalorder %s439_s15, 3 }
   0x4   : > { %p168_p2 = pnand %p379_p0, %p167_p1 }
   0x5   : > { %s192_s17 = smul.u32 (!%p168_p2), 10, %s476_s16  ;;  %p198_p3 = scmp.lt.s32.totalorder (!%p168_p2), %s476_s16, 1 }
   0x6   : > { %171 = sbr.rel (%p168_p2) target bundleno = 680 (0x2a8), region = 36  ;;  %p382_p5 = scmp.ne.s32.totalorder (!%p168_p2), %s476_s16, 0 }
   0x7   : > { %p193_p4 = scmp.lt.s32.totalorder (!%p168_p2), %s192_s17, 19 }
   0xb   : > { %s199_s18 = scalar_select %p198_p3, %s476_s16, 1 }
   0xc   : > { %s525_s17 = smov (!%p193_p4, %s192_s17), 19  ;;  %206 = sbr.rel (%p382_p5) target bundleno = 19 (0x13), region = 40 }
   0xd   : > { %s381_s19 = sshll.u32 %s199_s18, 2  ;;  %s380_s20 = sshll.u32 %s525_s17, 2 }
   0xe   : > { %s201_s23 = scalar_lea.vmem %s520_s1, %s381_s19  ;;  %s196_s26 = scalar_lea.vmem %s519_s0, %s380_s20 }
  0x11   : > { %vm207_vm0 = vcmask 797696   ;;  %v441_v0 = vmov 0.0  }
  0x12   : > { %208 = vst.msk [vmem:[%s523_s4] sm:$0xf] %vm207_vm0, %v441_v0 }
  0x13 PF: > { %v424_v1 = vld [vmem:[%s196_s26 + $0x20] sm:$0xff]   ;;  %v442_v2 = vmov 0.0   ;;  %v425_v3 = vld [vmem:[%s196_s26 + $0x18] sm:$0xff]   ;;  %vm443_vm1 = vmmov 0   ;;  %v426_v4 = vld [vmem:[%s196_s26 + $0x10] sm:$0xff]   ;;  %vm252_vm2 = vcmask 654336  }
  0x14   : > { %398 = vmatprep.subr.bf16.mxu0 %v442_v2  ;;  %408 = vmatprep.mubr.msk.bf16.mxu0 %vm443_vm1, %v442_v2  ;;  %v427_v5 = vld [vmem:[%s196_s26 + $0x8] sm:$0xff]   ;;  %v428_v6 = vld [vmem:[%s196_s26] sm:$0xff]   ;;  %vm297_vm3 = vcmask 797696   ;;  %p389_p6 = scmp.ne.s32.totalorder %s476_s16, 1 }
  0x15   : > { %399 = vmatpush3.bf16.msra.mxu0 %v424_v1  ;;  %v209_v7 = vld [vmem:[%s201_s23] sm:$0xf] }
  0x16   : > { %400 = vmatprep.subr.bf16.mxu0 %v442_v2  ;;  %v210_v8 = vpack.c.bf16 %v209_v7, %v209_v7 }
  0x19   : > { %401 = vmatpush3.bf16.msra.mxu0 %v425_v3  ;;  %v221_v9 = vld [vmem:[%s523_s4] sm:$0xf] }
  0x1a   : > { %402 = vmatprep.subr.bf16.mxu0 %v442_v2 }
  0x1d   : > { %403 = vmatpush3.bf16.msra.mxu0 %v426_v4 }
  0x1e   : > { %404 = vmatprep.subr.bf16.mxu0 %v442_v2 }
  0x21   : > { %405 = vmatpush3.bf16.msra.mxu0 %v427_v5 }
  0x22   : > { %406 = vmatprep.subr.bf16.mxu0 %v442_v2 }
  0x25   : > { %407 = vmatpush3.bf16.msra.mxu0 %v428_v6 }
  0x28   : > { %409 = vmatmul.mubr.msk.bf16.vlgmr.msra.gmra.mxu0 %vm252_vm2, %v210_v8 }
  0xe8   : > { %v290_v10 = vpop.f32.mrf.mxu0 }
  0xe9   : > { %v296_v11 = vadd.f32 %v290_v10, %v221_v9 }
  0xea   : > { %v410_v12 = vpop.f32.mrf.mxu0  ;;  %302 = sbr.rel (%p389_p6) target bundleno = 680 (0x2a8), region = 44 }
  0xeb   : > { %298 = vst.msk [vmem:[%s523_s4] sm:$0xf] %vm297_vm3, %v296_v11 }
  0xec   : > { %v293_v13 = vpop.f32.mrf.mxu0 }
  0xee   : > { %v411_v14 = vpop.f32.mrf.mxu0 }
  0xef   : > { %v444_v22 = vmov 0   ;;  %v315_v26 = vld [vmem:[%s521_s2] sm:$0xf] }
  0xf0   : > { %429 = vset.pattern.permute.xlu1 %v444_v22  ;;  %430 = vset.pattern.permute.xlu0 %v444_v22  ;;  %v319_v29 = vld [vmem:[%s522_s3] sm:$0xf] }
  0xf2   : > { %v303_v15 = vld [vmem:[%s523_s4] sm:$0xf] }
  0xf3   : > { %v304_v16 = vsel %vm297_vm3, %v303_v15, 0.0 }
  0xf4   : > { %305 = vadd.xlane.f32.xlu0 %v304_v16 }
 0x17d   : > { %v306_v17 = vpop.xlane.xlu0 %305 }
 0x17e   : > { %v308_v18 = vmul.f32 0.010204081, %v306_v17 }
 0x180   : > { %v309_v19 = vsub.f32 %v303_v15, %v308_v18 }
 0x182   : > { %v310_v20 = vmul.f32 %v309_v19, %v309_v19 }
 0x184   : > { %v311_v21 = vsel %vm297_vm3, %v310_v20, 0.0 }
 0x185   : > { %312 = vadd.xlane.f32.xlu0 %v311_v21 }
 0x20e   : > { %v313_v23 = vpop.xlane.xlu0 %312 }
 0x20f   : > { %v314_v24 = vmul.f32 0.010204081, %v313_v23 }
 0x211   : > { %v316_v25 = vadd.f32 1e-05, %v314_v24 }
 0x213   : > { %431 = vrsqrt.f32 %v316_v25 }
 0x220   : > { %v432_v27 = vpop.eup %431 }
 0x221   : > { %v318_v28 = vmul.f32 %v432_v27, %v315_v26 }
 0x223   : > { %324 = vperm.xlu1 %429, %v318_v28   ;;  %v320_v30 = vmul.f32 %v318_v28, %v308_v18 }
 0x225   : > { %v321_v31 = vsub.f32 %v319_v29, %v320_v30 }
 0x227   : > { %330 = vperm.xlu1 %429, %v321_v31  }
 0x29e   : > { %v325_v32 = vpop.permute.xlu1 %324 }
 0x29f   : > { %v327_v33 = vmul.f32 %v325_v32, %v303_v15 }
 0x2a2   : > { %v331_v34 = vpop.permute.xlu1 %330 }
 0x2a3   : > { %v333_v35 = vadd.f32 %v331_v34, %v327_v33 }
 0x2a5   : > { %v334_v36 = vmax.f32 %v333_v35, 0.0 }
 0x2a7   : > { %335 = vst.msk [vmem:[%s523_s4] sm:$0xf] %vm297_vm3, %v334_v36 }
 0x2a8 PF: > { %s14_s15 = sadd.s32 1, %s439_s15  }
 0x2a9   : > { %p11_p7 = scmp.ge.s32.totalorder %s14_s15, 4  }
 0x2ab   :  { %13 = sbr.rel (!%p11_p7) target bundleno = 1 (0x1), region = 73 }

// kernel: densenet_forward.23
= control target key start
LH: loop header
LB: loop body
LE: loop exit
PB: predicated region body
PF: predicated region fallthrough
CT: control target
= control target key end

     0   :  { %vm31_vm0 = vcmask 394240   ;;  %s541_s0 = inlined_call_operand.vmem [shape: f32[16,2,49], index: 0, kind: input, shape index: {}]   ;;  %s542_s1 = inlined_call_operand.vmem [shape: f32[16,10], index: 1, kind: input, shape index: {}]   ;;  %s543_s2 = inlined_call_operand.vmem [shape: f32[1,10], index: 2, kind: input, shape index: {}]   ;;  %s544_s3 = inlined_call_operand.hbm [shape: f32[2,10], index: 3, kind: output, shape index: {}]  }
   0x1   :  { %v15_v0 = vld [vmem:[%s541_s0] sm:$0x3]  ;;  %v17_v1 = vld [vmem:[%s541_s0 + $0x4] sm:$0x3]  ;;  %v16_v4 = vld [vmem:[%s541_s0 + $0x2] sm:$0x3] }
   0x2   :  { %v32_v2 = vsel %vm31_vm0, %v15_v0, 0.0  ;;  %v38_v3 = vsel %vm31_vm0, %v17_v1, 0.0  ;;  %v18_v5 = vld [vmem:[%s541_s0 + $0x6] sm:$0x3]  ;;  %v35_v6 = vsel %vm31_vm0, %v16_v4, 0.0 }
   0x3   :  { %33 = vadd.xlane.f32.xlu0 %v32_v2  ;;  %39 = vadd.xlane.f32.xlu1 %v38_v3  ;;  %v41_v7 = vsel %vm31_vm0, %v18_v5, 0.0  ;;  %v19_v8 = vld [vmem:[%s541_s0 + $0x8] sm:$0x3]  ;;  %v20_v9 = vld [vmem:[%s541_s0 + $0xa] sm:$0x3] }
   0x4   :  { %v44_v10 = vsel %vm31_vm0, %v19_v8, 0.0  ;;  %v47_v11 = vsel %vm31_vm0, %v20_v9, 0.0  ;;  %v21_v12 = vld [vmem:[%s541_s0 + $0xc] sm:$0x3]  ;;  %v22_v13 = vld [vmem:[%s541_s0 + $0xe] sm:$0x3] }
   0x7   :  { %36 = vadd.xlane.f32.xlu0 %v35_v6  ;;  %42 = vadd.xlane.f32.xlu1 %v41_v7 }
   0x8   :  { %8 = vsyncpa [#allocation3], 0  ;;  %v50_v14 = vsel %vm31_vm0, %v21_v12, 0.0  ;;  %v53_v15 = vsel %vm31_vm0, %v22_v13, 0.0  ;;  %v23_v16 = vld [vmem:[%s541_s0 + $0x10] sm:$0x3]  ;;  %v105_v34 = vlaneseq }
   0x9   :  { %v24_v17 = vld [vmem:[%s541_s0 + $0x12] sm:$0x3]  ;;  %v56_v18 = vsel %vm31_vm0, %v23_v16, 0.0  ;;  %v25_v20 = vld [vmem:[%s541_s0 + $0x14] sm:$0x3]  ;;  %v97_v38 = vld [vmem:[%s542_s1] sm:$0xff] }
   0xa   :  { %v59_v19 = vsel %vm31_vm0, %v24_v17, 0.0  ;;  %v26_v21 = vld [vmem:[%s541_s0 + $0x16] sm:$0x3]  ;;  %v62_v22 = vsel %vm31_vm0, %v25_v20, 0.0  ;;  %v27_v24 = vld [vmem:[%s541_s0 + $0x18] sm:$0x3]  ;;  %v101_v40 = vcombine.high %v97_v38, %v97_v38 }
   0xb   :  { %45 = vadd.xlane.f32.xlu0 %v44_v10  ;;  %48 = vadd.xlane.f32.xlu1 %v47_v11  ;;  %v65_v23 = vsel %vm31_vm0, %v26_v21, 0.0  ;;  %v28_v25 = vld [vmem:[%s541_s0 + $0x1a] sm:$0x3]  ;;  %v68_v26 = vsel %vm31_vm0, %v27_v24, 0.0  ;;  %v29_v28 = vld [vmem:[%s541_s0 + $0x1c] sm:$0x3] }
   0xc   :  { %v71_v27 = vsel %vm31_vm0, %v28_v25, 0.0  ;;  %v30_v29 = vld [vmem:[%s541_s0 + $0x1e] sm:$0x3]  ;;  %v74_v30 = vsel %vm31_vm0, %v29_v28, 0.0  ;;  %v392_v32 = vmov 1966171168  }
   0xd   :  { %v77_v31 = vsel %vm31_vm0, %v30_v29, 0.0  ;;  %v103_v33 = vunpack.c.l.s4 %v392_v32  ;;  %v106_v36 = vshrl.u32 %v105_v34, 7  ;;  %v98_v49 = vld [vmem:[%s542_s1 + $0x8] sm:$0xff]  ;;  %vm295_vm1 = vcmask 74752   ;;  %s393_s21 = smov [#allocation2]  }
   0xe   :  { %v150_v6 = vcombine.high %v98_v49, %v98_v49  ;;  %s353_s22 = sshll.u32 %s393_s21, 4  ;;  %s354_s22 = int_to_ptr.vmem [resolvable:$true] %s353_s22 }
   0xf   :  { %51 = vadd.xlane.f32.xlu0 %v50_v14  ;;  %54 = vadd.xlane.f32.xlu1 %v53_v15  ;;  %v104_v35 = vunpack.c.0.s8 %v103_v33  ;;  %v486_v44 = vsub.s32 0, %v106_v36  ;;  %p375_p1 = scmp.lt.s32.totalorder %s354_s22, %s354_s22 }
  0x11   :  { %v478_v37 = vsub.s32 %v104_v35, %v106_v36 }
  0x13   :  { %57 = vadd.xlane.f32.xlu0 %v56_v18  ;;  %60 = vadd.xlane.f32.xlu1 %v59_v19  ;;  %v108_v39 = vrot.slane %v97_v38, %v478_v37  ;;  %v115_v42 = vrot.slane %v101_v40, %v478_v37  ;;  %v157_v56 = vrot.slane %v98_v49, %v478_v37 }
  0x15   :  { %v116_v41 = vcombine.high %v108_v39, %v108_v39  ;;  %v124_v43 = vrot.slane %v108_v39, %v478_v37  ;;  %v117_v48 = vcombine.high %v115_v42, %v115_v42  ;;  %v131_v55 = vrot.slane %v115_v42, %v478_v37 }
  0x16   :  { %v165_v5 = vcombine.high %v157_v56, %v157_v56  ;;  %v173_v14 = vrot.slane %v157_v56, %v478_v37 }
  0x17   :  { %63 = vadd.xlane.f32.xlu0 %v62_v22  ;;  %66 = vadd.xlane.f32.xlu1 %v65_v23  ;;  %v138_v45 = vrot.slane %v116_v41, %v478_v37  ;;  %v146_v46 = vcombine.high %v124_v43, %v124_v43  ;;  %v202_v52 = vrot.slane %v124_v43, %v486_v44 }
  0x18   :  { %v145_v60 = vrot.slane %v117_v48, %v478_v37  ;;  %v147_v63 = vcombine.high %v131_v55, %v131_v55  ;;  %v218_v3 = vrot.slane %v131_v55, %v486_v44  ;;  %v187_v21 = vrot.slane %v165_v5, %v478_v37 }
  0x19   :  { %v148_v47 = vcombine.high %v138_v45, %v138_v45  ;;  %v210_v54 = vrot.slane %v146_v46, %v486_v44  ;;  %v206_v58 = vrot.slane %v138_v45, %v486_v44  ;;  %v164_v22 = vrot.slane %v150_v6, %v478_v37 }
  0x1a   :  { %v149_v4 = vcombine.high %v145_v60, %v145_v60  ;;  %v222_v10 = vrot.slane %v145_v60, %v486_v44  ;;  %v226_v13 = vrot.slane %v147_v63, %v486_v44  ;;  %v234_v33 = vrot.slane %v173_v14, %v486_v44 }
  0x1b   :  { %69 = vadd.xlane.f32.xlu0 %v68_v26  ;;  %72 = vadd.xlane.f32.xlu1 %v71_v27  ;;  %v214_v59 = vrot.slane %v148_v47, %v486_v44  ;;  %v238_v35 = vrot.slane %v187_v21, %v486_v44  ;;  %v195_v36 = vcombine.high %v173_v14, %v173_v14 }
  0x1c   :  { %v230_v20 = vrot.slane %v149_v4, %v486_v44  ;;  %v166_v38 = vcombine.high %v164_v22, %v164_v22  ;;  %v197_v42 = vcombine.high %v187_v21, %v187_v21 }
  0x1f   :  { %75 = vadd.xlane.f32.xlu0 %v74_v30  ;;  %78 = vadd.xlane.f32.xlu1 %v77_v31 }
  0x8c   :  { %v34_v50 = vpop.xlane.xlu0 %33  ;;  %v40_v51 = vpop.xlane.xlu1 %39 }
  0x8d   :  { %v81_v53 = vmul.f32 0.020408163, %v34_v50  ;;  %v83_v57 = vmul.f32 0.020408163, %v40_v51  ;;  %v242_v51 = vrot.slane %v195_v36, %v486_v44 }
  0x8f   :  { %v279_v0 = vmul.f32 %v202_v52, %v81_v53  ;;  %v281_v7 = vmul.f32 %v210_v54, %v83_v57  ;;  %v180_v52 = vrot.slane %v164_v22, %v478_v37  ;;  %v194_v53 = vrot.slane %v166_v38, %v478_v37 }
  0x90   :  { %v37_v61 = vpop.xlane.xlu0 %36  ;;  %v43_v62 = vpop.xlane.xlu1 %42  ;;  %v246_v57 = vrot.slane %v197_v42, %v486_v44 }
  0x91   :  { %v82_v1 = vmul.f32 0.020408163, %v37_v61  ;;  %v84_v2 = vmul.f32 0.020408163, %v43_v62  ;;  %v296_v15 = vsel %vm295_vm1, %v279_v0, 0.0  ;;  %v299_v23 = vsel %vm295_vm1, %v281_v7, 0.0 }
  0x92   :  { %v198_v6 = vcombine.high %v194_v53, %v194_v53 }
  0x93   :  { %v280_v8 = vmul.f32 %v206_v58, %v82_v1  ;;  %v282_v9 = vmul.f32 %v214_v59, %v84_v2  ;;  %v250_v1 = vrot.slane %v180_v52, %v486_v44  ;;  %v254_v2 = vrot.slane %v194_v53, %v486_v44 }
  0x94   :  { %v46_v11 = vpop.xlane.xlu0 %45  ;;  %v49_v12 = vpop.xlane.xlu1 %48 }
  0x95   :  { %v297_v16 = vsel %vm295_vm1, %v280_v8, 0.0  ;;  %v85_v17 = vmul.f32 0.020408163, %v46_v11  ;;  %v86_v18 = vmul.f32 0.020408163, %v49_v12  ;;  %v301_v24 = vsel %vm295_vm1, %v282_v9, 0.0 }
  0x96   :  { %v298_v19 = vadd.f32 %v297_v16, %v296_v15 }
  0x97   :  { %v283_v25 = vmul.f32 %v218_v3, %v85_v17  ;;  %v284_v26 = vmul.f32 %v222_v10, %v86_v18  ;;  %v196_v3 = vcombine.high %v180_v52, %v180_v52  ;;  %v262_v18 = vrot.slane %v198_v6, %v486_v44 }
  0x98   :  { %v300_v27 = vadd.f32 %v299_v23, %v298_v19  ;;  %v52_v28 = vpop.xlane.xlu0 %51  ;;  %v55_v29 = vpop.xlane.xlu1 %54 }
  0x99   :  { %v303_v30 = vsel %vm295_vm1, %v283_v25, 0.0  ;;  %v87_v31 = vmul.f32 0.020408163, %v52_v28  ;;  %v88_v32 = vmul.f32 0.020408163, %v55_v29  ;;  %v305_v39 = vsel %vm295_vm1, %v284_v26, 0.0 }
  0x9a   :  { %v302_v34 = vadd.f32 %v301_v24, %v300_v27  ;;  %v258_v14 = vrot.slane %v196_v3, %v486_v44  ;;  %v361_v44 = vld [vmem:[%s543_s2] ss:$0 sm:$0xff]  ;;  %s370_s2 = scalar_lea.vmem %s354_s22, 32 }
  0x9b   :  { %v285_v40 = vmul.f32 %v226_v13, %v87_v31  ;;  %v286_v41 = vmul.f32 %v230_v20, %v88_v32  ;;  %p371_p0 = scmp.ne.s32.totalorder %s354_s22, %s370_s2  ;;  %p376_p2 = scmp.lt.s32.totalorder %s370_s2, %s370_s2 }
  0x9c   :  { %v304_v43 = vadd.f32 %v303_v30, %v302_v34  ;;  %v58_v45 = vpop.xlane.xlu0 %57  ;;  %v61_v46 = vpop.xlane.xlu1 %60 }
  0x9d   :  { %v307_v47 = vsel %vm295_vm1, %v285_v40, 0.0  ;;  %v89_v48 = vmul.f32 0.020408163, %v58_v45  ;;  %v90_v49 = vmul.f32 0.020408163, %v61_v46  ;;  %v309_v54 = vsel %vm295_vm1, %v286_v41, 0.0  ;;  %p377_p3 = por %p376_p2, %p375_p1 }
  0x9e   :  { %v306_v50 = vadd.f32 %v305_v39, %v304_v43 }
  0x9f   :  { %v287_v55 = vmul.f32 %v234_v33, %v89_v48  ;;  %v288_v56 = vmul.f32 %v238_v35, %v90_v49  ;;  %p378_p4 = pnand %p377_p3, %p371_p0 }
  0xa0   :  { %v308_v58 = vadd.f32 %v307_v47, %v306_v50  ;;  %v64_v59 = vpop.xlane.xlu0 %63  ;;  %v67_v60 = vpop.xlane.xlu1 %66 }
  0xa1   :  { %v311_v61 = vsel %vm295_vm1, %v287_v55, 0.0  ;;  %v91_v62 = vmul.f32 0.020408163, %v64_v59  ;;  %v92_v63 = vmul.f32 0.020408163, %v67_v60  ;;  %v313_v37 = vsel %vm295_vm1, %v288_v56, 0.0 }
  0xa2   :  { %v310_v0 = vadd.f32 %v309_v54, %v308_v58 }
  0xa3   :  { %v289_v4 = vmul.f32 %v242_v51, %v91_v62  ;;  %v290_v5 = vmul.f32 %v246_v57, %v92_v63 }
  0xa4   :  { %v312_v7 = vadd.f32 %v311_v61, %v310_v0  ;;  %v70_v8 = vpop.xlane.xlu0 %69  ;;  %v73_v9 = vpop.xlane.xlu1 %72 }
  0xa5   :  { %v315_v10 = vsel %vm295_vm1, %v289_v4, 0.0  ;;  %v93_v11 = vmul.f32 0.020408163, %v70_v8  ;;  %v94_v12 = vmul.f32 0.020408163, %v73_v9  ;;  %v317_v15 = vsel %vm295_vm1, %v290_v5, 0.0 }
  0xa6   :  { %v314_v13 = vadd.f32 %v313_v37, %v312_v7 }
  0xa7   :  { %v291_v16 = vmul.f32 %v250_v1, %v93_v11  ;;  %v292_v17 = vmul.f32 %v254_v2, %v94_v12 }
  0xa8   :  { %v316_v19 = vadd.f32 %v315_v10, %v314_v13  ;;  %v76_v20 = vpop.xlane.xlu0 %75  ;;  %v79_v21 = vpop.xlane.xlu1 %78 }
  0xa9   :  { %v319_v22 = vsel %vm295_vm1, %v291_v16, 0.0  ;;  %v95_v23 = vmul.f32 0.020408163, %v76_v20  ;;  %v96_v24 = vmul.f32 0.020408163, %v79_v21  ;;  %v321_v26 = vsel %vm295_vm1, %v292_v17, 0.0 }
  0xaa   :  { %v318_v25 = vadd.f32 %v317_v15, %v316_v19 }
  0xab   :  { %v293_v27 = vmul.f32 %v258_v14, %v95_v23  ;;  %v294_v28 = vmul.f32 %v262_v18, %v96_v24 }
  0xac   :  { %v320_v29 = vadd.f32 %v319_v22, %v318_v25 }
  0xad   :  { %v323_v30 = vsel %vm295_vm1, %v293_v27, 0.0  ;;  %v325_v32 = vsel %vm295_vm1, %v294_v28, 0.0 }
  0xae   :  { %v322_v31 = vadd.f32 %v321_v26, %v320_v29 }
  0xb0   :  { %v324_v33 = vadd.f32 %v323_v30, %v322_v31 }
  0xb2   :  { %v326_v34 = vadd.f32 %v325_v32, %v324_v33 }
  0xb4   :  { %v334_v35 = vadd.f32 %v361_v44, %v326_v34 }
  0xb6   :  { %v335_v36 = vsel %vm295_vm1, %v334_v35, -inf }
  0xb7   :  { %336 = vmax.xlane.f32.xlu0 %v335_v36 }
 0x140   :  { %v337_v38 = vpop.xlane.xlu0 %336 }
 0x141   :  { %v338_v39 = vsub.f32 %v334_v35, %v337_v38 }
 0x143   :  { %v339_v40 = vmul.f32 1.442695, %v338_v39 }
 0x145   :  { %366 = vpow2.f32 %v339_v40 }
 0x152   :  { %v367_v41 = vpop.eup %366 }
 0x153   :  { %v341_v42 = vsel %vm295_vm1, %v367_v41, 0.0 }
 0x154   :  { %342 = vadd.xlane.f32.xlu1 %v341_v42 }
 0x1dd   :  { %v343_v43 = vpop.xlane.xlu1 %342 }
 0x1de   :  { %368 = vrcp.f32 %v343_v43 }
 0x1eb   :  { %v369_v45 = vpop.eup %368 }
 0x1ec   :  { %v345_v46 = vmul.f32 %v369_v45, %v367_v41 }
 0x1ee   :  { %346 = vst.msk [vmem:[#allocation2] sm:$0x3] %vm295_vm1, %v345_v46 }
 0x1ef   :  { %381 = shalt.err (!%p378_p4)
}
 0x1f0   :  { %356 = dma.vmem_to_hbm [thread:$0]  %s354_s22, 32, %s544_s3, [#allocation3]  }
 0x1f1   :  { %390 = dma.done.wait [#allocation3], 32  }
 0x1f2   :  { %391 = vsyncadd [#allocation3], 4294967264 }
 0x1f3   :  { %360 = vsyncpa [#allocation3], 1 }

</bundles_post_ra>
